<compile_context>
chip_gen: v7x
topology: tpu7x:2x2x1
jax: 0.10.0
libtpu: 0.0.40
codegen_flags: <defaults>
</compile_context>

<pallas_src>
import functools

import jax
import jax.numpy as jnp
from jax import lax
from jax.experimental import pallas as pl
from jax.experimental.pallas import tpu as pltpu


def _round_up(x, m):
    return (x + m - 1) // m * m


_COMPILER_PARAMS = pltpu.CompilerParams(
    dimension_semantics=("parallel",),
    vmem_limit_bytes=32 * 1024 * 1024,
)


# ---------------------------------------------------------------------------
# In-kernel helpers
# ---------------------------------------------------------------------------
def _conv_from_window(a_u, w_ref, offs, tm):
    """3x3 conv on one raster tile as a single fused MXU contraction.

    a_u  : (tm + 2*hh, Cin) bf16 activated window (halo rows included)
    w_ref: (9*Cin, Cout)    bf16 taps stacked (dy, dx)-major
    offs : static tuple of the 9 raster offsets dy*p + dx - (p+1)
    returns (tm, Cout) float32
    """
    cin = a_u.shape[1]
    hh = (a_u.shape[0] - tm) // 2
    taps = [a_u[hh + o:hh + o + tm] for o in offs]
    if cin >= 8:
        # One long-K matmul (K = 9*Cin) instead of 9 short ones.
        lhs = jnp.concatenate(taps, axis=1)
        return jnp.dot(lhs, w_ref[...], preferred_element_type=jnp.float32)
    # Tiny-Cin first layer (Cin = image_channels): 9 small dots.
    acc = jnp.zeros((tm, w_ref.shape[1]), jnp.float32)
    for t, tap in enumerate(taps):
        acc = acc + jnp.dot(tap, w_ref[t * cin:(t + 1) * cin, :],
                            preferred_element_type=jnp.float32)
    return acc


def _preact(xf_ref, pre_ref, post_ref, mf_ref, mpre_ref, mpost_ref,
            scale_ref, shift_ref):
    """a = relu(y*scale + shift) * mask on tile + halo rows, in bf16."""
    u = jnp.concatenate([pre_ref[...], xf_ref[...], post_ref[...]], axis=0)
    m = jnp.concatenate([mpre_ref[...], mf_ref[...], mpost_ref[...]], axis=0)
    a = jnp.maximum(u.astype(jnp.float32) * scale_ref[...] + shift_ref[...], 0.0)
    return (a * m).astype(jnp.bfloat16)


# ---------------------------------------------------------------------------
# Pallas kernels
# ---------------------------------------------------------------------------
def _conv_plain_kernel(xf_ref, pre_ref, post_ref, w_ref, y_ref, *, offs):
    """Layer 0: raw conv of the zero-padded input (ReLU fused into consumer)."""
    tm = xf_ref.shape[0]
    a_u = jnp.concatenate([pre_ref[...], xf_ref[...], post_ref[...]], axis=0)
    acc = _conv_from_window(a_u, w_ref, offs, tm)
    y_ref[...] = acc.astype(y_ref.dtype)


def _act_conv_stats_kernel(xf_ref, pre_ref, post_ref, mf_ref, mpre_ref,
                           mpost_ref, scale_ref, shift_ref, w_ref,
                           y_ref, stats_ref, *, offs):
    """Middle layer: fused (prev BN+ReLU+mask) -> conv -> raw y + BN partial sums."""
    tm = xf_ref.shape[0]
    a_u = _preact(xf_ref, pre_ref, post_ref, mf_ref, mpre_ref, mpost_ref,
                  scale_ref, shift_ref)
    acc = _conv_from_window(a_u, w_ref, offs, tm)
    y_ref[...] = acc.astype(y_ref.dtype)
    m = mf_ref[...]                                     # (tm, 1) output-row mask
    s = jnp.sum(acc * m, axis=0, keepdims=True)         # (1, Cout)
    ss = jnp.sum(acc * acc * m, axis=0, keepdims=True)  # (1, Cout)
    stats_ref[0] = jnp.concatenate([s, ss], axis=0)     # (2, Cout) per-tile slot


def _act_conv_residual_kernel(xf_ref, pre_ref, post_ref, mf_ref, mpre_ref,
                              mpost_ref, scale_ref, shift_ref, w_ref,
                              xres_ref, o_ref, *, offs):
    """Last layer: fused (prev BN+ReLU+mask) -> conv -> out = x - noise."""
    tm = xf_ref.shape[0]
    a_u = _preact(xf_ref, pre_ref, post_ref, mf_ref, mpre_ref, mpost_ref,
                  scale_ref, shift_ref)
    acc = _conv_from_window(a_u, w_ref, offs, tm)
    o_ref[...] = (xres_ref[...].astype(jnp.float32) - acc).astype(o_ref.dtype)


# ---------------------------------------------------------------------------
# BlockSpec builders & pallas_call wrappers
# ---------------------------------------------------------------------------
def _window_specs(tile_m, hh, c, n_hblk):
    """Main-tile + clamped pre/post halo BlockSpecs over one (mpad, c) array."""
    k = tile_m // hh
    main = pl.BlockSpec((tile_m, c), lambda i: (i, 0))
    pre = pl.BlockSpec((hh, c), lambda i: (jnp.maximum(i * k - 1, 0), 0))
    post = pl.BlockSpec(
        (hh, c), lambda i: (jnp.minimum((i + 1) * k, n_hblk - 1), 0))
    return [main, pre, post]


def _bcast_spec(c):
    return pl.BlockSpec((1, c), lambda i: (0, 0))


def _layer_first(g, w, *, tile_m, hh, n_tiles, n_hblk, offs):
    cin, cout = g.shape[-1], w.shape[-1]
    mpad = g.shape[0]
    return pl.pallas_call(
        functools.partial(_conv_plain_kernel, offs=offs),
        out_shape=jax.ShapeDtypeStruct((mpad, cout), jnp.bfloat16),
        grid=(n_tiles,),
        in_specs=_window_specs(tile_m, hh, cin, n_hblk)
        + [pl.BlockSpec((9 * cin, cout), lambda i: (0, 0))],
        out_specs=pl.BlockSpec((tile_m, cout), lambda i: (i, 0)),
        compiler_params=_COMPILER_PARAMS,
    )(g, g, g, w)


def _layer_middle(y, mask, scale, shift, w, *, tile_m, hh, n_tiles, n_hblk, offs):
    cin, cout = y.shape[-1], w.shape[-1]
    mpad = y.shape[0]
    return pl.pallas_call(
        functools.partial(_act_conv_stats_kernel, offs=offs),
        out_shape=(jax.ShapeDtypeStruct((mpad, cout), jnp.bfloat16),
                   jax.ShapeDtypeStruct((n_tiles, 2, cout), jnp.float32)),
        grid=(n_tiles,),
        in_specs=(_window_specs(tile_m, hh, cin, n_hblk)
                  + _window_specs(tile_m, hh, 1, n_hblk)
                  + [_bcast_spec(cin), _bcast_spec(cin),
                     pl.BlockSpec((9 * cin, cout), lambda i: (0, 0))]),
        out_specs=(pl.BlockSpec((tile_m, cout), lambda i: (i, 0)),
                   pl.BlockSpec((1, 2, cout), lambda i: (i, 0, 0))),
        compiler_params=_COMPILER_PARAMS,
    )(y, y, y, mask, mask, mask, scale, shift, w)


def _layer_last(y, mask, scale, shift, w, xres, *, tile_m, hh, n_tiles, n_hblk, offs):
    cin, cout = y.shape[-1], w.shape[-1]
    mpad = y.shape[0]
    return pl.pallas_call(
        functools.partial(_act_conv_residual_kernel, offs=offs),
        out_shape=jax.ShapeDtypeStruct((mpad, cout), jnp.float32),
        grid=(n_tiles,),
        in_specs=(_window_specs(tile_m, hh, cin, n_hblk)
                  + _window_specs(tile_m, hh, 1, n_hblk)
                  + [_bcast_spec(cin), _bcast_spec(cin),
                     pl.BlockSpec((9 * cin, cout), lambda i: (0, 0)),
                     pl.BlockSpec((tile_m, cout), lambda i: (i, 0))]),
        out_specs=pl.BlockSpec((tile_m, cout), lambda i: (i, 0)),
        compiler_params=_COMPILER_PARAMS,
    )(y, y, y, mask, mask, mask, scale, shift, w, xres)


# ---------------------------------------------------------------------------
# Plain-JAX glue (layout + tiny cross-tile BN reduction only)
# ---------------------------------------------------------------------------
def _pick_tile_m(requested, mp, hh, min_steps=8):
    """Multiple of hh (=> multiple of 16), capped so the grid keeps >= min_steps."""
    cap = max(hh, _round_up(pl.cdiv(mp, min_steps), hh))
    t = min(max(requested, hh), cap)
    return _round_up(t, hh)


def init_dncnn_params(key, depth, n_channels, image_channels):
    """Deterministic synthetic parameters; conv weights stored HWIO f32."""
    params = {"w": [], "gamma": [], "beta": []}
    cins = [image_channels] + [n_channels] * (depth - 1)
    couts = [n_channels] * (depth - 1) + [image_channels]
    for i in range(depth):
        cin, cout = cins[i], couts[i]
        key, kw = jax.random.split(key)
        std = (2.0 / (cin * 9)) ** 0.5
        w_oihw = std * jax.random.normal(kw, (cout, cin, 3, 3), jnp.float32)
        params["w"].append(jnp.transpose(w_oihw, (2, 3, 1, 0)))  # (3,3,cin,cout)
        if 0 < i < depth - 1:  # middle layers have BatchNorm
            key, kg, kb = jax.random.split(key, 3)
            params["gamma"].append(
                1.0 + 0.1 * jax.random.normal(kg, (cout,), jnp.float32))
            params["beta"].append(
                0.1 * jax.random.normal(kb, (cout,), jnp.float32))
    return params


def dncnn_forward(x_nchw, params, *, tile_m=2048, eps=1e-5):
    """DnCNN forward: returns x - dncnn(x).  Input/output NCHW, like PyTorch."""
    depth = len(params["w"])
    n, c_img, h, w = x_nchw.shape
    q = h + 2
    p = _round_up(w + 2, 8)                   # sublane-aligned padded width
    mp = n * q * p                            # padded raster length
    hh = _round_up(p + 1, 16)                 # halo rows per side (>= max |offset|)
    tile_m = _pick_tile_m(tile_m, mp, hh)
    n_tiles = pl.cdiv(mp, tile_m)
    mpad = n_tiles * tile_m
    n_hblk = mpad // hh
    offs = tuple(dy * p + dx - (p + 1) for dy in range(3) for dx in range(3))
    common = dict(tile_m=tile_m, hh=hh, n_tiles=n_tiles, n_hblk=n_hblk, offs=offs)

    # Input in the padded raster layout.  f32 copy kept for the residual.
    x_nhwc = jnp.transpose(x_nchw, (0, 2, 3, 1)).astype(jnp.float32)
    canvas = jnp.pad(x_nhwc, ((0, 0), (1, 1), (1, p - w - 1), (0, 0)))
    g0_f32 = jnp.pad(canvas.reshape(mp, c_img), ((0, mpad - mp), (0, 0)))
    g0 = g0_f32.astype(jnp.bfloat16)

    # 1.0 at raster rows of real pixels, 0.0 on the padding ring / tail.
    r = jnp.arange(mpad, dtype=jnp.int32)
    rr = r % (q * p)
    ii = rr // p
    jj = rr % p
    interior = (r < mp) & (ii >= 1) & (ii <= h) & (jj >= 1) & (jj <= w)
    mask = interior.astype(jnp.float32).reshape(mpad, 1)
    inv_count = 1.0 / float(n * h * w)

    # ---- Layer 0: plain conv (ReLU + ring re-zero applied by the consumer) -
    w0 = params["w"][0].reshape(9 * c_img, -1).astype(jnp.bfloat16)
    y = _layer_first(g0, w0, **common)
    nch = y.shape[-1]
    scale = jnp.ones((1, nch), jnp.float32)   # pending pre-activation for y
    shift = jnp.zeros((1, nch), jnp.float32)

    # ---- Middle layers: fused preact -> conv -> raw y + masked stats -------
    for li in range(1, depth - 1):
        cin = y.shape[-1]
        wflat = params["w"][li].reshape(9 * cin, -1).astype(jnp.bfloat16)
        y, stats = _layer_middle(y, mask, scale, shift, wflat, **common)
        sums = jnp.sum(stats, axis=0)                    # (2, Cout)
        mean = sums[0] * inv_count
        var = jnp.maximum(sums[1] * inv_count - mean * mean, 0.0)
        rstd = lax.rsqrt(var + eps)
        gamma = params["gamma"][li - 1]
        beta = params["beta"][li - 1]
        scale = (gamma * rstd).reshape(1, -1).astype(jnp.float32)
        shift = (beta - mean * gamma * rstd).reshape(1, -1).astype(jnp.float32)

    # ---- Last layer: fused preact -> conv -> out = x - noise ---------------
    cin = y.shape[-1]
    wl = params["w"][depth - 1].reshape(9 * cin, c_img).astype(jnp.bfloat16)
    out_flat = _layer_last(y, mask, scale, shift, wl, g0_f32, **common)

    out = out_flat[:mp].reshape(n, q, p, c_img)[:, 1:h + 1, 1:w + 1, :]
    return jnp.transpose(out, (0, 3, 1, 2))  # NHWC -> NCHW


# ---------------------------------------------------------------------------
# Pure-JAX reference (mirrors the kernel's bf16 rounding points)
# ---------------------------------------------------------------------------
def dncnn_reference(x_nchw, params, eps=1e-5):
    x = jnp.transpose(x_nchw, (0, 2, 3, 1)).astype(jnp.float32)
    dn = ("NHWC", "HWIO", "NHWC")
    depth = len(params["w"])

    def conv(a, w):
        return lax.conv_general_dilated(
            a.astype(jnp.bfloat16), w.astype(jnp.bfloat16), (1, 1),
            ((1, 1), (1, 1)), dimension_numbers=dn,
            preferred_element_type=jnp.float32)

    y = conv(x, params["w"][0]).astype(jnp.bfloat16)
    nch = params["w"][0].shape[-1]
    scale = jnp.ones((nch,), jnp.float32)
    shift = jnp.zeros((nch,), jnp.float32)
    for li in range(1, depth - 1):
        a = jnp.maximum(y.astype(jnp.float32) * scale + shift, 0.0)
        y_f32 = conv(a, params["w"][li])
        mean = jnp.mean(y_f32, axis=(0, 1, 2))
        var = jnp.maximum(jnp.mean(y_f32 * y_f32, axis=(0, 1, 2)) - mean * mean, 0.0)
        rstd = lax.rsqrt(var + eps)
        gm = params["gamma"][li - 1]
        bt = params["beta"][li - 1]
        scale = gm * rstd
        shift = bt - mean * gm * rstd
        y = y_f32.astype(jnp.bfloat16)
    a = jnp.maximum(y.astype(jnp.float32) * scale + shift, 0.0)
    noise = conv(a, params["w"][depth - 1])
    return jnp.transpose(x - noise, (0, 3, 1, 2))


# ---------------------------------------------------------------------------
if __name__ == "__main__":
    # Small deterministic config (module defaults are depth=17, n_channels=64,
    # image_channels=3; structure identical here).
    depth = 5
    n_channels = 32
    image_channels = 3
    N, H, W = 2, 16, 16

    key = jax.random.PRNGKey(0)
    k_param, k_x = jax.random.split(key)
    params = init_dncnn_params(k_param, depth, n_channels, image_channels)
    x = jax.random.normal(k_x, (N, image_channels, H, W), jnp.float32)

    fwd = jax.jit(lambda xx: dncnn_forward(xx, params))
    out = jax.block_until_ready(fwd(x))

    assert out.shape == (N, image_channels, H, W), out.shape
    assert bool(jnp.all(jnp.isfinite(out)))

    ref = jax.block_until_ready(jax.jit(lambda xx: dncnn_reference(xx, params))(x))
    max_err = float(jnp.max(jnp.abs(out - ref)))
    assert max_err < 3e-2, max_err

    print("KERNEL_OK")
</pallas_src>

<mosaic_0001>
module attributes {stable_mosaic.version = 11 : i64} {
  func.func @_conv_plain_kernel(%arg0: i32, %arg1: memref<128x3xbf16, #tpu.memory_space<vmem>>, %arg2: memref<32x3xbf16, #tpu.memory_space<vmem>>, %arg3: memref<32x3xbf16, #tpu.memory_space<vmem>>, %arg4: memref<27x32xbf16, #tpu.memory_space<vmem>>, %arg5: memref<128x32xbf16, #tpu.memory_space<vmem>>) attributes {dimension_semantics = [#tpu.dimension_semantics<parallel>], iteration_bounds = array<i64: 7>, scalar_prefetch = 0 : i64, scratch_operands = 0 : i64, tpu.core_type = #tpu.core_type<tc>, window_params = [{transform_indices = @transform_0, window_bounds = array<i64: 128, 3>}, {transform_indices = @transform_1, window_bounds = array<i64: 32, 3>}, {transform_indices = @transform_2, window_bounds = array<i64: 32, 3>}, {pipeline_mode = #tpu.pipeline_mode<synchronous>, transform_indices = @transform_3, window_bounds = array<i64: 27, 32>}, {transform_indices = @transform_4, window_bounds = array<i64: 128, 32>}]} {
    %c0 = arith.constant 0 : index
    %c0_0 = arith.constant 0 : index
    %0 = vector.load %arg2[%c0, %c0_0] : memref<32x3xbf16, #tpu.memory_space<vmem>>, vector<32x3xbf16>
    %c0_1 = arith.constant 0 : index
    %c0_2 = arith.constant 0 : index
    %1 = vector.load %arg1[%c0_1, %c0_2] : memref<128x3xbf16, #tpu.memory_space<vmem>>, vector<128x3xbf16>
    %c0_3 = arith.constant 0 : index
    %c0_4 = arith.constant 0 : index
    %2 = vector.load %arg3[%c0_3, %c0_4] : memref<32x3xbf16, #tpu.memory_space<vmem>>, vector<32x3xbf16>
    %3 = tpu.concatenate %0, %1, %2 in 0 : vector<32x3xbf16>, vector<128x3xbf16>, vector<32x3xbf16> -> vector<192x3xbf16>
    %4 = vector.extract_strided_slice %3 {offsets = [7, 0], sizes = [128, 3], strides = [1, 1]} : vector<192x3xbf16> to vector<128x3xbf16>
    %5 = vector.extract_strided_slice %3 {offsets = [8, 0], sizes = [128, 3], strides = [1, 1]} : vector<192x3xbf16> to vector<128x3xbf16>
    %6 = vector.extract_strided_slice %3 {offsets = [9, 0], sizes = [128, 3], strides = [1, 1]} : vector<192x3xbf16> to vector<128x3xbf16>
    %7 = vector.extract_strided_slice %3 {offsets = [31, 0], sizes = [128, 3], strides = [1, 1]} : vector<192x3xbf16> to vector<128x3xbf16>
    %8 = vector.extract_strided_slice %3 {offsets = [32, 0], sizes = [128, 3], strides = [1, 1]} : vector<192x3xbf16> to vector<128x3xbf16>
    %9 = vector.extract_strided_slice %3 {offsets = [33, 0], sizes = [128, 3], strides = [1, 1]} : vector<192x3xbf16> to vector<128x3xbf16>
    %10 = vector.extract_strided_slice %3 {offsets = [55, 0], sizes = [128, 3], strides = [1, 1]} : vector<192x3xbf16> to vector<128x3xbf16>
    %11 = vector.extract_strided_slice %3 {offsets = [56, 0], sizes = [128, 3], strides = [1, 1]} : vector<192x3xbf16> to vector<128x3xbf16>
    %12 = vector.extract_strided_slice %3 {offsets = [57, 0], sizes = [128, 3], strides = [1, 1]} : vector<192x3xbf16> to vector<128x3xbf16>
    %cst = arith.constant 0.000000e+00 : f32
    %13 = vector.broadcast %cst : f32 to vector<128x32xf32>
    %c0_5 = arith.constant 0 : index
    %c0_6 = arith.constant 0 : index
    %14 = vector.load %arg4[%c0_5, %c0_6] : memref<27x32xbf16, #tpu.memory_space<vmem>>, vector<3x32xbf16>
    %cst_7 = arith.constant dense<0.000000e+00> : vector<128x32xf32>
    %15 = tpu.matmul %4, %14, %cst_7 {dimension_numbers = #tpu.dot_dimension_numbers<[1], [0], [0], [1], [0, 0, 1, 1], [], []>} : vector<128x3xbf16>, vector<3x32xbf16>, vector<128x32xf32> -> vector<128x32xf32>
    %16 = arith.addf %13, %15 : vector<128x32xf32>
    %c3 = arith.constant 3 : index
    %c0_8 = arith.constant 0 : index
    %17 = vector.load %arg4[%c3, %c0_8] : memref<27x32xbf16, #tpu.memory_space<vmem>>, vector<3x32xbf16>
    %cst_9 = arith.constant dense<0.000000e+00> : vector<128x32xf32>
    %18 = tpu.matmul %5, %17, %cst_9 {dimension_numbers = #tpu.dot_dimension_numbers<[1], [0], [0], [1], [0, 0, 1, 1], [], []>} : vector<128x3xbf16>, vector<3x32xbf16>, vector<128x32xf32> -> vector<128x32xf32>
    %19 = arith.addf %16, %18 : vector<128x32xf32>
    %c6 = arith.constant 6 : index
    %c0_10 = arith.constant 0 : index
    %20 = vector.load %arg4[%c6, %c0_10] : memref<27x32xbf16, #tpu.memory_space<vmem>>, vector<3x32xbf16>
    %cst_11 = arith.constant dense<0.000000e+00> : vector<128x32xf32>
    %21 = tpu.matmul %6, %20, %cst_11 {dimension_numbers = #tpu.dot_dimension_numbers<[1], [0], [0], [1], [0, 0, 1, 1], [], []>} : vector<128x3xbf16>, vector<3x32xbf16>, vector<128x32xf32> -> vector<128x32xf32>
    %22 = arith.addf %19, %21 : vector<128x32xf32>
    %c9 = arith.constant 9 : index
    %c0_12 = arith.constant 0 : index
    %23 = vector.load %arg4[%c9, %c0_12] : memref<27x32xbf16, #tpu.memory_space<vmem>>, vector<3x32xbf16>
    %cst_13 = arith.constant dense<0.000000e+00> : vector<128x32xf32>
    %24 = tpu.matmul %7, %23, %cst_13 {dimension_numbers = #tpu.dot_dimension_numbers<[1], [0], [0], [1], [0, 0, 1, 1], [], []>} : vector<128x3xbf16>, vector<3x32xbf16>, vector<128x32xf32> -> vector<128x32xf32>
    %25 = arith.addf %22, %24 : vector<128x32xf32>
    %c12 = arith.constant 12 : index
    %c0_14 = arith.constant 0 : index
    %26 = vector.load %arg4[%c12, %c0_14] : memref<27x32xbf16, #tpu.memory_space<vmem>>, vector<3x32xbf16>
    %cst_15 = arith.constant dense<0.000000e+00> : vector<128x32xf32>
    %27 = tpu.matmul %8, %26, %cst_15 {dimension_numbers = #tpu.dot_dimension_numbers<[1], [0], [0], [1], [0, 0, 1, 1], [], []>} : vector<128x3xbf16>, vector<3x32xbf16>, vector<128x32xf32> -> vector<128x32xf32>
    %28 = arith.addf %25, %27 : vector<128x32xf32>
    %c15 = arith.constant 15 : index
    %c0_16 = arith.constant 0 : index
    %29 = vector.load %arg4[%c15, %c0_16] : memref<27x32xbf16, #tpu.memory_space<vmem>>, vector<3x32xbf16>
    %cst_17 = arith.constant dense<0.000000e+00> : vector<128x32xf32>
    %30 = tpu.matmul %9, %29, %cst_17 {dimension_numbers = #tpu.dot_dimension_numbers<[1], [0], [0], [1], [0, 0, 1, 1], [], []>} : vector<128x3xbf16>, vector<3x32xbf16>, vector<128x32xf32> -> vector<128x32xf32>
    %31 = arith.addf %28, %30 : vector<128x32xf32>
    %c18 = arith.constant 18 : index
    %c0_18 = arith.constant 0 : index
    %32 = vector.load %arg4[%c18, %c0_18] : memref<27x32xbf16, #tpu.memory_space<vmem>>, vector<3x32xbf16>
    %cst_19 = arith.constant dense<0.000000e+00> : vector<128x32xf32>
    %33 = tpu.matmul %10, %32, %cst_19 {dimension_numbers = #tpu.dot_dimension_numbers<[1], [0], [0], [1], [0, 0, 1, 1], [], []>} : vector<128x3xbf16>, vector<3x32xbf16>, vector<128x32xf32> -> vector<128x32xf32>
    %34 = arith.addf %31, %33 : vector<128x32xf32>
    %c21 = arith.constant 21 : index
    %c0_20 = arith.constant 0 : index
    %35 = vector.load %arg4[%c21, %c0_20] : memref<27x32xbf16, #tpu.memory_space<vmem>>, vector<3x32xbf16>
    %cst_21 = arith.constant dense<0.000000e+00> : vector<128x32xf32>
    %36 = tpu.matmul %11, %35, %cst_21 {dimension_numbers = #tpu.dot_dimension_numbers<[1], [0], [0], [1], [0, 0, 1, 1], [], []>} : vector<128x3xbf16>, vector<3x32xbf16>, vector<128x32xf32> -> vector<128x32xf32>
    %37 = arith.addf %34, %36 : vector<128x32xf32>
    %c24 = arith.constant 24 : index
    %c0_22 = arith.constant 0 : index
    %38 = vector.load %arg4[%c24, %c0_22] : memref<27x32xbf16, #tpu.memory_space<vmem>>, vector<3x32xbf16>
    %cst_23 = arith.constant dense<0.000000e+00> : vector<128x32xf32>
    %39 = tpu.matmul %12, %38, %cst_23 {dimension_numbers = #tpu.dot_dimension_numbers<[1], [0], [0], [1], [0, 0, 1, 1], [], []>} : vector<128x3xbf16>, vector<3x32xbf16>, vector<128x32xf32> -> vector<128x32xf32>
    %40 = arith.addf %37, %39 : vector<128x32xf32>
    %41 = arith.truncf %40 : vector<128x32xf32> to vector<128x32xbf16>
    %c0_24 = arith.constant 0 : index
    %c0_25 = arith.constant 0 : index
    %42 = vector.load %arg5[%c0_24, %c0_25] : memref<128x32xbf16, #tpu.memory_space<vmem>>, vector<128x32xbf16>
    tpu.vector_store %arg5[%c0_24, %c0_25], %41 {strides = array<i32>} : memref<128x32xbf16, #tpu.memory_space<vmem>>, vector<128x32xbf16>,
    return
  }
  func.func @transform_0(%arg0: i32) -> (i32, i32) {
    %c0_i32 = arith.constant 0 : i32
    %c0_i32_0 = arith.constant 0 : i32
    return %arg0, %c0_i32 : i32, i32
  }
  func.func @transform_1(%arg0: i32) -> (i32, i32) {
    %c4_i32 = arith.constant 4 : i32
    %0 = arith.muli %arg0, %c4_i32 : i32
    %c1_i32 = arith.constant 1 : i32
    %1 = arith.subi %0, %c1_i32 : i32
    %c0_i32 = arith.constant 0 : i32
    %2 = arith.maxsi %1, %c0_i32 : i32
    %c0_i32_0 = arith.constant 0 : i32
    %c0_i32_1 = arith.constant 0 : i32
    return %2, %c0_i32_0 : i32, i32
  }
  func.func @transform_2(%arg0: i32) -> (i32, i32) {
    %c1_i32 = arith.constant 1 : i32
    %0 = arith.addi %arg0, %c1_i32 : i32
    %c4_i32 = arith.constant 4 : i32
    %1 = arith.muli %0, %c4_i32 : i32
    %c27_i32 = arith.constant 27 : i32
    %2 = arith.minsi %1, %c27_i32 : i32
    %c0_i32 = arith.constant 0 : i32
    %c0_i32_0 = arith.constant 0 : i32
    return %2, %c0_i32 : i32, i32
  }
  func.func @transform_3(%arg0: i32) -> (i32, i32) {
    %c0_i32 = arith.constant 0 : i32
    %c0_i32_0 = arith.constant 0 : i32
    %c0_i32_1 = arith.constant 0 : i32
    return %c0_i32, %c0_i32_0 : i32, i32
  }
  func.func @transform_4(%arg0: i32) -> (i32, i32) {
    %c0_i32 = arith.constant 0 : i32
    %c0_i32_0 = arith.constant 0 : i32
    return %arg0, %c0_i32 : i32, i32
  }
}

module attributes {stable_mosaic.version = 11 : i64} {
  func.func @_act_conv_stats_kernel(%arg0: i32, %arg1: memref<128x32xbf16, #tpu.memory_space<vmem>>, %arg2: memref<32x32xbf16, #tpu.memory_space<vmem>>, %arg3: memref<32x32xbf16, #tpu.memory_space<vmem>>, %arg4: memref<128x1xf32, #tpu.memory_space<vmem>>, %arg5: memref<32x1xf32, #tpu.memory_space<vmem>>, %arg6: memref<32x1xf32, #tpu.memory_space<vmem>>, %arg7: memref<1x32xf32, #tpu.memory_space<vmem>>, %arg8: memref<1x32xf32, #tpu.memory_space<vmem>>, %arg9: memref<288x32xbf16, #tpu.memory_space<vmem>>, %arg10: memref<128x32xbf16, #tpu.memory_space<vmem>>, %arg11: memref<1x2x32xf32, #tpu.memory_space<vmem>>) attributes {dimension_semantics = [#tpu.dimension_semantics<parallel>], iteration_bounds = array<i64: 7>, scalar_prefetch = 0 : i64, scratch_operands = 0 : i64, tpu.core_type = #tpu.core_type<tc>, window_params = [{transform_indices = @transform_0, window_bounds = array<i64: 128, 32>}, {transform_indices = @transform_1, window_bounds = array<i64: 32, 32>}, {transform_indices = @transform_2, window_bounds = array<i64: 32, 32>}, {transform_indices = @transform_3, window_bounds = array<i64: 128, 1>}, {transform_indices = @transform_4, window_bounds = array<i64: 32, 1>}, {transform_indices = @transform_5, window_bounds = array<i64: 32, 1>}, {pipeline_mode = #tpu.pipeline_mode<synchronous>, transform_indices = @transform_6, window_bounds = array<i64: 1, 32>}, {pipeline_mode = #tpu.pipeline_mode<synchronous>, transform_indices = @transform_7, window_bounds = array<i64: 1, 32>}, {pipeline_mode = #tpu.pipeline_mode<synchronous>, transform_indices = @transform_8, window_bounds = array<i64: 288, 32>}, {transform_indices = @transform_9, window_bounds = array<i64: 128, 32>}, {transform_indices = @transform_10, window_bounds = array<i64: 1, 2, 32>}]} {
    %c0 = arith.constant 0 : index
    %c0_0 = arith.constant 0 : index
    %0 = vector.load %arg2[%c0, %c0_0] : memref<32x32xbf16, #tpu.memory_space<vmem>>, vector<32x32xbf16>
    %c0_1 = arith.constant 0 : index
    %c0_2 = arith.constant 0 : index
    %1 = vector.load %arg1[%c0_1, %c0_2] : memref<128x32xbf16, #tpu.memory_space<vmem>>, vector<128x32xbf16>
    %c0_3 = arith.constant 0 : index
    %c0_4 = arith.constant 0 : index
    %2 = vector.load %arg3[%c0_3, %c0_4] : memref<32x32xbf16, #tpu.memory_space<vmem>>, vector<32x32xbf16>
    %3 = tpu.concatenate %0, %1, %2 in 0 : vector<32x32xbf16>, vector<128x32xbf16>, vector<32x32xbf16> -> vector<192x32xbf16>
    %c0_5 = arith.constant 0 : index
    %c0_6 = arith.constant 0 : index
    %4 = vector.load %arg5[%c0_5, %c0_6] : memref<32x1xf32, #tpu.memory_space<vmem>>, vector<32x1xf32>
    %c0_7 = arith.constant 0 : index
    %c0_8 = arith.constant 0 : index
    %5 = vector.load %arg4[%c0_7, %c0_8] : memref<128x1xf32, #tpu.memory_space<vmem>>, vector<128x1xf32>
    %c0_9 = arith.constant 0 : index
    %c0_10 = arith.constant 0 : index
    %6 = vector.load %arg6[%c0_9, %c0_10] : memref<32x1xf32, #tpu.memory_space<vmem>>, vector<32x1xf32>
    %7 = tpu.concatenate %4, %5, %6 in 0 : vector<32x1xf32>, vector<128x1xf32>, vector<32x1xf32> -> vector<192x1xf32>
    %8 = arith.extf %3 : vector<192x32xbf16> to vector<192x32xf32>
    %c0_11 = arith.constant 0 : index
    %c0_12 = arith.constant 0 : index
    %9 = vector.load %arg7[%c0_11, %c0_12] : memref<1x32xf32, #tpu.memory_space<vmem>>, vector<1x32xf32>
    %10 = vector.broadcast %9 : vector<1x32xf32> to vector<192x32xf32>
    %11 = arith.mulf %8, %10 : vector<192x32xf32>
    %c0_13 = arith.constant 0 : index
    %c0_14 = arith.constant 0 : index
    %12 = vector.load %arg8[%c0_13, %c0_14] : memref<1x32xf32, #tpu.memory_space<vmem>>, vector<1x32xf32>
    %13 = vector.broadcast %12 : vector<1x32xf32> to vector<192x32xf32>
    %14 = arith.addf %11, %13 : vector<192x32xf32>
    %cst = arith.constant 0.000000e+00 : f32
    %15 = vector.broadcast %cst : f32 to vector<192x32xf32>
    %16 = arith.maximumf %14, %15 : vector<192x32xf32>
    %17 = vector.broadcast %7 : vector<192x1xf32> to vector<192x32xf32>
    %18 = arith.mulf %16, %17 : vector<192x32xf32>
    %19 = arith.truncf %18 : vector<192x32xf32> to vector<192x32xbf16>
    %20 = vector.extract_strided_slice %19 {offsets = [7, 0], sizes = [128, 32], strides = [1, 1]} : vector<192x32xbf16> to vector<128x32xbf16>
    %21 = vector.extract_strided_slice %19 {offsets = [8, 0], sizes = [128, 32], strides = [1, 1]} : vector<192x32xbf16> to vector<128x32xbf16>
    %22 = vector.extract_strided_slice %19 {offsets = [9, 0], sizes = [128, 32], strides = [1, 1]} : vector<192x32xbf16> to vector<128x32xbf16>
    %23 = vector.extract_strided_slice %19 {offsets = [31, 0], sizes = [128, 32], strides = [1, 1]} : vector<192x32xbf16> to vector<128x32xbf16>
    %24 = vector.extract_strided_slice %19 {offsets = [32, 0], sizes = [128, 32], strides = [1, 1]} : vector<192x32xbf16> to vector<128x32xbf16>
    %25 = vector.extract_strided_slice %19 {offsets = [33, 0], sizes = [128, 32], strides = [1, 1]} : vector<192x32xbf16> to vector<128x32xbf16>
    %26 = vector.extract_strided_slice %19 {offsets = [55, 0], sizes = [128, 32], strides = [1, 1]} : vector<192x32xbf16> to vector<128x32xbf16>
    %27 = vector.extract_strided_slice %19 {offsets = [56, 0], sizes = [128, 32], strides = [1, 1]} : vector<192x32xbf16> to vector<128x32xbf16>
    %28 = vector.extract_strided_slice %19 {offsets = [57, 0], sizes = [128, 32], strides = [1, 1]} : vector<192x32xbf16> to vector<128x32xbf16>
    %29 = tpu.concatenate %20, %21, %22, %23, %24, %25, %26, %27, %28 in 1 : vector<128x32xbf16>, vector<128x32xbf16>, vector<128x32xbf16>, vector<128x32xbf16>, vector<128x32xbf16>, vector<128x32xbf16>, vector<128x32xbf16>, vector<128x32xbf16>, vector<128x32xbf16> -> vector<128x288xbf16>
    %c0_15 = arith.constant 0 : index
    %c0_16 = arith.constant 0 : index
    %30 = vector.load %arg9[%c0_15, %c0_16] : memref<288x32xbf16, #tpu.memory_space<vmem>>, vector<288x32xbf16>
    %cst_17 = arith.constant dense<0.000000e+00> : vector<128x32xf32>
    %31 = tpu.matmul %29, %30, %cst_17 {dimension_numbers = #tpu.dot_dimension_numbers<[1], [0], [0], [1], [0, 0, 1, 1], [], []>} : vector<128x288xbf16>, vector<288x32xbf16>, vector<128x32xf32> -> vector<128x32xf32>
    %32 = arith.truncf %31 : vector<128x32xf32> to vector<128x32xbf16>
    %c0_18 = arith.constant 0 : index
    %c0_19 = arith.constant 0 : index
    %33 = vector.load %arg10[%c0_18, %c0_19] : memref<128x32xbf16, #tpu.memory_space<vmem>>, vector<128x32xbf16>
    tpu.vector_store %arg10[%c0_18, %c0_19], %32 {strides = array<i32>} : memref<128x32xbf16, #tpu.memory_space<vmem>>, vector<128x32xbf16>,
    %c0_20 = arith.constant 0 : index
    %c0_21 = arith.constant 0 : index
    %34 = vector.load %arg4[%c0_20, %c0_21] : memref<128x1xf32, #tpu.memory_space<vmem>>, vector<128x1xf32>
    %35 = vector.broadcast %34 : vector<128x1xf32> to vector<128x32xf32>
    %36 = arith.mulf %31, %35 : vector<128x32xf32>
    %cst_22 = arith.constant dense<0.000000e+00> : vector<32xf32>
    %37 = vector.multi_reduction <add>, %36, %cst_22 [0] : vector<128x32xf32> to vector<32xf32>
    %38 = vector.shape_cast %37 : vector<32xf32> to vector<1x32xf32>
    %39 = arith.mulf %31, %31 : vector<128x32xf32>
    %40 = vector.broadcast %34 : vector<128x1xf32> to vector<128x32xf32>
    %41 = arith.mulf %39, %40 : vector<128x32xf32>
    %cst_23 = arith.constant dense<0.000000e+00> : vector<32xf32>
    %42 = vector.multi_reduction <add>, %41, %cst_23 [0] : vector<128x32xf32> to vector<32xf32>
    %43 = vector.shape_cast %42 : vector<32xf32> to vector<1x32xf32>
    %44 = tpu.concatenate %38, %43 in 0 : vector<1x32xf32>, vector<1x32xf32> -> vector<2x32xf32>
    %c0_24 = arith.constant 0 : index
    %c0_25 = arith.constant 0 : index
    %c0_26 = arith.constant 0 : index
    %45 = vector.load %arg11[%c0_24, %c0_25, %c0_26] : memref<1x2x32xf32, #tpu.memory_space<vmem>>, vector<1x2x32xf32>
    %46 = vector.shape_cast %45 : vector<1x2x32xf32> to vector<2x32xf32>
    %47 = vector.shape_cast %44 : vector<2x32xf32> to vector<1x2x32xf32>
    tpu.vector_store %arg11[%c0_24, %c0_25, %c0_26], %47 {strides = array<i32>} : memref<1x2x32xf32, #tpu.memory_space<vmem>>, vector<1x2x32xf32>,
    return
  }
  func.func @transform_0(%arg0: i32) -> (i32, i32) {
    %c0_i32 = arith.constant 0 : i32
    %c0_i32_0 = arith.constant 0 : i32
    return %arg0, %c0_i32 : i32, i32
  }
  func.func @transform_1(%arg0: i32) -> (i32, i32) {
    %c4_i32 = arith.constant 4 : i32
    %0 = arith.muli %arg0, %c4_i32 : i32
    %c1_i32 = arith.constant 1 : i32
    %1 = arith.subi %0, %c1_i32 : i32
    %c0_i32 = arith.constant 0 : i32
    %2 = arith.maxsi %1, %c0_i32 : i32
    %c0_i32_0 = arith.constant 0 : i32
    %c0_i32_1 = arith.constant 0 : i32
    return %2, %c0_i32_0 : i32, i32
  }
  func.func @transform_2(%arg0: i32) -> (i32, i32) {
    %c1_i32 = arith.constant 1 : i32
    %0 = arith.addi %arg0, %c1_i32 : i32
    %c4_i32 = arith.constant 4 : i32
    %1 = arith.muli %0, %c4_i32 : i32
    %c27_i32 = arith.constant 27 : i32
    %2 = arith.minsi %1, %c27_i32 : i32
    %c0_i32 = arith.constant 0 : i32
    %c0_i32_0 = arith.constant 0 : i32
    return %2, %c0_i32 : i32, i32
  }
  func.func @transform_3(%arg0: i32) -> (i32, i32) {
    %c0_i32 = arith.constant 0 : i32
    %c0_i32_0 = arith.constant 0 : i32
    return %arg0, %c0_i32 : i32, i32
  }
  func.func @transform_4(%arg0: i32) -> (i32, i32) {
    %c4_i32 = arith.constant 4 : i32
    %0 = arith.muli %arg0, %c4_i32 : i32
    %c1_i32 = arith.constant 1 : i32
    %1 = arith.subi %0, %c1_i32 : i32
    %c0_i32 = arith.constant 0 : i32
    %2 = arith.maxsi %1, %c0_i32 : i32
    %c0_i32_0 = arith.constant 0 : i32
    %c0_i32_1 = arith.constant 0 : i32
    return %2, %c0_i32_0 : i32, i32
  }
  func.func @transform_5(%arg0: i32) -> (i32, i32) {
    %c1_i32 = arith.constant 1 : i32
    %0 = arith.addi %arg0, %c1_i32 : i32
    %c4_i32 = arith.constant 4 : i32
    %1 = arith.muli %0, %c4_i32 : i32
    %c27_i32 = arith.constant 27 : i32
    %2 = arith.minsi %1, %c27_i32 : i32
    %c0_i32 = arith.constant 0 : i32
    %c0_i32_0 = arith.constant 0 : i32
    return %2, %c0_i32 : i32, i32
  }
  func.func @transform_6(%arg0: i32) -> (i32, i32) {
    %c0_i32 = arith.constant 0 : i32
    %c0_i32_0 = arith.constant 0 : i32
    %c0_i32_1 = arith.constant 0 : i32
    return %c0_i32, %c0_i32_0 : i32, i32
  }
  func.func @transform_7(%arg0: i32) -> (i32, i32) {
    %c0_i32 = arith.constant 0 : i32
    %c0_i32_0 = arith.constant 0 : i32
    %c0_i32_1 = arith.constant 0 : i32
    return %c0_i32, %c0_i32_0 : i32, i32
  }
  func.func @transform_8(%arg0: i32) -> (i32, i32) {
    %c0_i32 = arith.constant 0 : i32
    %c0_i32_0 = arith.constant 0 : i32
    %c0_i32_1 = arith.constant 0 : i32
    return %c0_i32, %c0_i32_0 : i32, i32
  }
  func.func @transform_9(%arg0: i32) -> (i32, i32) {
    %c0_i32 = arith.constant 0 : i32
    %c0_i32_0 = arith.constant 0 : i32
    return %arg0, %c0_i32 : i32, i32
  }
  func.func @transform_10(%arg0: i32) -> (i32, i32, i32) {
    %c0_i32 = arith.constant 0 : i32
    %c0_i32_0 = arith.constant 0 : i32
    %c0_i32_1 = arith.constant 0 : i32
    return %arg0, %c0_i32, %c0_i32_0 : i32, i32, i32
  }
}

module attributes {stable_mosaic.version = 11 : i64} {
  func.func @_act_conv_residual_kernel(%arg0: i32, %arg1: memref<128x32xbf16, #tpu.memory_space<vmem>>, %arg2: memref<32x32xbf16, #tpu.memory_space<vmem>>, %arg3: memref<32x32xbf16, #tpu.memory_space<vmem>>, %arg4: memref<128x1xf32, #tpu.memory_space<vmem>>, %arg5: memref<32x1xf32, #tpu.memory_space<vmem>>, %arg6: memref<32x1xf32, #tpu.memory_space<vmem>>, %arg7: memref<1x32xf32, #tpu.memory_space<vmem>>, %arg8: memref<1x32xf32, #tpu.memory_space<vmem>>, %arg9: memref<288x3xbf16, #tpu.memory_space<vmem>>, %arg10: memref<128x3xf32, #tpu.memory_space<vmem>>, %arg11: memref<128x3xf32, #tpu.memory_space<vmem>>) attributes {dimension_semantics = [#tpu.dimension_semantics<parallel>], iteration_bounds = array<i64: 7>, scalar_prefetch = 0 : i64, scratch_operands = 0 : i64, tpu.core_type = #tpu.core_type<tc>, window_params = [{transform_indices = @transform_0, window_bounds = array<i64: 128, 32>}, {transform_indices = @transform_1, window_bounds = array<i64: 32, 32>}, {transform_indices = @transform_2, window_bounds = array<i64: 32, 32>}, {transform_indices = @transform_3, window_bounds = array<i64: 128, 1>}, {transform_indices = @transform_4, window_bounds = array<i64: 32, 1>}, {transform_indices = @transform_5, window_bounds = array<i64: 32, 1>}, {pipeline_mode = #tpu.pipeline_mode<synchronous>, transform_indices = @transform_6, window_bounds = array<i64: 1, 32>}, {pipeline_mode = #tpu.pipeline_mode<synchronous>, transform_indices = @transform_7, window_bounds = array<i64: 1, 32>}, {pipeline_mode = #tpu.pipeline_mode<synchronous>, transform_indices = @transform_8, window_bounds = array<i64: 288, 3>}, {transform_indices = @transform_9, window_bounds = array<i64: 128, 3>}, {transform_indices = @transform_10, window_bounds = array<i64: 128, 3>}]} {
    %c0 = arith.constant 0 : index
    %c0_0 = arith.constant 0 : index
    %0 = vector.load %arg2[%c0, %c0_0] : memref<32x32xbf16, #tpu.memory_space<vmem>>, vector<32x32xbf16>
    %c0_1 = arith.constant 0 : index
    %c0_2 = arith.constant 0 : index
    %1 = vector.load %arg1[%c0_1, %c0_2] : memref<128x32xbf16, #tpu.memory_space<vmem>>, vector<128x32xbf16>
    %c0_3 = arith.constant 0 : index
    %c0_4 = arith.constant 0 : index
    %2 = vector.load %arg3[%c0_3, %c0_4] : memref<32x32xbf16, #tpu.memory_space<vmem>>, vector<32x32xbf16>
    %3 = tpu.concatenate %0, %1, %2 in 0 : vector<32x32xbf16>, vector<128x32xbf16>, vector<32x32xbf16> -> vector<192x32xbf16>
    %c0_5 = arith.constant 0 : index
    %c0_6 = arith.constant 0 : index
    %4 = vector.load %arg5[%c0_5, %c0_6] : memref<32x1xf32, #tpu.memory_space<vmem>>, vector<32x1xf32>
    %c0_7 = arith.constant 0 : index
    %c0_8 = arith.constant 0 : index
    %5 = vector.load %arg4[%c0_7, %c0_8] : memref<128x1xf32, #tpu.memory_space<vmem>>, vector<128x1xf32>
    %c0_9 = arith.constant 0 : index
    %c0_10 = arith.constant 0 : index
    %6 = vector.load %arg6[%c0_9, %c0_10] : memref<32x1xf32, #tpu.memory_space<vmem>>, vector<32x1xf32>
    %7 = tpu.concatenate %4, %5, %6 in 0 : vector<32x1xf32>, vector<128x1xf32>, vector<32x1xf32> -> vector<192x1xf32>
    %8 = arith.extf %3 : vector<192x32xbf16> to vector<192x32xf32>
    %c0_11 = arith.constant 0 : index
    %c0_12 = arith.constant 0 : index
    %9 = vector.load %arg7[%c0_11, %c0_12] : memref<1x32xf32, #tpu.memory_space<vmem>>, vector<1x32xf32>
    %10 = vector.broadcast %9 : vector<1x32xf32> to vector<192x32xf32>
    %11 = arith.mulf %8, %10 : vector<192x32xf32>
    %c0_13 = arith.constant 0 : index
    %c0_14 = arith.constant 0 : index
    %12 = vector.load %arg8[%c0_13, %c0_14] : memref<1x32xf32, #tpu.memory_space<vmem>>, vector<1x32xf32>
    %13 = vector.broadcast %12 : vector<1x32xf32> to vector<192x32xf32>
    %14 = arith.addf %11, %13 : vector<192x32xf32>
    %cst = arith.constant 0.000000e+00 : f32
    %15 = vector.broadcast %cst : f32 to vector<192x32xf32>
    %16 = arith.maximumf %14, %15 : vector<192x32xf32>
    %17 = vector.broadcast %7 : vector<192x1xf32> to vector<192x32xf32>
    %18 = arith.mulf %16, %17 : vector<192x32xf32>
    %19 = arith.truncf %18 : vector<192x32xf32> to vector<192x32xbf16>
    %20 = vector.extract_strided_slice %19 {offsets = [7, 0], sizes = [128, 32], strides = [1, 1]} : vector<192x32xbf16> to vector<128x32xbf16>
    %21 = vector.extract_strided_slice %19 {offsets = [8, 0], sizes = [128, 32], strides = [1, 1]} : vector<192x32xbf16> to vector<128x32xbf16>
    %22 = vector.extract_strided_slice %19 {offsets = [9, 0], sizes = [128, 32], strides = [1, 1]} : vector<192x32xbf16> to vector<128x32xbf16>
    %23 = vector.extract_strided_slice %19 {offsets = [31, 0], sizes = [128, 32], strides = [1, 1]} : vector<192x32xbf16> to vector<128x32xbf16>
    %24 = vector.extract_strided_slice %19 {offsets = [32, 0], sizes = [128, 32], strides = [1, 1]} : vector<192x32xbf16> to vector<128x32xbf16>
    %25 = vector.extract_strided_slice %19 {offsets = [33, 0], sizes = [128, 32], strides = [1, 1]} : vector<192x32xbf16> to vector<128x32xbf16>
    %26 = vector.extract_strided_slice %19 {offsets = [55, 0], sizes = [128, 32], strides = [1, 1]} : vector<192x32xbf16> to vector<128x32xbf16>
    %27 = vector.extract_strided_slice %19 {offsets = [56, 0], sizes = [128, 32], strides = [1, 1]} : vector<192x32xbf16> to vector<128x32xbf16>
    %28 = vector.extract_strided_slice %19 {offsets = [57, 0], sizes = [128, 32], strides = [1, 1]} : vector<192x32xbf16> to vector<128x32xbf16>
    %29 = tpu.concatenate %20, %21, %22, %23, %24, %25, %26, %27, %28 in 1 : vector<128x32xbf16>, vector<128x32xbf16>, vector<128x32xbf16>, vector<128x32xbf16>, vector<128x32xbf16>, vector<128x32xbf16>, vector<128x32xbf16>, vector<128x32xbf16>, vector<128x32xbf16> -> vector<128x288xbf16>
    %c0_15 = arith.constant 0 : index
    %c0_16 = arith.constant 0 : index
    %30 = vector.load %arg9[%c0_15, %c0_16] : memref<288x3xbf16, #tpu.memory_space<vmem>>, vector<288x3xbf16>
    %cst_17 = arith.constant dense<0.000000e+00> : vector<128x3xf32>
    %31 = tpu.matmul %29, %30, %cst_17 {dimension_numbers = #tpu.dot_dimension_numbers<[1], [0], [0], [1], [0, 0, 1, 1], [], []>} : vector<128x288xbf16>, vector<288x3xbf16>, vector<128x3xf32> -> vector<128x3xf32>
    %c0_18 = arith.constant 0 : index
    %c0_19 = arith.constant 0 : index
    %32 = vector.load %arg10[%c0_18, %c0_19] : memref<128x3xf32, #tpu.memory_space<vmem>>, vector<128x3xf32>
    %33 = arith.subf %32, %31 : vector<128x3xf32>
    %c0_20 = arith.constant 0 : index
    %c0_21 = arith.constant 0 : index
    %34 = vector.load %arg11[%c0_20, %c0_21] : memref<128x3xf32, #tpu.memory_space<vmem>>, vector<128x3xf32>
    tpu.vector_store %arg11[%c0_20, %c0_21], %33 {strides = array<i32>} : memref<128x3xf32, #tpu.memory_space<vmem>>, vector<128x3xf32>,
    return
  }
  func.func @transform_0(%arg0: i32) -> (i32, i32) {
    %c0_i32 = arith.constant 0 : i32
    %c0_i32_0 = arith.constant 0 : i32
    return %arg0, %c0_i32 : i32, i32
  }
  func.func @transform_1(%arg0: i32) -> (i32, i32) {
    %c4_i32 = arith.constant 4 : i32
    %0 = arith.muli %arg0, %c4_i32 : i32
    %c1_i32 = arith.constant 1 : i32
    %1 = arith.subi %0, %c1_i32 : i32
    %c0_i32 = arith.constant 0 : i32
    %2 = arith.maxsi %1, %c0_i32 : i32
    %c0_i32_0 = arith.constant 0 : i32
    %c0_i32_1 = arith.constant 0 : i32
    return %2, %c0_i32_0 : i32, i32
  }
  func.func @transform_2(%arg0: i32) -> (i32, i32) {
    %c1_i32 = arith.constant 1 : i32
    %0 = arith.addi %arg0, %c1_i32 : i32
    %c4_i32 = arith.constant 4 : i32
    %1 = arith.muli %0, %c4_i32 : i32
    %c27_i32 = arith.constant 27 : i32
    %2 = arith.minsi %1, %c27_i32 : i32
    %c0_i32 = arith.constant 0 : i32
    %c0_i32_0 = arith.constant 0 : i32
    return %2, %c0_i32 : i32, i32
  }
  func.func @transform_3(%arg0: i32) -> (i32, i32) {
    %c0_i32 = arith.constant 0 : i32
    %c0_i32_0 = arith.constant 0 : i32
    return %arg0, %c0_i32 : i32, i32
  }
  func.func @transform_4(%arg0: i32) -> (i32, i32) {
    %c4_i32 = arith.constant 4 : i32
    %0 = arith.muli %arg0, %c4_i32 : i32
    %c1_i32 = arith.constant 1 : i32
    %1 = arith.subi %0, %c1_i32 : i32
    %c0_i32 = arith.constant 0 : i32
    %2 = arith.maxsi %1, %c0_i32 : i32
    %c0_i32_0 = arith.constant 0 : i32
    %c0_i32_1 = arith.constant 0 : i32
    return %2, %c0_i32_0 : i32, i32
  }
  func.func @transform_5(%arg0: i32) -> (i32, i32) {
    %c1_i32 = arith.constant 1 : i32
    %0 = arith.addi %arg0, %c1_i32 : i32
    %c4_i32 = arith.constant 4 : i32
    %1 = arith.muli %0, %c4_i32 : i32
    %c27_i32 = arith.constant 27 : i32
    %2 = arith.minsi %1, %c27_i32 : i32
    %c0_i32 = arith.constant 0 : i32
    %c0_i32_0 = arith.constant 0 : i32
    return %2, %c0_i32 : i32, i32
  }
  func.func @transform_6(%arg0: i32) -> (i32, i32) {
    %c0_i32 = arith.constant 0 : i32
    %c0_i32_0 = arith.constant 0 : i32
    %c0_i32_1 = arith.constant 0 : i32
    return %c0_i32, %c0_i32_0 : i32, i32
  }
  func.func @transform_7(%arg0: i32) -> (i32, i32) {
    %c0_i32 = arith.constant 0 : i32
    %c0_i32_0 = arith.constant 0 : i32
    %c0_i32_1 = arith.constant 0 : i32
    return %c0_i32, %c0_i32_0 : i32, i32
  }
  func.func @transform_8(%arg0: i32) -> (i32, i32) {
    %c0_i32 = arith.constant 0 : i32
    %c0_i32_0 = arith.constant 0 : i32
    %c0_i32_1 = arith.constant 0 : i32
    return %c0_i32, %c0_i32_0 : i32, i32
  }
  func.func @transform_9(%arg0: i32) -> (i32, i32) {
    %c0_i32 = arith.constant 0 : i32
    %c0_i32_0 = arith.constant 0 : i32
    return %arg0, %c0_i32 : i32, i32
  }
  func.func @transform_10(%arg0: i32) -> (i32, i32) {
    %c0_i32 = arith.constant 0 : i32
    %c0_i32_0 = arith.constant 0 : i32
    return %arg0, %c0_i32 : i32, i32
  }
}

</mosaic_0001>

<bundles_post_ra>
// kernel: mul.3
= control target key start
LH: loop header
LB: loop body
LE: loop exit
PB: predicated region body
PF: predicated region fallthrough
CT: control target
= control target key end

     0   :  { %s34_s0 = inlined_call_operand.vmem [shape: f32[1,32], index: 0, kind: input, shape index: {}]   ;;  %s35_s1 = inlined_call_operand.vmem [shape: f32[1,32], index: 1, kind: input, shape index: {}]   ;;  %s36_s2 = inlined_call_operand.vmem [shape: f32[1,32], index: 2, kind: output, shape index: {}]  }
   0x1   :  { %v3_v0 = vld [vmem:[%s34_s0] sm:$0x1] }
   0x2   :  { %v4_v1 = vld [vmem:[%s35_s1] sm:$0x1] }
   0x3   :  { %v7_v2 = vmul.f32 %v4_v1, %v3_v0 }
   0x5   :  { %9 = vst [vmem:[%s36_s2] sm:$0x1] %v7_v2 }

// kernel: _lambda_.5
= control target key start
LH: loop header
LB: loop body
LE: loop exit
PB: predicated region body
PF: predicated region fallthrough
CT: control target
= control target key end

     0   :  { %s2619_s15 = smov 0   ;;  %s3202_s0 = inlined_call_operand.vmem [shape: bf16[896,3], index: 0, kind: input, shape index: {}, may-alias: {0,1,2}]   ;;  %s3203_s1 = inlined_call_operand.vmem [shape: bf16[896,3], index: 1, kind: input, shape index: {}, may-alias: {0,1,2}]   ;;  %s3204_s2 = inlined_call_operand.vmem [shape: bf16[896,3], index: 2, kind: input, shape index: {}, may-alias: {0,1,2}]   ;;  %s3205_s3 = inlined_call_operand.vmem [shape: bf16[27,32], index: 3, kind: input, shape index: {}]   ;;  %s3206_s4 = inlined_call_operand.vmem [shape: bf16[896,32], index: 4, kind: output, shape index: {}]  }
   0x1 LB: > { %s2029_s16 = sadd.s32 4294967295, %s2591_s15   ;;  %p2039_p0 = scmp.ge.s32.totalorder %s2591_s15, 1  ;;  %s2591_s15 = sphi %s2619_s15, %s14_s15  }
   0x2   : > { %p217_p1 = scmp.lt.s32.totalorder %s2591_s15, 8 }
   0x4   : > { %p218_p2 = pnand %p2039_p0, %p217_p1 }
   0x6   : > { %221 = sbr.rel (%p218_p2) target bundleno = 385 (0x181), region = 36 }
   0xd   : > { %vm442_vm0 = vcmask 1040384   ;;  %vm443_vm1 = vcmask 1041408   ;;  %s2040_s17 = sshll.u32 %s2029_s16, 4  ;;  %v2593_v0 = vmov 65535   ;;  %s2637_s22 = sshll.u32 %s2029_s16, 2  ;;  %vm417_vm2 = vcmask 23552  }
   0xe   : > { %v444_v1 = vsel %vm442_vm0, 4294967295, %v2593_v0  ;;  %v2566_v2 = vld [vmem:[%s3205_s3 + $0x4] ss:$0 sps:$4 sm:$0xcc]   ;;  %p262_p3 = scmp.lt.s32.totalorder %s2040_s17, 111  ;;  %s2043_s24 = sadd.s32 4294967295, %s2637_s22 }
   0xf   : > { %v2630_v3 = vsel %vm443_vm1, %v444_v1, 0  ;;  %v2569_v4 = vld [vmem:[%s3205_s3] ss:$0 sps:$4 sm:$0x66]   ;;  %v1121_v5 = vrot.slane %v2566_v2, 2  ;;  %p269_p4 = scmp.gt.s32.totalorder %s2043_s24, 0 }
  0x10   : > { %s3224_s17 = smov (!%p262_p3, %s2040_s17), 111  ;;  %v410_v6 = vshrl.u32 %v2569_v4, 16  ;;  %v413_v7 = vshll.u32 %v2569_v4, 16  ;;  %v386_v9 = vld [vmem:[%s3205_s3] sm:$0x3]  ;;  %s2167_s6 = sadd.s32 4, %s2637_s22 }
  0x11   : > { %v2640_v8 = vand.u32 %v1121_v5, %v2630_v3  ;;  %s2041_s23 = sshll.u32 %s3224_s17, 2  ;;  %v2574_v12 = vld [vmem:[%s3205_s3 + $0x4] sm:$0x18]   ;;  %s3226_s24 = smov (!%p269_p4, %s2043_s24), 0  ;;  %v652_v21 = vand.u32 %v2630_v3, %v386_v9  ;;  %vm388_vm3 = vcmask 1043456   ;;  %vm1932_vm8 = vcmask 257024  }
  0x12   : > { %s2652_s29 = scalar_lea.vmem %s3202_s0, %s2041_s23  ;;  %v412_v10 = vrot.slane %v410_v6, 1  ;;  %v415_v11 = vrot.slane %v413_v7, 2  ;;  %s2044_s7 = sshll.u32 %s3226_s24, 2  ;;  %v1291_v22 = vshrl.u32 %v2574_v12, 16  ;;  %v1294_v25 = vshll.u32 %v2574_v12, 16 }
  0x13   : > { %2337 = vmatprep.subr.bf16.mxu0 %v2640_v8  ;;  %v2659_v13 = vld [vmem:[%s2652_s29] sm:$0xff]   ;;  %v2664_v14 = vld [vmem:[%s2652_s29 + $0x8] sm:$0xff]   ;;  %v2679_v20 = vld [vmem:[%s2652_s29 + $0x10] sm:$0xff]   ;;  %p283_p5 = scmp.lt.s32.totalorder %s2167_s6, 27  ;;  %p272_p6 = scmp.lt.s32.totalorder %s2044_s7, 111 }
  0x14   : > { %2338 = vmatpush3.bf16.msra.mxu0 %v2640_v8  ;;  %v416_v15 = vor.u32 %v415_v11, %v412_v10  ;;  %v2667_v16 = vshll.u32 %v2659_v13, 16  ;;  %2339 = vmatprep.mubr.msk.bf16.mxu0 %vm417_vm2, %v2659_v13  ;;  %v2672_v17 = vshrl.u32 %v2659_v13, 16  ;;  %v2675_v18 = vshll.u32 %v2664_v14, 16  ;;  %v2689_v23 = vld [vmem:[%s2652_s29 + $0x18] sm:$0xff]   ;;  %v2712_v34 = vld [vmem:[%s2652_s29 + $0x20] sm:$0xff]   ;;  %v2733_v45 = vld [vmem:[%s2652_s29 + $0x28] sm:$0xff]  }
  0x15   : > { %s3228_s6 = smov (!%p283_p5, %s2167_s6), 27  ;;  %s3230_s7 = smov (!%p272_p6, %s2044_s7), 111  ;;  %v1293_v24 = vrot.slane %v1291_v22, 3  ;;  %v2693_v27 = vshrl.u32 %v2664_v14, 16  ;;  %v2696_v28 = vshrl.u32 %v2679_v20, 16  ;;  %v2701_v30 = vshll.u32 %v2679_v20, 16 }
  0x16   : > { %v447_v19 = vand.u32 %v2630_v3, %v416_v15  ;;  %v1257_v26 = vrot.slane %v2667_v16, 1  ;;  %s2047_s8 = sshll.u32 %s3228_s6, 2  ;;  %vm1256_vm4 = vsmask.f32 7424  ;;  %v1259_v29 = vrot.slane %v2675_v18, 1  ;;  %s2045_s9 = sshll.u32 %s3230_s7, 2 }
  0x17   : > { %2340 = vmatmul.mubr.msk.bf16.vlgmr.msra.gmra.mrb[0].mxu0 %vm417_vm2, %v2664_v14  ;;  %p2703_p7 = scmp.lt.s32.totalorder %s2047_s8, 111  ;;  %v2708_v31 = vshll.u32 %v2689_v23, 16  ;;  %v1296_v32 = vrot.slane %v1294_v25, 4  ;;  %3214 = vst [vmem:[#allocation2_spill] sm:$0xff] %v2712_v34  ;;  %s275_s13 = scalar_lea.vmem %s3203_s1, %s2045_s9  ;;  %v392_v37 = vrot.slane %v2659_v13, 4  ;;  %v394_v40 = vrot.slane %v2664_v14, 4 }
  0x18   : > { %2265 = vmatprep.subr.bf16.mxu1 %v447_v19  ;;  %2343 = vmatprep.mubr.msk.bf16.mxu0 %vm417_vm2, %v2679_v20  ;;  %v1258_v33 = vor.u32 %v1257_v26, %v2672_v17  ;;  %v2717_v35 = vld [vmem:[%s275_s13] sm:$0xff]   ;;  %v2721_v39 = vld [vmem:[%s275_s13 + $0x8] sm:$0xff]   ;;  %v1262_v43 = vrot.slane %v2701_v30, 1  ;;  %3215 = vst [vmem:[#allocation3_spill] sm:$0xff] %v2733_v45  ;;  %v1261_v47 = vor.u32 %v1259_v29, %v2693_v27  ;;  %v396_v48 = vrot.slane %v2679_v20, 4  ;;  %v2770_v63 = vld [vmem:[%s2652_s29 + $0x30] sm:$0xff]   ;;  %s3165_s7 = scalar_lea.vmem %s3206_s4, %s2041_s23 }
  0x19   : > { %2266 = vmatpush3.bf16.msra.mxu1 %v447_v19  ;;  %v1297_v36 = vor.u32 %v1296_v32, %v1293_v24  ;;  %v389_v41 = vrot.slane %v2717_v35, 4  ;;  %v2576_v44 = vld [vmem:[%s3205_s3 + $0x8] ss:$0 sps:$4 sm:$0x66]   ;;  %s3232_s8 = smov (!%p2703_p7, %s2047_s8), 111  ;;  %v390_v46 = vrot.slane %v2721_v39, 4  ;;  %v395_v55 = vsel %vm388_vm3, %v392_v37, %v394_v40 }
  0x1a   : > { %2283 = vmatprep.subr.bf16.mxu1 %v652_v21  ;;  %v1260_v38 = vsel %vm1256_vm4, %v1258_v33, %v1259_v29  ;;  %v1265_v49 = vrot.slane %v2708_v31, 1  ;;  %v1264_v50 = vor.u32 %v1262_v43, %v2696_v28  ;;  %v2746_v51 = vshll.u32 %v2712_v34, 16  ;;  %v2580_v61 = vld [vmem:[%s3205_s3] sm:$0x18]   ;;  %v2773_v0 = vld [vmem:[%s2652_s29 + $0x38] sm:$0xff]   ;;  %s2048_s20 = sshll.u32 %s3232_s8, 2 }
  0x1b   : > { %v1323_v42 = vand.u32 %v1297_v36, %v2630_v3  ;;  %v1461_v52 = vrot.slane %v2576_v44, 1  ;;  %v391_v53 = vsel %vm388_vm3, %v389_v41, %v390_v46  ;;  %v393_v54 = vsel %vm388_vm3, %v390_v46, %v392_v37  ;;  %s2784_s24 = scalar_lea.vmem %s3204_s2, %s2048_s20  ;;  %v2582_v37 = vld [vmem:[%s3205_s3 + $0x8] ss:$0 sps:$4 sm:$0xcc]  }
  0x1c   : > { %2267 = vmatprep.mubr.msk.bf16.mxu1 %vm417_vm2, %v391_v53  ;;  %v2753_v56 = vshrl.u32 %v2689_v23, 16  ;;  %v1263_v58 = vsel %vm1256_vm4, %v1261_v47, %v1262_v43  ;;  %v2759_v59 = vshrl.u32 %v2712_v34, 16  ;;  %v2762_v60 = vshll.u32 %v2733_v45, 16  ;;  %v2820_v26 = vld [vmem:[%s2784_s24] sm:$0xff]  }
  0x1d   : > { %2355 = vmatprep.subr.bf16.mxu0 %v1323_v42  ;;  %v1472_v57 = vand.u32 %v1461_v52, %v2630_v3  ;;  %2268 = vmatmul.mubr.msk.bf16.vlgmr.msra.gmra.mrb[0].mxu1 %vm417_vm2, %v393_v54  ;;  %v1266_v62 = vsel %vm1256_vm4, %v1264_v50, %v1265_v49  ;;  %v2777_v1 = vsel %vm388_vm3, %v394_v40, %v396_v48  ;;  %v398_v2 = vrot.slane %v2689_v23, 4 }
  0x1e   : > { %2356 = vmatpush3.bf16.msra.mxu0 %v1323_v42  ;;  %2284 = vmatpush3.bf16.msra.mxu1 %v652_v21  ;;  %v1268_v4 = vrot.slane %v2746_v51, 1  ;;  %v2787_v5 = vshrl.u32 %v2721_v39, 16  ;;  %v1267_v6 = vor.u32 %v1265_v49, %v2753_v56  ;;  %v400_v7 = vrot.slane %v2712_v34, 4 }
  0x1f   : > { %2344 = vmatmul.mubr.msk.bf16.gmra.mrb[4].mxu0 %vm417_vm2, %v2689_v23  ;;  %2271 = vmatprep.mubr.msk.bf16.mxu1 %vm417_vm2, %v395_v55  ;;  %v794_v9 = vrot.slane %v2580_v61, 3  ;;  %v1271_v11 = vrot.slane %v2762_v60, 1  ;;  %v402_v12 = vrot.slane %v2733_v45, 4  ;;  %v2797_v13 = vshrl.u32 %v2733_v45, 16 }
  0x20   : > { %2357 = vmatprep.mubr.msk.bf16.mxu0 %vm417_vm2, %v1260_v38  ;;  %2373 = vmatprep.subr.bf16.mxu0 %v1472_v57  ;;  %v1270_v10 = vor.u32 %v1268_v4, %v2759_v59  ;;  %v2800_v14 = vshll.u32 %v2770_v63, 16  ;;  %v2803_v15 = vshll.u32 %v2773_v0, 16  ;;  %v3210_v19 = vshrl.u32 %v2717_v35, 16 }
  0x21   : > { %v2807_v20 = vand.u32 %v794_v9, %v2630_v3  ;;  %v2810_v21 = vsel %vm388_vm3, %v396_v48, %v398_v2  ;;  %v3208_v22 = vshll.u32 %v2717_v35, 16  ;;  %v3207_v23 = vshll.u32 %v2721_v39, 16 }
  0x22   : > { %v1269_v24 = vsel %vm1256_vm4, %v1267_v6, %v1268_v4  ;;  %v2816_v25 = vsel %vm388_vm3, %v398_v2, %v400_v7  ;;  %v1272_v29 = vsel %vm1256_vm4, %v1270_v10, %v1271_v11  ;;  %v2828_v32 = vsel %vm388_vm3, %v400_v7, %v402_v12 }
  0x23   : > { %2301 = vmatprep.subr.bf16.mxu1 %v2807_v20  ;;  %v1273_v33 = vor.u32 %v1271_v11, %v2797_v13  ;;  %v2832_v36 = vshrl.u32 %v2770_v63, 16  ;;  %v1274_v38 = vrot.slane %v2800_v14, 1  ;;  %v1277_v40 = vrot.slane %v2803_v15, 1 }
  0x24   : > { %v550_v41 = vrot.slane %v3210_v19, 3  ;;  %v558_v42 = vrot.slane %v2787_v5, 3  ;;  %v553_v43 = vrot.slane %v3208_v22, 4  ;;  %v561_v44 = vrot.slane %v3207_v23, 4 }
  0x25   : > { %2272 = vmatmul.mubr.msk.bf16.gmra.mrb[4].mxu1 %vm417_vm2, %v2777_v1  ;;  %v2849_v46 = vshrl.u32 %v2773_v0, 16  ;;  %v567_v47 = vrot.slane %v2672_v17, 3  ;;  %v2854_v48 = vshll.u32 %v2820_v26, 16  ;;  %v570_v49 = vrot.slane %v2667_v16, 4 }
  0x26   : > { %2275 = vmatprep.mubr.msk.bf16.mxu1 %vm417_vm2, %v2810_v21  ;;  %v576_v50 = vrot.slane %v2693_v27, 3  ;;  %v579_v52 = vrot.slane %v2675_v18, 4  ;;  %v585_v53 = vrot.slane %v2696_v28, 3  ;;  %v588_v54 = vrot.slane %v2701_v30, 4 }
  0x27   : > { %2358 = vmatmul.mubr.msk.bf16.vlgmr.msra.gmra.mrb[0].mxu0 %vm417_vm2, %v1263_v58  ;;  %v1598_v55 = vshrl.u32 %v2582_v37, 16  ;;  %v3209_v58 = vrot.slane %v2770_v63, 4  ;;  %v1276_v61 = vor.u32 %v1274_v38, %v2832_v36  ;;  %v597_v2 = vrot.slane %v2708_v31, 4 }
  0x28   : > { %2361 = vmatprep.mubr.msk.bf16.mxu0 %vm417_vm2, %v1266_v62  ;;  %2374 = vmatpush3.bf16.msra.mxu0 %v1472_v57  ;;  %v1601_v57 = vshll.u32 %v2582_v37, 16  ;;  %v594_v62 = vrot.slane %v2753_v56, 3  ;;  %v1275_v4 = vsel %vm1256_vm4, %v1273_v33, %v1274_v38  ;;  %vm546_vm5 = vsmask.f32 4352 }
  0x29   : > { %v1600_v6 = vrot.slane %v1598_v55, 2  ;;  %v554_v9 = vor.u32 %v553_v43, %v550_v41  ;;  %v562_v10 = vor.u32 %v561_v44, %v558_v42  ;;  %v1279_v11 = vor.u32 %v1277_v40, %v2849_v46 }
  0x2a   : > { %v1603_v7 = vrot.slane %v1601_v57, 3  ;;  %v1283_v37 = vrot.slane %v2854_v48, 1  ;;  %v580_v23 = vor.u32 %v579_v52, %v576_v50  ;;  %v589_v22 = vor.u32 %v588_v54, %v585_v53 }
  0x2b   : > { %v1278_v38 = vsel %vm1256_vm4, %v1276_v61, %v1277_v40  ;;  %v598_v41 = vor.u32 %v597_v2, %v594_v62  ;;  %v603_v42 = vrot.slane %v2759_v59, 3  ;;  %v606_v43 = vrot.slane %v2746_v51, 4 }
  0x2c   : > { %v1604_v33 = vor.u32 %v1603_v7, %v1600_v6  ;;  %v612_v44 = vrot.slane %v2797_v13, 3  ;;  %v2890_v40 = vsel %vm388_vm3, %v402_v12, %v3209_v58  ;;  %v563_v50 = vsel %vm546_vm5, %v554_v9, %v562_v10 }
  0x2d   : > { %2276 = vmatmul.mubr.msk.bf16.gmra.mrb[8].mxu1 %vm417_vm2, %v2816_v25  ;;  %v1284_v54 = vsel %vm1256_vm4, %v1279_v11, %v1283_v37  ;;  %v2897_v55 = vsel %vm546_vm5, %v580_v23, %v589_v22  ;;  %v761_v61 = vrot.slane %v2672_v17, 4  ;;  %v2903_v12 = vsel %vm546_vm5, %v589_v22, %v598_v41 }
  0x2e   : > { %2279 = vmatprep.mubr.msk.bf16.mxu1 %vm417_vm2, %v2828_v32  ;;  %v2905_v62 = vor.u32 %v606_v43, %v603_v42  ;;  %v762_v2 = vrot.slane %v2667_v16, 5  ;;  %v769_v22 = vrot.slane %v2696_v28, 4  ;;  %v624_v37 = vrot.slane %v2800_v14, 4 }
  0x2f   : > { %2362 = vmatmul.mubr.msk.bf16.gmra.mrb[4].mxu0 %vm417_vm2, %v1269_v24  ;;  %v571_v24 = vor.u32 %v570_v49, %v567_v47  ;;  %v615_v47 = vrot.slane %v2762_v60, 4  ;;  %v2882_v49 = vand.u32 %v1604_v33, %v2630_v3  ;;  %vm753_vm6 = vsmask.f32 3328 }
  0x30   : > { %2365 = vmatprep.mubr.msk.bf16.mxu0 %vm417_vm2, %v1272_v29  ;;  %v2583_v29 = vld [vmem:[%s3205_s3 + $0x4] ss:$0 sps:$4 sm:$0x33]   ;;  %v2913_v11 = vor.u32 %v762_v2, %v761_v61  ;;  %v2925_v42 = vsel %vm546_vm5, %v598_v41, %v2905_v62  ;;  %v778_v41 = vrot.slane %v2746_v51, 5  ;;  %v782_v58 = vrot.slane %v2762_v60, 5 }
  0x31   : > { %v572_v52 = vsel %vm546_vm5, %v562_v10, %v571_v24  ;;  %v973_v53 = vshll.u32 %v2583_v29, 16  ;;  %v581_v57 = vsel %vm546_vm5, %v571_v24, %v580_v23  ;;  %2391 = vmatprep.subr.bf16.mxu0 %v2882_v49  ;;  %v2909_v6 = vor.u32 %v615_v47, %v612_v44  ;;  %v2929_v44 = vld [vmem:[%s2784_s24 + $0x8] sm:$0xff]  }
  0x32   : > { %v971_v7 = vshrl.u32 %v2583_v29, 16  ;;  %v766_v23 = vrot.slane %v2675_v18, 5  ;;  %v621_v10 = vrot.slane %v2832_v36, 3  ;;  %v770_v24 = vrot.slane %v2701_v30, 5 }
  0x33   : > { %v975_v9 = vrot.slane %v973_v53, 1  ;;  %v773_v29 = vrot.slane %v2753_v56, 4  ;;  %v938_v43 = vrot.slane %v2672_v17, 7  ;;  %v1453_v45 = vshll.u32 %v2929_v44, 16 }
  0x34   : > { %v771_v47 = vor.u32 %v770_v24, %v769_v22  ;;  %v785_v22 = vrot.slane %v2832_v36, 4  ;;  %v1443_v24 = vshrl.u32 %v2820_v26, 16  ;;  %vm936_vm7 = vsmask.f32 256 }
  0x35   : > { %2280 = vmatmul.mubr.msk.bf16.gmra.mrb[12].mxu1 %vm417_vm2, %v2890_v40  ;;  %v976_v53 = vor.u32 %v975_v9, %v971_v7  ;;  %v2945_v7 = vor.u32 %v624_v37, %v621_v10  ;;  %v1730_v10 = vld [vmem:[%s3205_s3 + $0xc] sm:$0x3]  ;;  %v944_v17 = vrot.slane %v2696_v28, 7 }
  0x36   : > { %2285 = vmatprep.mubr.msk.bf16.mxu1 %vm417_vm2, %v563_v50 }
  0x37   : > { %2366 = vmatmul.mubr.msk.bf16.gmra.mrb[8].mxu0 %vm417_vm2, %v1275_v4  ;;  %v765_v4 = vrot.slane %v2693_v27, 4  ;;  %v2955_v19 = vand.u32 %v976_v53, %v2630_v3  ;;  %v939_v53 = vor.u32 %v938_v43, %v2667_v16  ;;  %v945_v28 = vor.u32 %v944_v17, %v2701_v30 }
  0x38   : > { %2369 = vmatprep.mubr.msk.bf16.mxu0 %vm417_vm2, %v1278_v38  ;;  %v774_v38 = vrot.slane %v2708_v31, 5 }
  0x39   : > { %v767_v33 = vor.u32 %v766_v23, %v765_v4  ;;  %v777_v4 = vrot.slane %v2759_v59, 4  ;;  %v781_v23 = vrot.slane %v2797_v13, 4 }
  0x3a   : > { %v775_v2 = vor.u32 %v774_v38, %v773_v29 }
  0x3b   : > { %v2933_v61 = vsel %vm753_vm6, %v2913_v11, %v767_v33  ;;  %v2938_v50 = vsel %vm753_vm6, %v767_v33, %v771_v47  ;;  %v1450_v33 = vshrl.u32 %v2929_v44, 16  ;;  %v779_v29 = vor.u32 %v778_v41, %v777_v4 }
  0x3c   : > { %v2948_v9 = vsel %vm753_vm6, %v771_v47, %v775_v2  ;;  %v783_v38 = vor.u32 %v782_v58, %v781_v23  ;;  %v937_v47 = vrot.slane %v2787_v5, 7  ;;  %v941_v41 = vrot.slane %v2693_v27, 7 }
  0x3d   : > { %v2964_v34 = vsel %vm753_vm6, %v775_v2, %v779_v29  ;;  %2286 = vmatmul.mubr.msk.bf16.vlgmr.msra.gmra.mrb[0].mxu1 %vm417_vm2, %v572_v52  ;;  %v2979_v2 = vand.u32 %v1730_v10, %v2630_v3  ;;  %v947_v23 = vrot.slane %v2753_v56, 7  ;;  %v950_v52 = vrot.slane %v2759_v59, 7 }
  0x3e   : > { %v2967_v4 = vsel %vm753_vm6, %v779_v29, %v783_v38  ;;  %2302 = vmatpush3.bf16.msra.mxu1 %v2807_v20  ;;  %2289 = vmatprep.mubr.msk.bf16.mxu1 %vm417_vm2, %v581_v57  ;;  %v2986_v16 = vsel %vm936_vm7, %v937_v47, %v939_v53  ;;  %v942_v27 = vor.u32 %v941_v41, %v2675_v18  ;;  %v956_v20 = vrot.slane %v2832_v36, 7 }
  0x3f   : > { %2370 = vmatmul.mubr.msk.bf16.gmra.mrb[12].mxu0 %vm417_vm2, %v1284_v54  ;;  %v786_v54 = vrot.slane %v2800_v14, 5  ;;  %2319 = vmatprep.subr.bf16.mxu1 %v2955_v19  ;;  %v948_v3 = vor.u32 %v947_v23, %v2708_v31  ;;  %v951_v56 = vor.u32 %v950_v52, %v2746_v51  ;;  %v3004_v30 = vsel %vm936_vm7, %v941_v41, %v945_v28 }
  0x40   : > { %2375 = vmatprep.mubr.msk.bf16.mxu0 %vm417_vm2, %v2897_v55  ;;  %v3001_v18 = vsel %vm936_vm7, %v938_v43, %v942_v27  ;;  %v957_v36 = vor.u32 %v956_v20, %v2800_v14  ;;  %v1732_v31 = vrot.slane %v2803_v15, 5  ;;  %v962_v57 = vrot.slane %v2849_v46, 7 }
  0x41   : > { %v787_v37 = vor.u32 %v786_v54, %v785_v22  ;;  %v953_v22 = vrot.slane %v2797_v13, 7  ;;  %v1731_v13 = vrot.slane %v2849_v46, 4  ;;  %v3010_v51 = vsel %vm936_vm7, %v944_v17, %v948_v3 }
  0x42   : > { %v1735_v14 = vrot.slane %v1443_v24, 4  ;;  %v1736_v29 = vrot.slane %v2854_v48, 5  ;;  %v965_v10 = vor.u32 %v2803_v15, %v962_v57  ;;  %v1739_v47 = vrot.slane %v1450_v33, 4 }
  0x43   : > { %v2971_v58 = vsel %vm753_vm6, %v783_v38, %v787_v37  ;;  %v954_v59 = vor.u32 %v953_v22, %v2762_v60  ;;  %v3013_v60 = vsel %vm936_vm7, %v947_v23, %v951_v56  ;;  %v3020_v43 = vsel %vm936_vm7, %v953_v22, %v957_v36 }
  0x44   : > { %v1733_v54 = vor.u32 %v1732_v31, %v1731_v13  ;;  %v617_v38 = vsel %vm546_vm5, %v2905_v62, %v2909_v6  ;;  %v1740_v53 = vrot.slane %v1453_v45, 5  ;;  %v1440_v41 = vrot.slane %v2803_v15, 4 }
  0x45   : > { %2290 = vmatmul.mubr.msk.bf16.gmra.mrb[4].mxu1 %vm417_vm2, %v2897_v55  ;;  %v1446_v17 = vrot.slane %v2854_v48, 4  ;;  %v626_v62 = vsel %vm546_vm5, %v2909_v6, %v2945_v7  ;;  %v1445_v22 = vrot.slane %v1443_v24, 3  ;;  %v3044_v27 = vsel %vm936_vm7, %v956_v20, %v965_v10 }
  0x46   : > { %v3036_v23 = vsel %vm753_vm6, %v787_v37, %v1733_v54  ;;  %2293 = vmatprep.mubr.msk.bf16.mxu1 %vm417_vm2, %v2903_v12  ;;  %v1741_v55 = vor.u32 %v1740_v53, %v1739_v47  ;;  %v3217_v6 = vshrl.u32 %v2717_v35, 16  ;;  %v3218_v20 = vshll.u32 %v2717_v35, 16 }
  0x47   : > { %2376 = vmatmul.mubr.msk.bf16.vlgmr.msra.gmra.mrb[0].mxu0 %vm417_vm2, %v2903_v12  ;;  %v3216_v12 = vrot.slane %v2849_v46, 3  ;;  %v1447_v28 = vor.u32 %v1446_v17, %v1445_v22  ;;  %v757_v56 = vrot.slane %v2787_v5, 4  ;;  %v1452_v46 = vrot.slane %v1450_v33, 3 }
  0x48   : > { %2379 = vmatprep.mubr.msk.bf16.mxu0 %vm417_vm2, %v2925_v42  ;;  %2392 = vmatpush3.bf16.msra.mxu0 %v2882_v49  ;;  %v3016_v49 = vsel %vm936_vm7, %v950_v52, %v954_v59  ;;  %v1737_v52 = vor.u32 %v1736_v29, %v1735_v14  ;;  %v754_v24 = vrot.slane %v3217_v6, 4  ;;  %v755_v3 = vrot.slane %v3218_v20, 5 }
  0x49   : > { %2409 = vmatprep.subr.bf16.mxu0 %v2979_v2  ;;  %v1441_v37 = vor.u32 %v1440_v41, %v3216_v12  ;;  %v3219_v59 = vshll.u32 %v2721_v39, 16  ;;  %v1455_v31 = vrot.slane %v1453_v45, 4 }
  0x4a   : > { %v3047_v15 = vsel %vm753_vm6, %v1733_v54, %v1737_v52  ;;  %v3051_v48 = vsel %vm753_vm6, %v1737_v52, %v1741_v55  ;;  %v756_v5 = vor.u32 %v755_v3, %v754_v24 }
  0x4b   : > { %v758_v13 = vrot.slane %v3219_v59, 5  ;;  %v1442_v36 = vsel %vm546_vm5, %v2945_v7, %v1441_v37  ;;  %v1448_v35 = vsel %vm546_vm5, %v1441_v37, %v1447_v28  ;;  %v1456_v39 = vor.u32 %v1455_v31, %v1452_v46 }
  0x4d   : > { %2294 = vmatmul.mubr.msk.bf16.gmra.mrb[8].mxu1 %vm417_vm2, %v2925_v42  ;;  %v759_v57 = vor.u32 %v758_v13, %v757_v56  ;;  %v1457_v7 = vsel %vm546_vm5, %v1447_v28, %v1456_v39 }
  0x4e   : > { %2297 = vmatprep.mubr.msk.bf16.mxu1 %vm417_vm2, %v617_v38 }
  0x4f   : > { %2380 = vmatmul.mubr.msk.bf16.gmra.mrb[4].mxu0 %vm417_vm2, %v617_v38  ;;  %v760_v42 = vsel %vm753_vm6, %v756_v5, %v759_v57  ;;  %v764_v45 = vsel %vm753_vm6, %v759_v57, %v2913_v11 }
  0x50   : > { %2383 = vmatprep.mubr.msk.bf16.mxu0 %vm417_vm2, %v626_v62 }
  0x55   : > { %2298 = vmatmul.mubr.msk.bf16.gmra.mrb[12].mxu1 %vm417_vm2, %v626_v62 }
  0x56   : > { %2303 = vmatprep.mubr.msk.bf16.mxu1 %vm417_vm2, %v760_v42 }
  0x57   : > { %2384 = vmatmul.mubr.msk.bf16.gmra.mrb[8].mxu0 %vm417_vm2, %v1442_v36 }
  0x58   : > { %2387 = vmatprep.mubr.msk.bf16.mxu0 %vm417_vm2, %v1448_v35 }
  0x5d   : > { %2304 = vmatmul.mubr.msk.bf16.vlgmr.msra.gmra.mrb[0].mxu1 %vm417_vm2, %v764_v45 }
  0x5e   : > { %2320 = vmatpush3.bf16.msra.mxu1 %v2955_v19  ;;  %2307 = vmatprep.mubr.msk.bf16.mxu1 %vm417_vm2, %v2933_v61  ;;  %v1590_v19 = vrot.slane %v2820_v26, 4 }
  0x5f   : > { %2388 = vmatmul.mubr.msk.bf16.gmra.mrb[12].mxu0 %vm417_vm2, %v1457_v7  ;;  %2427 = vmatprep.subr.bf16.mxu1 %v2640_v8 }
  0x60   : > { %2393 = vmatprep.mubr.msk.bf16.mxu0 %vm417_vm2, %v2777_v1  ;;  %v1588_v1 = vrot.slane %v2773_v0, 4 }
  0x62   : > { %v1591_v11 = vsel %vm388_vm3, %v1588_v1, %v1590_v19 }
  0x65   : > { %2308 = vmatmul.mubr.msk.bf16.gmra.mrb[4].mxu1 %vm417_vm2, %v2938_v50 }
  0x66   : > { %2311 = vmatprep.mubr.msk.bf16.mxu1 %vm417_vm2, %v2948_v9 }
  0x67   : > { %2394 = vmatmul.mubr.msk.bf16.vlgmr.msra.gmra.mrb[0].mxu0 %vm417_vm2, %v2810_v21  ;;  %v3220_v21 = vrot.slane %v2770_v63, 4 }
  0x68   : > { %2397 = vmatprep.mubr.msk.bf16.mxu0 %vm417_vm2, %v2816_v25  ;;  %2410 = vmatpush3.bf16.msra.mxu0 %v2979_v2 }
  0x69   : > { %v1589_v25 = vsel %vm388_vm3, %v3220_v21, %v1588_v1 }
  0x6d   : > { %2312 = vmatmul.mubr.msk.bf16.gmra.mrb[8].mxu1 %vm417_vm2, %v2964_v34 }
  0x6e   : > { %2315 = vmatprep.mubr.msk.bf16.mxu1 %vm417_vm2, %v2967_v4 }
  0x6f   : > { %2398 = vmatmul.mubr.msk.bf16.gmra.mrb[4].mxu0 %vm417_vm2, %v2828_v32  ;;  %v1592_v32 = vrot.slane %v2929_v44, 4 }
  0x70   : > { %2401 = vmatprep.mubr.msk.bf16.mxu0 %vm417_vm2, %v2890_v40 }
  0x71   : > { %v1593_v26 = vsel %vm388_vm3, %v1590_v19, %v1592_v32 }
  0x75   : > { %2316 = vmatmul.mubr.msk.bf16.gmra.mrb[12].mxu1 %vm417_vm2, %v2971_v58 }
  0x76   : > { %2321 = vmatprep.mubr.msk.bf16.mxu1 %vm417_vm2, %v2986_v16 }
  0x77   : > { %2402 = vmatmul.mubr.msk.bf16.gmra.mrb[8].mxu0 %vm417_vm2, %v1589_v25 }
  0x78   : > { %2405 = vmatprep.mubr.msk.bf16.mxu0 %vm417_vm2, %v1591_v11 }
  0x7d   : > { %2322 = vmatmul.mubr.msk.bf16.vlgmr.msra.gmra.mrb[0].mxu1 %vm417_vm2, %v3001_v18 }
  0x7e   : > { %2428 = vmatpush3.bf16.msra.mxu1 %v2640_v8  ;;  %2325 = vmatprep.mubr.msk.bf16.mxu1 %vm417_vm2, %v3004_v30  ;;  %v3221_v8 = vld [vmem:[#allocation2_spill] sm:$0xff] }
  0x7f   : > { %2406 = vmatmul.mubr.msk.bf16.gmra.mrb[12].mxu0 %vm417_vm2, %v1593_v26 }
  0x80   : > { %2411 = vmatprep.mubr.msk.bf16.mxu0 %vm417_vm2, %v2938_v50 }
  0x85   : > { %2326 = vmatmul.mubr.msk.bf16.gmra.mrb[4].mxu1 %vm417_vm2, %v3010_v51 }
  0x86   : > { %2329 = vmatprep.mubr.msk.bf16.mxu1 %vm417_vm2, %v3013_v60 }
  0x87   : > { %2412 = vmatmul.mubr.msk.bf16.vlgmr.msra.gmra.mrb[0].mxu0 %vm417_vm2, %v2948_v9 }
  0x88   : > { %2415 = vmatprep.mubr.msk.bf16.mxu0 %vm417_vm2, %v2964_v34  ;;  %v3222_v34 = vld [vmem:[#allocation3_spill] sm:$0xff] }
  0x8d   : > { %2330 = vmatmul.mubr.msk.bf16.gmra.mrb[8].mxu1 %vm417_vm2, %v3016_v49 }
  0x8e   : > { %2333 = vmatprep.mubr.msk.bf16.mxu1 %vm417_vm2, %v3020_v43 }
  0x8f   : > { %2416 = vmatmul.mubr.msk.bf16.gmra.mrb[4].mxu0 %vm417_vm2, %v2967_v4 }
  0x90   : > { %2419 = vmatprep.mubr.msk.bf16.mxu0 %vm417_vm2, %v2971_v58 }
  0x95   : > { %2334 = vmatmul.mubr.msk.bf16.gmra.mrb[12].mxu1 %vm417_vm2, %v3044_v27 }
  0x96   : > { %2347 = vmatprep.mubr.msk.bf16.mxu1 %vm417_vm2, %v3221_v8 }
  0x97   : > { %2420 = vmatmul.mubr.msk.bf16.gmra.mrb[8].mxu0 %vm417_vm2, %v3036_v23 }
  0x98   : > { %2423 = vmatprep.mubr.msk.bf16.mxu0 %vm417_vm2, %v3047_v15 }
  0x9d   : > { %2348 = vmatmul.mubr.msk.bf16.vlgmr.msra.gmra.mrb[8].mxu1 %vm417_vm2, %v3222_v34 }
  0x9e   : > { %2351 = vmatprep.mubr.msk.bf16.mxu1 %vm417_vm2, %v2770_v63 }
  0x9f   : > { %2424 = vmatmul.mubr.msk.bf16.gmra.mrb[12].mxu0 %vm417_vm2, %v3051_v48 }
  0xa5   : > { %2352 = vmatmul.mubr.msk.bf16.gmra.mrb[12].mxu1 %vm417_vm2, %v2773_v0 }
 0x150   : > { %v2323_v40 = vpop.f32.mrb[0].mxu1 }
 0x151   : > { %v1038_v44 = vpop.f32.mrb[1].mxu1 }
 0x152   : > { %v2324_v61 = vpop.f32.mrb[2].mxu1 }
 0x153   : > { %v1041_v50 = vpop.f32.mrb[3].mxu1 }
 0x158   : > { %v2327_v51 = vpop.f32.mrb[4].mxu1 }
 0x159   : > { %v1054_v49 = vpop.f32.mrb[5].mxu1 }
 0x15a   : > { %v2413_v9 = vpop.f32.mrb[0].mxu0  ;;  %v2328_v54 = vpop.f32.mrb[6].mxu1 }
 0x15b   : > { %v2429_v33 = vadd.f32 %v2413_v9, %v2323_v40  ;;  %v1789_v4 = vpop.f32.mrb[1].mxu0  ;;  %v1057_v14 = vpop.f32.mrb[7].mxu1 }
 0x15c   : > { %v2430_v63 = vadd.f32 %v1789_v4, %v1038_v44  ;;  %v2414_v0 = vpop.f32.mrb[2].mxu0 }
 0x15d   : > { %v2170_v58 = vpack.c.bf16 %v2429_v33, %v2429_v33  ;;  %v2431_v2 = vadd.f32 %v2414_v0, %v2324_v61  ;;  %v1792_v16 = vpop.f32.mrb[3].mxu0 }
 0x15e   : > { %v2168_v18 = vpack.c.bf16 %v2430_v63, %v2430_v63  ;;  %v2432_v30 = vadd.f32 %v1792_v16, %v1041_v50 }
 0x15f   : > { %1935 = vst.msk [vmem:[%s3165_s7 + $0x8] sm:$0xf] %vm1932_vm8, %v2170_v58  ;;  %v2171_v60 = vpack.c.bf16 %v2431_v2, %v2431_v2 }
 0x160   : > { %1933 = vst.msk [vmem:[%s3165_s7] sm:$0xf] %vm1932_vm8, %v2168_v18  ;;  %v2169_v43 = vpack.c.bf16 %v2432_v30, %v2432_v30 }
 0x161   : > { %1936 = vst.msk [vmem:[%s3165_s7 + $0xc] sm:$0xf] %vm1932_vm8, %v2171_v60 }
 0x162   : > { %1934 = vst.msk [vmem:[%s3165_s7 + $0x4] sm:$0xf] %vm1932_vm8, %v2169_v43  ;;  %v2417_v29 = vpop.f32.mrb[4].mxu0 }
 0x163   : > { %v2433_v38 = vadd.f32 %v2417_v29, %v2327_v51  ;;  %v1805_v10 = vpop.f32.mrb[5].mxu0 }
 0x164   : > { %v2434_v47 = vadd.f32 %v1805_v10, %v1054_v49  ;;  %v2418_v53 = vpop.f32.mrb[6].mxu0 }
 0x165   : > { %v2174_v41 = vpack.c.bf16 %v2433_v38, %v2433_v38  ;;  %v2435_v17 = vadd.f32 %v2418_v53, %v2328_v54  ;;  %v1808_v23 = vpop.f32.mrb[7].mxu0 }
 0x166   : > { %v2172_v52 = vpack.c.bf16 %v2434_v47, %v2434_v47  ;;  %v2436_v62 = vadd.f32 %v1808_v23, %v1057_v14 }
 0x167   : > { %1939 = vst.msk [vmem:[%s3165_s7 + $0x18] sm:$0xf] %vm1932_vm8, %v2174_v41  ;;  %v2175_v22 = vpack.c.bf16 %v2435_v17, %v2435_v17 }
 0x168   : > { %1937 = vst.msk [vmem:[%s3165_s7 + $0x10] sm:$0xf] %vm1932_vm8, %v2172_v52  ;;  %v2173_v27 = vpack.c.bf16 %v2436_v62, %v2436_v62 }
 0x169   : > { %1940 = vst.msk [vmem:[%s3165_s7 + $0x1c] sm:$0xf] %vm1932_vm8, %v2175_v22 }
 0x16a   : > { %1938 = vst.msk [vmem:[%s3165_s7 + $0x14] sm:$0xf] %vm1932_vm8, %v2173_v27  ;;  %v2421_v55 = vpop.f32.mrb[8].mxu0 }
 0x16b   : > { %v1821_v15 = vpop.f32.mrb[9].mxu0 }
 0x16c   : > { %v2422_v48 = vpop.f32.mrb[10].mxu0 }
 0x16d   : > { %v1824_v12 = vpop.f32.mrb[11].mxu0 }
 0x170   : > { %v2349_v20 = vpop.f32.mrb[8].mxu1 }
 0x171   : > { %v2437_v3 = vadd.f32 %v2421_v55, %v2349_v20  ;;  %v1207_v56 = vpop.f32.mrb[9].mxu1 }
 0x172   : > { %v2425_v37 = vpop.f32.mrb[12].mxu0  ;;  %v2438_v59 = vadd.f32 %v1821_v15, %v1207_v56  ;;  %v2350_v13 = vpop.f32.mrb[10].mxu1 }
 0x173   : > { %v1837_v28 = vpop.f32.mrb[13].mxu0  ;;  %v2178_v36 = vpack.c.bf16 %v2437_v3, %v2437_v3  ;;  %v2439_v46 = vadd.f32 %v2422_v48, %v2350_v13  ;;  %v1210_v31 = vpop.f32.mrb[11].mxu1 }
 0x174   : > { %v2426_v6 = vpop.f32.mrb[14].mxu0  ;;  %v2176_v35 = vpack.c.bf16 %v2438_v59, %v2438_v59  ;;  %v2440_v5 = vadd.f32 %v1824_v12, %v1210_v31 }
 0x175   : > { %v1840_v24 = vpop.f32.mrb[15].mxu0  ;;  %1943 = vst.msk [vmem:[%s3165_s7 + $0x28] sm:$0xf] %vm1932_vm8, %v2178_v36  ;;  %v2179_v57 = vpack.c.bf16 %v2439_v46, %v2439_v46 }
 0x176   : > { %1941 = vst.msk [vmem:[%s3165_s7 + $0x20] sm:$0xf] %vm1932_vm8, %v2176_v35  ;;  %v2177_v39 = vpack.c.bf16 %v2440_v5, %v2440_v5 }
 0x177   : > { %1944 = vst.msk [vmem:[%s3165_s7 + $0x2c] sm:$0xf] %vm1932_vm8, %v2179_v57 }
 0x178   : > { %1942 = vst.msk [vmem:[%s3165_s7 + $0x24] sm:$0xf] %vm1932_vm8, %v2177_v39  ;;  %v2353_v42 = vpop.f32.mrb[12].mxu1 }
 0x179   : > { %v2441_v7 = vadd.f32 %v2425_v37, %v2353_v42  ;;  %v1223_v45 = vpop.f32.mrb[13].mxu1 }
 0x17a   : > { %v2442_v1 = vadd.f32 %v1837_v28, %v1223_v45  ;;  %v2354_v19 = vpop.f32.mrb[14].mxu1 }
 0x17b   : > { %v2182_v21 = vpack.c.bf16 %v2441_v7, %v2441_v7  ;;  %v2443_v25 = vadd.f32 %v2426_v6, %v2354_v19  ;;  %v1226_v11 = vpop.f32.mrb[15].mxu1 }
 0x17c   : > { %v2180_v32 = vpack.c.bf16 %v2442_v1, %v2442_v1  ;;  %v2444_v26 = vadd.f32 %v1840_v24, %v1226_v11 }
 0x17d   : > { %1947 = vst.msk [vmem:[%s3165_s7 + $0x38] sm:$0xf] %vm1932_vm8, %v2182_v21  ;;  %v2183_v8 = vpack.c.bf16 %v2443_v25, %v2443_v25 }
 0x17e   : > { %1945 = vst.msk [vmem:[%s3165_s7 + $0x30] sm:$0xf] %vm1932_vm8, %v2180_v32  ;;  %v2181_v34 = vpack.c.bf16 %v2444_v26, %v2444_v26 }
 0x17f   : > { %1948 = vst.msk [vmem:[%s3165_s7 + $0x3c] sm:$0xf] %vm1932_vm8, %v2183_v8 }
 0x180   : > { %1946 = vst.msk [vmem:[%s3165_s7 + $0x34] sm:$0xf] %vm1932_vm8, %v2181_v34 }
 0x181 PF: > { %s14_s15 = sadd.s32 1, %s2591_s15  }
 0x182   : > { %p11_p8 = scmp.ge.s32.totalorder %s14_s15, 9  }
 0x184   :  { %13 = sbr.rel (!%p11_p8) target bundleno = 1 (0x1), region = 72 }

// kernel: _lambda_.6
= control target key start
LH: loop header
LB: loop body
LE: loop exit
PB: predicated region body
PF: predicated region fallthrough
CT: control target
= control target key end

     0   :  { %s2822_s13 = smov 0   ;;  %s3782_s0 = inlined_call_operand.vmem [shape: bf16[896,32], index: 0, kind: input, shape index: {}, may-alias: {0,1,2}]   ;;  %s3783_s1 = inlined_call_operand.vmem [shape: bf16[896,32], index: 1, kind: input, shape index: {}, may-alias: {0,1,2}]   ;;  %s3784_s2 = inlined_call_operand.vmem [shape: bf16[896,32], index: 2, kind: input, shape index: {}, may-alias: {0,1,2}]   ;;  %s3785_s3 = inlined_call_operand.vmem [shape: f32[896,1], index: 3, kind: input, shape index: {}, may-alias: {3,4,5}]   ;;  %s3786_s4 = inlined_call_operand.vmem [shape: f32[896,1], index: 4, kind: input, shape index: {}, may-alias: {3,4,5}]   ;;  %s3787_s5 = inlined_call_operand.vmem [shape: f32[896,1], index: 5, kind: input, shape index: {}, may-alias: {3,4,5}]   ;;  %s3788_s6 = inlined_call_operand.vmem [shape: f32[1,32], index: 6, kind: input, shape index: {}]   ;;  %s3789_s7 = inlined_call_operand.vmem [shape: f32[1,32], index: 7, kind: input, shape index: {}]   ;;  %s3790_s8 = inlined_call_operand.vmem [shape: bf16[288,32], index: 8, kind: input, shape index: {}]   ;;  %s3791_s9 = inlined_call_operand.vmem [shape: bf16[896,32], index: 9, kind: output, shape index: {0}]   ;;  %s3792_s10 = inlined_call_operand.vmem [shape: f32[7,2,32], index: 10, kind: output, shape index: {1}]  }
   0x1 LB: > { %s2828_s14 = sadd.s32 4294967295, %s2761_s13   ;;  %p2478_p0 = scmp.ge.s32.totalorder %s2761_s13, 1  ;;  %s2761_s13 = sphi %s2822_s13, %s21_s13  }
   0x2   : > { %p435_p1 = scmp.lt.s32.totalorder %s2761_s13, 8 }
   0x4   : > { %p436_p2 = pnand %p2478_p0, %p435_p1 }
   0x5   : > { %s2479_s15 = sshll.u32 (!%p436_p2), %s2828_s14, 4  ;;  %s2481_s16 = sshll.u32 (!%p436_p2), %s2828_s14, 2  ;;  %v2763_v0 = vmov (!%p436_p2), 0   ;;  %v2865_v13 = vld [vmem:[%s3788_s6] ss:$0 sm:$0xff] (!%p436_p2)  ;;  %vm1082_vm1 = vcmask (!%p436_p2), 1046528  }
   0x6   : > { %439 = sbr.rel (%p436_p2) target bundleno = 671 (0x29f), region = 56  ;;  %2713 = vset.pattern.permute.xlu1 (!%p436_p2), %v2763_v0  ;;  %2712 = vset.pattern.permute.xlu0 (!%p436_p2), %v2763_v0  ;;  %p519_p3 = scmp.lt.s32.totalorder (!%p436_p2), %s2479_s15, 111  ;;  %v2870_v14 = vld [vmem:[%s3789_s7] ss:$0 sm:$0xff] (!%p436_p2)  ;;  %vm1155_vm0 = vsmask.f32 (!%p436_p2), 3328 }
   0x7   : > { %s2482_s17 = sadd.s32 (!%p436_p2), 4294967295, %s2481_s16  ;;  %s2571_s18 = sadd.s32 (!%p436_p2), 4, %s2481_s16  ;;  %vm1193_vm2 = vcmask (!%p436_p2), 1042432   ;;  %vm1119_vm3 = vcmask (!%p436_p2), 1043456   ;;  %vm983_vm4 = vsmask.f32 (!%p436_p2), 7424 }
   0x8   : > { %p526_p4 = scmp.gt.s32.totalorder (!%p436_p2), %s2482_s17, 0  ;;  %p540_p5 = scmp.lt.s32.totalorder (!%p436_p2), %s2571_s18, 27  ;;  %vm1447_vm5 = vsmask.f32 (!%p436_p2), 4352  ;;  %vm1291_vm6 = vcmask (!%p436_p2), 261120   ;;  %vm1310_vm7 = vcmask (!%p436_p2), 523264  }
   0x9   : > { %vm1329_vm8 = vcmask (!%p436_p2), 785408   ;;  %vm2076_vm9 = vcmask (!%p436_p2), 257024   ;;  %p592_p8 = scmp.lt.s32.totalorder (!%p436_p2), %s2828_s14, 6  ;;  %vm2311_vm10 = vcmask (!%p436_p2), 1040384   ;;  %vm2313_vm11 = vcmask (!%p436_p2), 254976  }
   0xd   : > { %s3828_s15 = smov (!%p519_p3, %s2479_s15), 111  ;;  %s3830_s17 = smov (!%p526_p4, %s2482_s17), 0 }
   0xe   : > { %s2489_s19 = sshll.u32 %s3828_s15, 3  ;;  %s2483_s23 = sshll.u32 %s3830_s17, 2 }
   0xf   : > { %s2840_s22 = scalar_lea.vmem %s3785_s3, %s2489_s19  ;;  %p529_p6 = scmp.lt.s32.totalorder %s2483_s23, 111 }
  0x10   : > { %v700_v1 = vld [vmem:[%s2840_s22 + $0x18] sm:$0xff]  ;;  %v699_v2 = vld [vmem:[%s2840_s22 + $0x10] sm:$0xff]  ;;  %s2480_s24 = sshll.u32 %s3828_s15, 2  ;;  %s3832_s18 = smov (!%p540_p5, %s2571_s18), 27  ;;  %v702_v3 = vld [vmem:[%s2840_s22 + $0x28] sm:$0xff] }
  0x11   : > { %864 = vperm.xlu1 %2713, %v700_v1   ;;  %859 = vperm.xlu0 %2712, %v699_v2   ;;  %v701_v4 = vld [vmem:[%s2840_s22 + $0x20] sm:$0xff]  ;;  %s3834_s23 = smov (!%p529_p6, %s2483_s23), 111  ;;  %s2486_s25 = sshll.u32 %s3832_s18, 2  ;;  %v698_v17 = vld [vmem:[%s2840_s22 + $0x8] sm:$0xff]  ;;  %v704_v26 = vld [vmem:[%s2840_s22 + $0x38] sm:$0xff] }
  0x12   : > { %s2852_s28 = scalar_lea.vmem %s3782_s0, %s2480_s24  ;;  %s2484_s29 = sshll.u32 %s3834_s23, 2  ;;  %v697_v18 = vld [vmem:[%s2840_s22] sm:$0xff]  ;;  %v703_v28 = vld [vmem:[%s2840_s22 + $0x30] sm:$0xff]  ;;  %v706_v29 = vld [vmem:[%s2840_s22 + $0x48] sm:$0xff] }
  0x13   : > { %s2493_s30 = sshll.u32 %s3834_s23, 3  ;;  %s532_s20 = scalar_lea.vmem %s3783_s1, %s2484_s29  ;;  %v2900_v30 = vld [vmem:[%s2840_s22 + $0x40] sm:$0xff]  ;;  %v708_v31 = vld [vmem:[%s2840_s22 + $0x58] sm:$0xff]  ;;  %v2905_v32 = vld [vmem:[%s2840_s22 + $0x50] sm:$0xff] }
  0x14   : > { %s566_s16 = scalar_lea.vmem %s3786_s4, %s2493_s30  ;;  %p543_p7 = scmp.lt.s32.totalorder %s2486_s25, 111  ;;  %v2716_v8 = vld [vmem:[%s532_s20 + $0x8] sm:$0xff]   ;;  %v2717_v10 = vld [vmem:[%s532_s20] sm:$0xff]   ;;  %v712_v34 = vld [vmem:[%s2840_s22 + $0x78] sm:$0xff] }
  0x15   : > { %874 = vperm.xlu1 %2713, %v702_v3   ;;  %869 = vperm.xlu0 %2712, %v701_v4   ;;  %v695_v5 = vld [vmem:[%s566_s16 + $0x10] sm:$0xff]  ;;  %v693_v6 = vld [vmem:[%s566_s16] sm:$0xff]  ;;  %v696_v7 = vld [vmem:[%s566_s16 + $0x18] sm:$0xff]  ;;  %v719_v11 = vunpack.c.l.bf16 %v2716_v8  ;;  %v720_v12 = vunpack.c.h.bf16 %v2716_v8  ;;  %v717_v15 = vunpack.c.l.bf16 %v2717_v10  ;;  %v718_v16 = vunpack.c.h.bf16 %v2717_v10  ;;  %s2766_s20 = smov 96   ;;  %s3684_s17 = scalar_lea.vmem %s3791_s9, %s2480_s24 }
  0x16   : > { %v694_v9 = vld [vmem:[%s566_s16 + $0x8] sm:$0xff]  ;;  %s3836_s25 = smov (!%p543_p7, %s2486_s25), 111  ;;  %v2910_v35 = vld [vmem:[%s2840_s22 + $0x70] sm:$0xff]  ;;  %v2931_v48 = vld [vmem:[%s2840_s22 + $0x60] sm:$0xff]  ;;  %s3838_s14 = smov (!%p592_p8, %s2828_s14), 6 }
  0x17   : > { %s2487_s27 = sshll.u32 %s3836_s25, 2  ;;  %v750_v19 = vmul.f32 %v2865_v13, %v719_v11  ;;  %v748_v20 = vmul.f32 %v2865_v13, %v717_v15  ;;  %v751_v21 = vmul.f32 %v2865_v13, %v720_v12  ;;  %v749_v23 = vmul.f32 %v2865_v13, %v718_v16  ;;  %s2496_s12 = sshll.u32 %s3836_s25, 3  ;;  %v2928_v47 = vld [vmem:[%s2840_s22 + $0x68] sm:$0xff]  ;;  %v2715_v58 = vld [vmem:[%s2852_s28 + $0x10] sm:$0xff]   ;;  %v2718_v16 = vld [vmem:[%s2852_s28] sm:$0xff]  }
  0x18   : > { %s2885_s11 = scalar_lea.vmem %s3784_s2, %s2487_s27  ;;  %s580_s19 = scalar_lea.vmem %s3787_s5, %s2496_s12  ;;  %v2714_v55 = vld [vmem:[%s2852_s28 + $0x8] sm:$0xff]   ;;  %v726_v61 = vunpack.c.h.bf16 %v2715_v58  ;;  %v725_v62 = vunpack.c.l.bf16 %v2715_v58 }
  0x19   : > { %839 = vperm.xlu1 %2713, %v695_v5   ;;  %829 = vperm.xlu0 %2712, %v693_v6   ;;  %v2879_v22 = vadd.f32 %v2870_v14, %v750_v19  ;;  %v2888_v24 = vadd.f32 %v2870_v14, %v748_v20  ;;  %v2891_v25 = vadd.f32 %v2870_v14, %v751_v21  ;;  %v2723_v33 = vld [vmem:[%s2885_s11] sm:$0xff]   ;;  %v714_v42 = vld [vmem:[%s580_s19 + $0x8] sm:$0xff]  ;;  %v716_v53 = vld [vmem:[%s580_s19 + $0x18] sm:$0xff]  ;;  %v724_v56 = vunpack.c.h.bf16 %v2714_v55  ;;  %s2764_s25 = smov 64   ;;  %s2499_s15 = sshll.u32 %s3838_s14, 1 }
  0x1a   : > { %v2895_v27 = vadd.f32 %v2870_v14, %v749_v23  ;;  %v738_v36 = vunpack.c.h.bf16 %v2723_v33  ;;  %v737_v37 = vunpack.c.l.bf16 %v2723_v33  ;;  %v713_v43 = vld [vmem:[%s580_s19] sm:$0xff]  ;;  %v2725_v44 = vld [vmem:[%s2885_s11 + $0x8] sm:$0xff]   ;;  %v715_v54 = vld [vmem:[%s580_s19 + $0x10] sm:$0xff]  ;;  %v723_v57 = vunpack.c.l.bf16 %v2714_v55  ;;  %s595_s18 = scalar_lea.vmem %s3792_s10, %s2499_s15 }
  0x1b   : > { %v740_v45 = vunpack.c.h.bf16 %v2725_v44  ;;  %v739_v46 = vunpack.c.l.bf16 %v2725_v44  ;;  %v755_v59 = vmul.f32 %v2865_v13, %v724_v56  ;;  %v757_v1 = vmul.f32 %v2865_v13, %v726_v61  ;;  %v2720_v19 = vld [vmem:[%s2852_s28 + $0x20] sm:$0xff]  }
  0x1c   : > { %v769_v38 = vmul.f32 %v2865_v13, %v738_v36  ;;  %v768_v39 = vmul.f32 %v2865_v13, %v737_v37  ;;  %v754_v60 = vmul.f32 %v2865_v13, %v723_v57  ;;  %v756_v2 = vmul.f32 %v2865_v13, %v725_v62 }
  0x1d   : > { %844 = vperm.xlu1 %2713, %v696_v7   ;;  %834 = vperm.xlu0 %2712, %v694_v9   ;;  %v771_v49 = vmul.f32 %v2865_v13, %v740_v45  ;;  %v770_v50 = vmul.f32 %v2865_v13, %v739_v46  ;;  %v786_v63 = vadd.f32 %v2870_v14, %v755_v59  ;;  %v805_v23 = vmax.f32 %v2879_v22, 0.0 }
  0x1e   : > { %v2921_v40 = vadd.f32 %v2870_v14, %v769_v38  ;;  %v2924_v41 = vadd.f32 %v2870_v14, %v768_v39  ;;  %v785_v0 = vadd.f32 %v2870_v14, %v754_v60  ;;  %v788_v5 = vadd.f32 %v2870_v14, %v757_v1  ;;  %v2722_v60 = vld [vmem:[%s2852_s28 + $0x38] sm:$0xff]  }
  0x1f   : > { %v2938_v51 = vadd.f32 %v2870_v14, %v771_v49  ;;  %v2941_v52 = vadd.f32 %v2870_v14, %v770_v50  ;;  %v810_v3 = vmax.f32 %v786_v63, 0.0  ;;  %v787_v6 = vadd.f32 %v2870_v14, %v756_v2  ;;  %v2719_v49 = vld [vmem:[%s2852_s28 + $0x18] sm:$0xff]  }
  0x20   : > { %v809_v4 = vmax.f32 %v785_v0, 0.0  ;;  %v812_v11 = vmax.f32 %v788_v5, 0.0  ;;  %v806_v33 = vmax.f32 %v2891_v25, 0.0  ;;  %v730_v38 = vunpack.c.h.bf16 %v2720_v19 }
  0x21   : > { %854 = vperm.xlu1 %2713, %v698_v17   ;;  %849 = vperm.xlu0 %2712, %v697_v18   ;;  %v811_v12 = vmax.f32 %v787_v6, 0.0  ;;  %v729_v39 = vunpack.c.l.bf16 %v2720_v19  ;;  %v804_v25 = vmax.f32 %v2895_v27, 0.0  ;;  %v721_v46 = vunpack.c.l.bf16 %v2718_v16 }
  0x22   : > { %v761_v58 = vmul.f32 %v2865_v13, %v730_v38  ;;  %v728_v2 = vunpack.c.h.bf16 %v2719_v49  ;;  %v735_v19 = vunpack.c.l.bf16 %v2722_v60 }
  0x23   : > { %v760_v59 = vmul.f32 %v2865_v13, %v729_v39  ;;  %v752_v1 = vmul.f32 %v2865_v13, %v721_v46 }
  0x25   : > { %884 = vperm.xlu1 %2713, %v704_v26   ;;  %879 = vperm.xlu0 %2712, %v703_v28   ;;  %v803_v26 = vmax.f32 %v2888_v24, 0.0 }
  0x29   : > { %894 = vperm.xlu1 %2713, %v706_v29   ;;  %889 = vperm.xlu0 %2712, %v2900_v30  }
  0x2d   : > { %904 = vperm.xlu1 %2713, %v708_v31   ;;  %899 = vperm.xlu0 %2712, %v2905_v32  }
  0x31   : > { %924 = vperm.xlu1 %2713, %v712_v34   ;;  %919 = vperm.xlu0 %2712, %v2910_v35   ;;  %v722_v34 = vunpack.c.h.bf16 %v2718_v16  ;;  %v792_v16 = vadd.f32 %v2870_v14, %v761_v58 }
  0x33   : > { %v816_v39 = vmax.f32 %v792_v16, 0.0 }
  0x35   : > { %934 = vperm.xlu1 %2713, %v714_v42   ;;  %929 = vperm.xlu0 %2712, %v713_v43   ;;  %v2721_v42 = vld [vmem:[%s2852_s28 + $0x28] sm:$0xff]  }
  0x36   : > { %v732_v27 = vunpack.c.h.bf16 %v2721_v42  ;;  %v731_v0 = vunpack.c.l.bf16 %v2721_v42 }
  0x39   : > { %914 = vperm.xlu1 %2713, %v2928_v47   ;;  %909 = vperm.xlu0 %2712, %v2931_v48  }
  0x3d   : > { %944 = vperm.xlu1 %2713, %v716_v53   ;;  %939 = vperm.xlu0 %2712, %v715_v54   ;;  %v753_v53 = vmul.f32 %v2865_v13, %v722_v34 }
  0x90   : > { %v865_v7 = vpop.permute.xlu1 %864  ;;  %v860_v8 = vpop.permute.xlu0 %859 }
  0x91   : > { %v954_v9 = vmul.f32 %v865_v7, %v810_v3  ;;  %v953_v10 = vmul.f32 %v860_v8, %v809_v4  ;;  %v727_v3 = vunpack.c.l.bf16 %v2719_v49 }
  0x93   : > { %v2953_v15 = vpack.c.bf16 %v954_v9, %v953_v10  ;;  %v763_v9 = vmul.f32 %v2865_v13, %v732_v27  ;;  %v736_v10 = vunpack.c.h.bf16 %v2722_v60 }
  0x94   : > { %v875_v17 = vpop.permute.xlu1 %874  ;;  %v870_v18 = vpop.permute.xlu0 %869 }
  0x95   : > { %v956_v20 = vmul.f32 %v875_v17, %v812_v11  ;;  %v955_v21 = vmul.f32 %v870_v18, %v811_v12  ;;  %1230 = vrot.lane.b32.xlu0 %v2953_v15, %s2764_s25  ;;  %v3803_v28 = vshll.u32 %v2953_v15, 16  ;;  %v3799_v29 = vshrl.u32 %v2953_v15, 16  ;;  %v2724_v11 = vld [vmem:[%s2852_s28 + $0x30] sm:$0xff]   ;;  %s2765_s28 = smov 32  }
  0x96   : > { %v791_v17 = vadd.f32 %v2870_v14, %v760_v59  ;;  %v762_v18 = vmul.f32 %v2865_v13, %v731_v0  ;;  %v734_v38 = vunpack.c.h.bf16 %v2724_v11  ;;  %v733_v49 = vunpack.c.l.bf16 %v2724_v11 }
  0x97   : > { %v2963_v31 = vpack.c.bf16 %v956_v20, %v955_v21  ;;  %v1159_v22 = vrot.slane %v3799_v29, 4  ;;  %v1160_v24 = vrot.slane %v3803_v28, 5  ;;  %v784_v20 = vadd.f32 %v2870_v14, %v753_v53 }
  0x98   : > { %v840_v36 = vpop.permute.xlu1 %839  ;;  %v830_v37 = vpop.permute.xlu0 %829  ;;  %v783_v21 = vadd.f32 %v2870_v14, %v752_v1  ;;  %v815_v42 = vmax.f32 %v791_v17, 0.0  ;;  %v765_v58 = vmul.f32 %v2865_v13, %v734_v38 }
  0x99   : > { %v949_v43 = vmul.f32 %v840_v36, %v805_v23  ;;  %v947_v44 = vmul.f32 %v830_v37, %v803_v26  ;;  %1232 = vrot.lane.b32.xlu1 %v2963_v31, %s2764_s25  ;;  %v3802_v45 = vshll.u32 %v2963_v31, 16  ;;  %v3797_v50 = vshrl.u32 %v2963_v31, 16 }
  0x9a   : > { %v2980_v55 = vor.u32 %v1160_v24, %v1159_v22  ;;  %v759_v23 = vmul.f32 %v2865_v13, %v728_v2  ;;  %v758_v26 = vmul.f32 %v2865_v13, %v727_v3  ;;  %v794_v36 = vadd.f32 %v2870_v14, %v763_v9 }
  0x9b   : > { %v1164_v54 = vrot.slane %v3802_v45, 5  ;;  %v1163_v61 = vrot.slane %v3797_v50, 4  ;;  %v767_v37 = vmul.f32 %v2865_v13, %v736_v10  ;;  %v793_v22 = vadd.f32 %v2870_v14, %v762_v18 }
  0x9c   : > { %v845_v56 = vpop.permute.xlu1 %844  ;;  %v835_v57 = vpop.permute.xlu0 %834  ;;  %v766_v24 = vmul.f32 %v2865_v13, %v735_v19  ;;  %v789_v46 = vadd.f32 %v2870_v14, %v758_v26  ;;  %v764_v2 = vmul.f32 %v2865_v13, %v733_v49  ;;  %v796_v11 = vadd.f32 %v2870_v14, %v765_v58 }
  0x9d   : > { %v950_v62 = vmul.f32 %v845_v56, %v806_v33  ;;  %v948_v63 = vmul.f32 %v835_v57, %v804_v25  ;;  %v2988_v4 = vor.u32 %v1164_v54, %v1163_v61  ;;  %v790_v25 = vadd.f32 %v2870_v14, %v759_v23 }
  0x9e   : > { %v818_v56 = vmax.f32 %v794_v36, 0.0  ;;  %v798_v57 = vadd.f32 %v2870_v14, %v767_v37  ;;  %v817_v60 = vmax.f32 %v793_v22, 0.0  ;;  %v797_v61 = vadd.f32 %v2870_v14, %v766_v24 }
  0x9f   : > { %v2990_v5 = vpack.c.bf16 %v950_v62, %v949_v43  ;;  %v2992_v6 = vpack.c.bf16 %v948_v63, %v947_v44  ;;  %v2999_v12 = vsel %vm1155_vm0, %v2980_v55, %v2988_v4  ;;  %v808_v43 = vmax.f32 %v784_v20, 0.0 }
  0xa0   : > { %v855_v7 = vpop.permute.xlu1 %854  ;;  %v850_v8 = vpop.permute.xlu0 %849  ;;  %v807_v44 = vmax.f32 %v783_v21, 0.0  ;;  %v814_v0 = vmax.f32 %v790_v25, 0.0  ;;  %v813_v1 = vmax.f32 %v789_v46, 0.0  ;;  %v822_v10 = vmax.f32 %v798_v57, 0.0 }
  0xa1   : > { %v952_v62 = vmul.f32 %v855_v7, %v808_v43  ;;  %v821_v19 = vmax.f32 %v797_v61, 0.0  ;;  %v824_v36 = vmax.f32 %v2921_v40, 0.0  ;;  %v823_v37 = vmax.f32 %v2924_v41, 0.0 }
  0xa2   : > { %v951_v63 = vmul.f32 %v850_v8, %v807_v44  ;;  %v795_v8 = vadd.f32 %v2870_v14, %v764_v2  ;;  %v820_v38 = vmax.f32 %v796_v11, 0.0  ;;  %v1195_v43 = vrot.slane %v2953_v15, 5 }
  0xa3   : > { %v3798_v57 = vrot.slane %v2953_v15, 4 }
  0xa4   : > { %v885_v33 = vpop.permute.xlu1 %884  ;;  %v880_v34 = vpop.permute.xlu0 %879  ;;  %v3021_v20 = vpack.c.bf16 %v952_v62, %v951_v63  ;;  %v819_v41 = vmax.f32 %v795_v8, 0.0 }
  0xa5   : > { %v958_v21 = vmul.f32 %v885_v33, %v814_v0  ;;  %v957_v23 = vmul.f32 %v880_v34, %v813_v1 }
  0xa6   : > { %v1194_v14 = vrot.slane %v3021_v20, 5  ;;  %v3795_v44 = vrot.slane %v3021_v20, 4  ;;  %v3808_v61 = vshll.u32 %v3021_v20, 16  ;;  %v3807_v63 = vshrl.u32 %v3021_v20, 16 }
  0xa7   : > { %v3031_v24 = vpack.c.bf16 %v958_v21, %v957_v23 }
  0xa8   : > { %v895_v53 = vpop.permute.xlu1 %894  ;;  %v890_v54 = vpop.permute.xlu0 %889 }
  0xa9   : > { %v960_v59 = vmul.f32 %v895_v53, %v816_v39  ;;  %v959_v27 = vmul.f32 %v890_v54, %v815_v42  ;;  %v3805_v39 = vrot.slane %v2963_v31, 5  ;;  %v826_v54 = vmax.f32 %v2938_v51, 0.0 }
  0xaa   : > { %v1196_v51 = vsel %vm1193_vm2, %v1194_v14, %v1195_v43  ;;  %v3801_v2 = vshrl.u32 %v3031_v24, 16 }
  0xab   : > { %v3019_v16 = vpack.c.bf16 %v960_v59, %v959_v27  ;;  %v3052_v58 = vsel %vm1193_vm2, %v1195_v43, %v3805_v39 }
  0xac   : > { %v905_v3 = vpop.permute.xlu1 %904  ;;  %v900_v9 = vpop.permute.xlu0 %899 }
  0xad   : > { %v962_v17 = vmul.f32 %v905_v3, %v818_v56  ;;  %v961_v18 = vmul.f32 %v900_v9, %v817_v60  ;;  %v3793_v34 = vrot.slane %v3019_v16, 5  ;;  %v825_v56 = vmax.f32 %v2941_v52, 0.0 }
  0xae   : > { %v1094_v60 = vrot.slane %v3019_v16, 1  ;;  %v3064_v52 = vsel %vm1119_vm3, %v3795_v44, %v3798_v57  ;;  %v3794_v3 = vrot.slane %v3031_v24, 1  ;;  %v1032_v45 = vshll.u32 %v3019_v16, 16 }
  0xaf   : > { %v3023_v7 = vpack.c.bf16 %v962_v17, %v961_v18 }
  0xb0   : > { %v925_v13 = vpop.permute.xlu1 %924  ;;  %v920_v26 = vpop.permute.xlu0 %919 }
  0xb1   : > { %v966_v42 = vmul.f32 %v925_v13, %v822_v10  ;;  %v965_v22 = vmul.f32 %v920_v26, %v821_v19  ;;  %v1203_v33 = vrot.slane %v3023_v7, 5  ;;  %v1096_v25 = vrot.slane %v3023_v7, 1 }
  0xb2   : > { %v1131_v11 = vrot.slane %v3023_v7, 4  ;;  %v3800_v17 = vshll.u32 %v3023_v7, 16  ;;  %v3796_v19 = vrot.slane %v3019_v16, 4 }
  0xb3   : > { %v3036_v40 = vpack.c.bf16 %v966_v42, %v965_v22  ;;  %v3044_v46 = vsel %vm1193_vm2, %v3793_v34, %v1203_v33  ;;  %v3073_v1 = vsel %vm1082_vm1, %v1094_v60, %v1096_v25  ;;  %v1024_v34 = vshll.u32 %v3031_v24, 16 }
  0xb4   : > { %v935_v49 = vpop.permute.xlu1 %934  ;;  %v930_v53 = vpop.permute.xlu0 %929  ;;  %v1537_v26 = vshrl.u32 %v3073_v1, 16  ;;  %v1540_v43 = vshll.u32 %v3073_v1, 16 }
  0xb5   : > { %v968_v59 = vmul.f32 %v935_v49, %v824_v36  ;;  %v967_v27 = vmul.f32 %v930_v53, %v823_v37  ;;  %1242 = vrot.lane.b32.xlu0 %v3036_v40, %s2764_s25  ;;  %v1187_v18 = vshll.u32 %v3036_v40, 16  ;;  %v1207_v8 = vrot.slane %v3036_v40, 5 }
  0xb6   : > { %v1184_v36 = vshrl.u32 %v3036_v40, 16  ;;  %v1542_v50 = vrot.slane %v1540_v43, 4 }
  0xb7   : > { %v3068_v0 = vpack.c.bf16 %v968_v59, %v967_v27  ;;  %v1248_v37 = vrot.slane %v1187_v18, 1 }
  0xb8   : > { %v915_v9 = vpop.permute.xlu1 %914  ;;  %v910_v10 = vpop.permute.xlu0 %909 }
  0xb9   : > { %v964_v21 = vmul.f32 %v915_v9, %v820_v38  ;;  %v963_v23 = vmul.f32 %v910_v10, %v819_v41  ;;  %1234 = vrot.lane.b32.xlu0 %v3031_v24, %s2764_s25  ;;  %v1209_v13 = vrot.slane %v3068_v0, 5  ;;  %v1252_v42 = vshll.u32 %v3068_v0, 16 }
  0xba   : > { %v3804_v38 = vrot.slane %v3036_v40, 1  ;;  %v1250_v59 = vor.u32 %v1248_v37, %v1184_v36  ;;  %v3102_v9 = vsel %vm1082_vm1, %v3794_v3, %v1094_v60  ;;  %v3109_v10 = vsel %vm1119_vm3, %v3796_v19, %v1131_v11 }
  0xbb   : > { %v3090_v22 = vpack.c.bf16 %v964_v21, %v963_v23  ;;  %v3097_v41 = vsel %vm1193_vm2, %v1207_v8, %v1209_v13  ;;  %v1254_v27 = vrot.slane %v1252_v42, 1  ;;  %v3806_v3 = vshrl.u32 %v3023_v7, 16 }
  0xbc   : > { %v945_v49 = vpop.permute.xlu1 %944  ;;  %v940_v53 = vpop.permute.xlu0 %939 }
  0xbd   : > { %v970_v21 = vmul.f32 %v945_v49, %v826_v54  ;;  %v969_v23 = vmul.f32 %v940_v53, %v825_v56  ;;  %1211 = vrot.lane.b32.xlu0 %v1194_v14, %s2765_s28  ;;  %v1098_v13 = vrot.slane %v3090_v22, 1  ;;  %v1205_v42 = vrot.slane %v3090_v22, 5 }
  0xbe   : > { %v1048_v60 = vshll.u32 %v3090_v22, 16  ;;  %v3118_v44 = vsel %vm983_vm4, %v1250_v59, %v1254_v27  ;;  %v1052_v56 = vshrl.u32 %v3090_v22, 16  ;;  %v1036_v53 = vshrl.u32 %v3019_v16, 16 }
  0xbf   : > { %v3120_v19 = vpack.c.bf16 %v970_v21, %v969_v23  ;;  %v3125_v54 = vsel %vm1082_vm1, %v1098_v13, %v3804_v38  ;;  %1116 = vrot.lane.b32.xlu1 %v1098_v13, %s2764_s25  ;;  %v1206_v14 = vsel %vm1193_vm2, %v1203_v33, %v1205_v42  ;;  %v3135_v49 = vsel %vm1082_vm1, %v1096_v25, %v1098_v13 }
  0xc0   : > { %v1176_v59 = vrot.slane %v3800_v17, 5  ;;  %v1167_v21 = vrot.slane %v3801_v2, 4  ;;  %v1539_v23 = vrot.slane %v1537_v26, 3  ;;  %v1562_v33 = vshrl.u32 %v3135_v49, 16 }
  0xc1   : > { %1223 = vrot.lane.b32.xlu0 %v1206_v14, %s2765_s28  ;;  %v1565_v57 = vshll.u32 %v3135_v49, 16  ;;  %v3145_v29 = vrot.slane %v1048_v60, 1  ;;  %v1175_v25 = vrot.slane %v3806_v3, 4  ;;  %v1260_v13 = vshll.u32 %v3120_v19, 16 }
  0xc2   : > { %v1256_v17 = vshrl.u32 %v3068_v0, 16  ;;  %v1564_v2 = vrot.slane %v1562_v33, 3  ;;  %v1179_v26 = vrot.slane %v1052_v56, 4  ;;  %v1180_v43 = vrot.slane %v1048_v60, 5 }
  0xc3   : > { %1213 = vrot.lane.b32.xlu1 %v1196_v51, %s2765_s28  ;;  %v1567_v14 = vrot.slane %v1565_v57, 4  ;;  %v3154_v28 = vor.u32 %v1052_v56, %v3145_v29  ;;  %v3156_v38 = vrot.slane %v1260_v13, 1  ;;  %v1287_v3 = vrot.slane %v3068_v0, 1 }
  0xc4   : > { %v1258_v39 = vor.u32 %v1256_v17, %v1254_v27  ;;  %v3159_v62 = vor.u32 %v1542_v50, %v1539_v23  ;;  %v1171_v57 = vrot.slane %v1036_v53, 4  ;;  %v1156_v51 = vrot.slane %v3807_v63, 4 }
  0xc5   : > { %1112 = vrot.lane.b32.xlu0 %v3073_v1, %s2764_s25  ;;  %v1133_v60 = vrot.slane %v3090_v22, 4  ;;  %v1186_v56 = vrot.slane %v1184_v36, 4  ;;  %v3174_v50 = vsel %vm983_vm4, %v3154_v28, %v1248_v37  ;;  %v1568_v1 = vor.u32 %v1567_v14, %v1564_v2 }
  0xc6   : > { %v3170_v33 = vsel %vm983_vm4, %v1258_v39, %v3156_v38  ;;  %v1157_v17 = vrot.slane %v3808_v61, 5  ;;  %v1177_v27 = vor.u32 %v1176_v59, %v1175_v25  ;;  %v1181_v23 = vor.u32 %v1180_v43, %v1179_v26 }
  0xc7   : > { %1139 = vrot.lane.b32.xlu1 %v3064_v52, %s2766_s20  ;;  %v1587_v36 = vshrl.u32 %v3125_v54, 16  ;;  %v1189_v39 = vrot.slane %v1187_v18, 5  ;;  %v1168_v13 = vrot.slane %v1024_v34, 5  ;;  %v1172_v37 = vrot.slane %v1032_v45, 5 }
  0xc8   : > { %v1289_v63 = vrot.slane %v3120_v19, 1  ;;  %v1590_v52 = vshll.u32 %v3125_v54, 16  ;;  %v3191_v2 = vor.u32 %v1157_v17, %v1156_v51  ;;  %v3194_v59 = vsel %vm1155_vm0, %v1177_v27, %v1181_v23 }
  0xc9   : > { %1215 = vrot.lane.b32.xlu0 %v3052_v58, %s2765_s28  ;;  %v1208_v18 = vsel %vm1193_vm2, %v1205_v42, %v1207_v8  ;;  %v3199_v25 = vor.u32 %v1189_v39, %v1186_v56  ;;  %v1169_v14 = vor.u32 %v1168_v13, %v1167_v21  ;;  %v1173_v26 = vor.u32 %v1172_v37, %v1171_v57 }
  0xca   : > { %v1134_v54 = vsel %vm1119_vm3, %v1131_v11, %v1133_v60  ;;  %v3809_v58 = vrot.slane %v3031_v24, 5  ;;  %v3810_v43 = vrot.slane %v2963_v31, 5  ;;  %v3213_v8 = vsel %vm1155_vm0, %v3191_v2, %v2980_v55 }
  0xcb   : > { %1225 = vrot.lane.b32.xlu1 %v1208_v18, %s2765_s28  ;;  %v3217_v42 = vsel %vm1447_vm5, %v3159_v62, %v1568_v1  ;;  %v3221_v21 = vsel %vm1155_vm0, %v1181_v23, %v3199_v25  ;;  %v3225_v11 = vsel %vm1155_vm0, %v2988_v4, %v1169_v14  ;;  %v3228_v57 = vsel %vm1155_vm0, %v1169_v14, %v1173_v26 }
  0xcc   : > { %v1200_v51 = vsel %vm1193_vm2, %v3810_v43, %v3809_v58  ;;  %v3231_v56 = vsel %vm1155_vm0, %v1173_v26, %v1177_v27  ;;  %v1589_v55 = vrot.slane %v1587_v36, 3  ;;  %v1592_v17 = vrot.slane %v1590_v52, 4 }
  0xcd   : > { %1149 = vrot.lane.b32.xlu0 %v1134_v54, %s2766_s20  ;;  %v3811_v39 = vrot.slane %v3036_v40, 1  ;;  %v1290_v23 = vsel %vm1082_vm1, %v1287_v3, %v1289_v63  ;;  %v1135_v27 = vrot.slane %v3036_v40, 4  ;;  %v1662_v26 = vshrl.u32 %v1289_v63, 16 }
  0xce   : > { %v1637_v4 = vshrl.u32 %v1290_v23, 16  ;;  %v1640_v58 = vshll.u32 %v1290_v23, 16  ;;  %v1593_v14 = vor.u32 %v1592_v17, %v1589_v55  ;;  %v1665_v54 = vshll.u32 %v1289_v63, 16 }
  0xcf   : > { %v1288_v13 = vsel %vm1082_vm1, %v3811_v39, %v1287_v3  ;;  %1114 = vrot.lane.b32.xlu1 %v3135_v49, %s2764_s25  ;;  %v3812_v3 = vshll.u32 %v2953_v15, 16  ;;  %v1664_v23 = vrot.slane %v1662_v26, 3  ;;  %v1136_v55 = vsel %vm1119_vm3, %v1133_v60, %v1135_v27 }
  0xd0   : > { %v1612_v37 = vshrl.u32 %v1288_v13, 16  ;;  %v1615_v18 = vshll.u32 %v1288_v13, 16  ;;  %v1639_v43 = vrot.slane %v1637_v4, 3  ;;  %v1642_v61 = vrot.slane %v1640_v58, 4 }
  0xd1   : > { %1217 = vrot.lane.b32.xlu0 %v1200_v51, %s2765_s28  ;;  %v3244_v39 = vrot.slane %v3812_v3, 1  ;;  %v3247_v13 = vsel %vm1447_vm5, %v1568_v1, %v1593_v14  ;;  %v1667_v49 = vrot.slane %v1665_v54, 4  ;;  %v1086_v63 = vrot.slane %v3021_v20, 1 }
  0xd2   : > { %v1614_v36 = vrot.slane %v1612_v37, 3  ;;  %v1617_v52 = vrot.slane %v1615_v18, 4  ;;  %v1643_v37 = vor.u32 %v1642_v61, %v1639_v43  ;;  %v1088_v18 = vrot.slane %v2953_v15, 1 }
  0xd3   : > { %1151 = vrot.lane.b32.xlu1 %v1136_v55, %s2766_s20  ;;  %v1668_v51 = vor.u32 %v1667_v49, %v1664_v23  ;;  %v3813_v4 = vshll.u32 %v2963_v31, 16  ;;  %v3814_v54 = vshrl.u32 %v2953_v15, 16  ;;  %v3815_v3 = vshll.u32 %v3023_v7, 16  ;;  %v2726_v49 = vld [vmem:[%s3790_s8 + $0x40] sm:$0xff]  }
  0xd4   : > { %v1618_v17 = vor.u32 %v1617_v52, %v1614_v36  ;;  %v1089_v61 = vsel %vm1082_vm1, %v1086_v63, %v1088_v18  ;;  %v1125_v36 = vrot.slane %v2963_v31, 4  ;;  %v1034_v52 = vrot.slane %v1032_v45, 1  ;;  %2684 = vmatprep.subr.bf16.mxu1 %v2726_v49  ;;  %2590 = vmatprep.subr.bf16.mxu0 %v2726_v49 }
  0xd5   : > { %v1018_v58 = vrot.slane %v3813_v4, 1  ;;  %1246 = vrot.lane.b32.xlu0 %v3120_v19, %s2764_s25  ;;  %v3266_v60 = vsel %vm1447_vm5, %v1643_v37, %v1668_v51  ;;  %v1042_v23 = vrot.slane %v3815_v3, 1  ;;  %v3816_v55 = vrot.slane %v2953_v15, 4  ;;  %v2727_v4 = vld [vmem:[%s3790_s8] sm:$0xff]  }
  0xd6   : > { %v3258_v1 = vsel %vm1447_vm5, %v1593_v14, %v1618_v17  ;;  %v3261_v26 = vsel %vm1447_vm5, %v1618_v17, %v1643_v37  ;;  %v1014_v14 = vor.u32 %v3814_v54, %v3244_v39  ;;  %v1038_v45 = vor.u32 %v1036_v53, %v1034_v52  ;;  %v2728_v53 = vld [vmem:[%s3790_s8 + $0x48] sm:$0xff]   ;;  %2692 = vmatpush3.bf16.msra.mxu1 %v2727_v4 }
  0xd7   : > { %1104 = vrot.lane.b32.xlu1 %v1089_v61, %s2764_s25  ;;  %v1126_v17 = vsel %vm1119_vm3, %v3816_v55, %v1125_v36  ;;  %v1026_v37 = vrot.slane %v1024_v34, 1  ;;  %v3817_v34 = vshrl.u32 %v3031_v24, 16  ;;  %2591 = vmatpush3.bf16.msra.mxu0 %v2727_v4  ;;  %v1083_v49 = vrot.slane %v2992_v6, 1 }
  0xd8   : > { %v1019_v43 = vsel %vm983_vm4, %v1014_v14, %v1018_v58  ;;  %v3298_v51 = vsel %vm983_vm4, %v1038_v45, %v1042_v23  ;;  %2685 = vmatprep.subr.bf16.mxu1 %v2728_v53  ;;  %2592 = vmatprep.subr.bf16.mxu0 %v2728_v53  ;;  %v2729_v14 = vld [vmem:[%s3790_s8 + $0x8] sm:$0xff]   ;;  %v1084_v55 = vrot.slane %v2990_v5, 1  ;;  %v3820_v4 = vshrl.u32 %v3023_v7, 16 }
  0xd9   : > { %1267 = vrot.lane.b32.xlu0 %v1019_v43, %s2766_s20  ;;  %v1030_v61 = vor.u32 %v3817_v34, %v1026_v37  ;;  %v987_v34 = vshll.u32 %v2992_v6, 16  ;;  %v1127_v40 = vrot.slane %v3031_v24, 4 }
  0xda   : > { %2693 = vmatpush3.bf16.msra.mxu1 %v2729_v14  ;;  %v1046_v53 = vor.u32 %v3820_v4, %v1042_v23  ;;  %v3822_v23 = vrot.slane %v3021_v20, 4  ;;  %v992_v4 = vshll.u32 %v2990_v5, 16 }
  0xdb   : > { %1141 = vrot.lane.b32.xlu1 %v1126_v17, %s2766_s20  ;;  %v3313_v54 = vsel %vm983_vm4, %v1030_v61, %v1034_v52  ;;  %v3818_v52 = vshrl.u32 %v2963_v31, 16  ;;  %v3819_v17 = vshll.u32 %v3021_v20, 16  ;;  %2593 = vmatpush3.bf16.msra.mxu0 %v2729_v14  ;;  %v2733_v61 = vld [vmem:[%s3790_s8 + $0x18] sm:$0xff]  }
  0xdc   : > { %v3355_v14 = vsel %vm983_vm4, %v1046_v53, %v3145_v29  ;;  %v2734_v29 = vld [vmem:[%s3790_s8 + $0x60] sm:$0xff]   ;;  %v2736_v53 = vld [vmem:[%s3790_s8 + $0x68] sm:$0xff]  }
  0xdd   : > { %1067 = vrot.lane.b32.xlu0 %v3298_v51, %s2765_s28  ;;  %v1022_v3 = vor.u32 %v3818_v52, %v1018_v58  ;;  %v3335_v45 = vrot.slane %v3819_v17, 1  ;;  %v2731_v58 = vld [vmem:[%s3790_s8 + $0x10] sm:$0xff]   ;;  %v3821_v52 = vshrl.u32 %v3021_v20, 16  ;;  %v989_v17 = vrot.slane %v987_v34, 1 }
  0xdf   : > { %1244 = vrot.lane.b32.xlu1 %v3068_v0, %s2764_s25  ;;  %v2730_v0 = vld [vmem:[%s3790_s8 + $0x50] sm:$0xff]  }
  0xe0   : > { %2686 = vmatprep.subr.bf16.mxu1 %v2730_v0  ;;  %2594 = vmatprep.subr.bf16.mxu0 %v2730_v0  ;;  %v1120_v0 = vrot.slane %v2990_v5, 4 }
  0xe1   : > { %1271 = vrot.lane.b32.xlu0 %v3313_v54, %s2766_s20  ;;  %2694 = vmatpush3.bf16.msra.mxu1 %v2731_v58 }
  0xe2   : > { %2595 = vmatpush3.bf16.msra.mxu0 %v2731_v58  ;;  %v2735_v58 = vld [vmem:[%s3790_s8 + $0x20] sm:$0xff]  }
  0xe3   : > { %1071 = vrot.lane.b32.xlu1 %v3154_v28, %s2765_s28  ;;  %v3331_v28 = vsel %vm983_vm4, %v1022_v3, %v1026_v37  ;;  %v1085_v37 = vsel %vm1082_vm1, %v1083_v49, %v1084_v55  ;;  %v1006_v3 = vor.u32 %v3821_v52, %v3335_v45  ;;  %v1122_v49 = vsel %vm1119_vm3, %v1120_v0, %v3822_v23  ;;  %v2738_v52 = vld [vmem:[%s3790_s8 + $0x70] sm:$0xff]   ;;  %v2740_v23 = vld [vmem:[%s3790_s8 + $0x78] sm:$0xff]  }
  0xe4   : > { %v994_v0 = vrot.slane %v992_v4, 1  ;;  %v2746_v4 = vld [vmem:[%s2840_s22 + $0x20] sm:$0xff] }
  0xe5   : > { %1061 = vrot.lane.b32.xlu0 %v1019_v43, %s2765_s28  ;;  %v2732_v43 = vld [vmem:[%s3790_s8 + $0x58] sm:$0xff]  }
  0xe6   : > { %2687 = vmatprep.subr.bf16.mxu1 %v2732_v43  ;;  %2596 = vmatprep.subr.bf16.mxu0 %v2732_v43  ;;  %v985_v43 = vshrl.u32 %v2992_v6, 16 }
  0xe7   : > { %1269 = vrot.lane.b32.xlu1 %v3331_v28, %s2766_s20  ;;  %2695 = vmatpush3.bf16.msra.mxu1 %v2733_v61 }
  0xe8   : > { %2597 = vmatpush3.bf16.msra.mxu0 %v2733_v61  ;;  %2688 = vmatprep.subr.bf16.mxu1 %v2734_v29  ;;  %v990_v34 = vor.u32 %v989_v17, %v985_v43  ;;  %v2737_v61 = vld [vmem:[%s3790_s8 + $0x28] sm:$0xff]   ;;  %v1090_v17 = vrot.slane %v2963_v31, 1 }
  0xe9   : > { %1100 = vrot.lane.b32.xlu0 %v1085_v37, %s2764_s25  ;;  %v1011_v37 = vsel %vm983_vm4, %v1006_v3, %v3244_v39  ;;  %2598 = vmatprep.subr.bf16.mxu0 %v2734_v29  ;;  %v1087_v39 = vsel %vm1082_vm1, %v1084_v55, %v1086_v63  ;;  %v1264_v63 = vshrl.u32 %v3120_v19, 16  ;;  %v2739_v55 = vld [vmem:[%s3790_s8 + $0x30] sm:$0xff]   ;;  %v2741_v19 = vld [vmem:[%s3790_s8 + $0x38] sm:$0xff]   ;;  %v3823_v29 = vrot.slane %v3019_v16, 5 }
  0xeb   : > { %1069 = vrot.lane.b32.xlu1 %v3355_v14, %s2765_s28  ;;  %2696 = vmatpush3.bf16.msra.mxu1 %v2735_v58  ;;  %v1266_v3 = vor.u32 %v1264_v63, %v3156_v38  ;;  %v2751_v63 = vld [vmem:[%s2840_s22 + $0x38] sm:$0xff] }
  0xec   : > { %2599 = vmatpush3.bf16.msra.mxu0 %v2735_v58  ;;  %2689 = vmatprep.subr.bf16.mxu1 %v2736_v53 }
  0xed   : > { %1137 = vrot.lane.b32.xlu0 %v1122_v49, %s2766_s20  ;;  %2600 = vmatprep.subr.bf16.mxu0 %v2736_v53  ;;  %v996_v49 = vshrl.u32 %v2990_v5, 16 }
  0xef   : > { %1059 = vrot.lane.b32.xlu1 %v1011_v37, %s2765_s28  ;;  %2697 = vmatpush3.bf16.msra.mxu1 %v2737_v61 }
  0xf0   : > { %2601 = vmatpush3.bf16.msra.mxu0 %v2737_v61  ;;  %2690 = vmatprep.subr.bf16.mxu1 %v2738_v52 }
  0xf1   : > { %1227 = vrot.lane.b32.xlu0 %v3097_v41, %s2765_s28  ;;  %v995_v41 = vsel %vm983_vm4, %v990_v34, %v994_v0  ;;  %2602 = vmatprep.subr.bf16.mxu0 %v2738_v52  ;;  %v2750_v52 = vld [vmem:[%s2840_s22 + $0x28] sm:$0xff] }
  0xf3   : > { %1102 = vrot.lane.b32.xlu1 %v1087_v39, %s2764_s25  ;;  %2698 = vmatpush3.bf16.msra.mxu1 %v2739_v55  ;;  %v2749_v39 = vld [vmem:[%s2840_s22 + $0x18] sm:$0xff] }
  0xf4   : > { %2603 = vmatpush3.bf16.msra.mxu0 %v2739_v55  ;;  %2691 = vmatprep.subr.bf16.mxu1 %v2740_v23 }
  0xf5   : > { %1055 = vrot.lane.b32.xlu0 %v995_v41, %s2765_s28  ;;  %2604 = vmatprep.subr.bf16.mxu0 %v2740_v23 }
  0xf7   : > { %1279 = vrot.lane.b32.xlu1 %v3118_v44, %s2766_s20  ;;  %v998_v44 = vor.u32 %v996_v49, %v994_v0  ;;  %2699 = vmatpush3.bf16.msra.mxu1 %v2741_v19  ;;  %v2752_v49 = vld [vmem:[%s2840_s22 + $0x48] sm:$0xff] }
  0xf8   : > { %2605 = vmatpush3.bf16.msra.mxu0 %v2741_v19  ;;  %v2753_v19 = vld [vmem:[%s2840_s22 + $0x58] sm:$0xff] }
  0xf9   : > { %1236 = vrot.lane.b32.xlu0 %v3019_v16, %s2764_s25  ;;  %v1003_v38 = vsel %vm983_vm4, %v998_v44, %v3335_v45  ;;  %v3432_v45 = vld [vmem:[%s3790_s8 + $0x80] sm:$0xff]  }
  0xfa   : > { %2664 = vmatprep.subr.bf16.mxu1 %v3432_v45 }
  0xfb   : > { %1283 = vrot.lane.b32.xlu1 %v1266_v3, %s2766_s20 }
  0xfd   : > { %1281 = vrot.lane.b32.xlu0 %v3170_v33, %s2766_s20  ;;  %v3824_v33 = vrot.slane %v3031_v24, 5 }
  0xff   : > { %1057 = vrot.lane.b32.xlu1 %v1003_v38, %s2765_s28  ;;  %v1202_v58 = vsel %vm1193_vm2, %v3824_v33, %v3823_v29 }
 0x101   : > { %1273 = vrot.lane.b32.xlu0 %v3298_v51, %s2766_s20  ;;  %v3437_v51 = vsel %vm1082_vm1, %v1088_v18, %v1090_v17  ;;  %v3825_v18 = vrot.slane %v3031_v24, 1 }
 0x103   : > { %1153 = vrot.lane.b32.xlu1 %v1135_v27, %s2766_s20  ;;  %v1128_v27 = vsel %vm1119_vm3, %v1125_v36, %v1127_v40  ;;  %v3458_v37 = vsel %vm1082_vm1, %v1090_v17, %v3825_v18  ;;  %v3826_v36 = vrot.slane %v3019_v16, 4 }
 0x105   : > { %1219 = vrot.lane.b32.xlu0 %v1202_v58, %s2765_s28  ;;  %v2754_v58 = vld [vmem:[%s2840_s22 + $0x78] sm:$0xff] }
 0x107   : > { %1106 = vrot.lane.b32.xlu1 %v3437_v51, %s2764_s25  ;;  %v1231_v43 = vpop.permute.xlu0 %1230 }
 0x109   : > { %1238 = vrot.lane.b32.xlu0 %v3023_v7, %s2764_s25 }
 0x10b   : > { %1143 = vrot.lane.b32.xlu1 %v1128_v27, %s2766_s20  ;;  %v1233_v0 = vpop.permute.xlu1 %1232 }
 0x10d   : > { %1275 = vrot.lane.b32.xlu0 %v3355_v14, %s2766_s20  ;;  %v2745_v14 = vld [vmem:[%s2840_s22 + $0x10] sm:$0xff] }
 0x10f   : > { %1063 = vrot.lane.b32.xlu1 %v3331_v28, %s2765_s28  ;;  %v1130_v28 = vsel %vm1119_vm3, %v1127_v40, %v3826_v36 }
 0x111   : > { %1221 = vrot.lane.b32.xlu0 %v3044_v46, %s2765_s28  ;;  %v2744_v46 = vld [vmem:[%s2840_s22] sm:$0xff] }
 0x113   : > { %1108 = vrot.lane.b32.xlu1 %v3458_v37, %s2764_s25 }
 0x115   : > { %1240 = vrot.lane.b32.xlu0 %v3090_v22, %s2764_s25 }
 0x117   : > { %1145 = vrot.lane.b32.xlu1 %v1130_v28, %s2766_s20 }
 0x119   : > { %1277 = vrot.lane.b32.xlu0 %v3174_v50, %s2766_s20  ;;  %v2747_v50 = vld [vmem:[%s2840_s22 + $0x8] sm:$0xff] }
 0x11b   : > { %1065 = vrot.lane.b32.xlu1 %v3313_v54, %s2765_s28  ;;  %v2748_v54 = vld [vmem:[%s2840_s22 + $0x30] sm:$0xff] }
 0x11d   : > { %2111 = vperm.xlu0 %2712, %v2744_v46  }
 0x11f   : > { %1110 = vrot.lane.b32.xlu1 %v3102_v9, %s2764_s25 }
 0x121   : > { %2121 = vperm.xlu0 %2712, %v2745_v14  }
 0x123   : > { %1147 = vrot.lane.b32.xlu1 %v3109_v10, %s2766_s20 }
 0x125   : > { %2131 = vperm.xlu0 %2712, %v2746_v4  }
 0x127   : > { %v1243_v53 = vpop.permute.xlu0 %1242  ;;  %2116 = vperm.xlu1 %2713, %v2747_v50  }
 0x129   : > { %2141 = vperm.xlu0 %2712, %v2748_v54  }
 0x12b   : > { %v1235_v34 = vpop.permute.xlu0 %1234  ;;  %2126 = vperm.xlu1 %2713, %v2749_v39  }
 0x12d   : > { %2151 = vperm.xlu0 %2712, %v2900_v30  }
 0x12f   : > { %v1212_v61 = vpop.permute.xlu0 %1211  ;;  %2136 = vperm.xlu1 %2713, %v2750_v52  }
 0x131   : > { %v3484_v41 = vpop.permute.xlu1 %1116  ;;  %2161 = vperm.xlu0 %2712, %v2905_v32  }
 0x133   : > { %v1224_v10 = vpop.permute.xlu0 %1223  ;;  %2146 = vperm.xlu1 %2713, %v2751_v63  }
 0x134   : > { %v1368_v55 = vsel %vm1291_vm6, %v3194_v59, %v1224_v10 }
 0x135   : > { %v1214_v3 = vpop.permute.xlu1 %1213  ;;  %2171 = vperm.xlu0 %2712, %v2931_v48   ;;  %v3492_v30 = vsel %vm1310_vm7, %v1368_v55, %v1243_v53 }
 0x136   : > { %v1353_v54 = vsel %vm1291_vm6, %v3213_v8, %v1214_v3 }
 0x137   : > { %v1113_v23 = vpop.permute.xlu0 %1112  ;;  %2156 = vperm.xlu1 %2713, %v2752_v49   ;;  %v1378_v63 = vsel %vm1310_vm7, %v1353_v54, %v1233_v0 }
 0x139   : > { %v3495_v32 = vpop.permute.xlu1 %1139  ;;  %2181 = vperm.xlu0 %2712, %v2910_v35  }
 0x13b   : > { %v1216_v44 = vpop.permute.xlu0 %1215  ;;  %2166 = vperm.xlu1 %2713, %v2753_v19  }
 0x13c   : > { %v1356_v59 = vsel %vm1291_vm6, %v2999_v12, %v1216_v44  ;;  %v1350_v12 = vsel %vm1291_vm6, %v3191_v2, %v1212_v61 }
 0x13d   : > { %v3501_v38 = vpop.permute.xlu1 %1225  ;;  %v1380_v48 = vsel %vm1310_vm7, %v1356_v59, %v1235_v34 }
 0x13f   : > { %v1150_v17 = vpop.permute.xlu0 %1149  ;;  %2176 = vperm.xlu1 %2713, %v2928_v47   ;;  %v1376_v47 = vsel %vm1310_vm7, %v1350_v12, %v1231_v43 }
 0x141   : > { %v1115_v29 = vpop.permute.xlu1 %1114 }
 0x143   : > { %v3505_v33 = vpop.permute.xlu0 %1217  ;;  %2186 = vperm.xlu1 %2713, %v2754_v58  }
 0x145   : > { %v1152_v40 = vpop.permute.xlu1 %1151 }
 0x147   : > { %v3508_v35 = vpop.permute.xlu0 %1246 }
 0x149   : > { %v1105_v27 = vpop.permute.xlu1 %1104 }
 0x14b   : > { %v1268_v18 = vpop.permute.xlu0 %1267 }
 0x14c   : > { %v1394_v14 = vsel %vm1329_vm8, %v1376_v47, %v1268_v18 }
 0x14d   : > { %v3510_v36 = vpop.permute.xlu1 %1141  ;;  %v1463_v34 = vshrl.u32 %v1394_v14, 16  ;;  %v1466_v39 = vshll.u32 %v1394_v14, 16 }
 0x14f   : > { %v1068_v28 = vpop.permute.xlu0 %1067  ;;  %v1465_v55 = vrot.slane %v1463_v34, 3  ;;  %v1468_v43 = vrot.slane %v1466_v39, 4 }
 0x150   : > { %v1305_v12 = vsel %vm1291_vm6, %v3019_v16, %v1068_v28 }
 0x151   : > { %v3514_v46 = vpop.permute.xlu1 %1244  ;;  %v1324_v54 = vsel %vm1310_vm7, %v1305_v12, %v1113_v23 }
 0x152   : > { %v1343_v28 = vsel %vm1329_vm8, %v1324_v54, %v1150_v17 }
 0x153   : > { %v1272_v4 = vpop.permute.xlu0 %1271  ;;  %v1595_v23 = vshrl.u32 %v1343_v28, 16 }
 0x154   : > { %v1398_v53 = vsel %vm1329_vm8, %v1380_v48, %v1272_v4  ;;  %v1469_v4 = vor.u32 %v1468_v43, %v1465_v55  ;;  %v1598_v55 = vshll.u32 %v1343_v28, 16 }
 0x155   : > { %v1072_v50 = vpop.permute.xlu1 %1071  ;;  %v1503_v52 = vshrl.u32 %v1398_v53, 16  ;;  %v1506_v10 = vshll.u32 %v1398_v53, 16 }
 0x156   : > { %v1600_v12 = vrot.slane %v1598_v55, 4 }
 0x157   : > { %v3521_v2 = vpop.permute.xlu0 %1061  ;;  %v1505_v44 = vrot.slane %v1503_v52, 3  ;;  %v1508_v19 = vrot.slane %v1506_v10, 4 }
 0x159   : > { %v1270_v61 = vpop.permute.xlu1 %1269  ;;  %v3527_v47 = vor.u32 %v1508_v19, %v1505_v44  ;;  %v1479_v19 = vshrl.u32 %v3437_v51, 16 }
 0x15a   : > { %v1396_v49 = vsel %vm1329_vm8, %v1378_v63, %v1270_v61 }
 0x15b   : > { %v1470_v59 = vshrl.u32 %v1396_v49, 16  ;;  %v1473_v48 = vshll.u32 %v1396_v49, 16  ;;  %v1101_v58 = vpop.permute.xlu0 %1100 }
 0x15d   : > { %v1472_v18 = vrot.slane %v1470_v59, 3  ;;  %v1475_v8 = vrot.slane %v1473_v48, 4  ;;  %v1070_v3 = vpop.permute.xlu1 %1069 }
 0x15e   : > { %v1307_v0 = vsel %vm1291_vm6, %v3023_v7, %v1070_v3  ;;  %v1597_v3 = vrot.slane %v1595_v23, 3 }
 0x15f   : > { %v1138_v14 = vpop.permute.xlu0 %1137  ;;  %v1476_v53 = vor.u32 %v1475_v8, %v1472_v18  ;;  %v1326_v10 = vsel %vm1310_vm7, %v1307_v0, %v1115_v29  ;;  %v1482_v29 = vshll.u32 %v3437_v51, 16  ;;  %v1309_v0 = vsel %vm1291_vm6, %v3090_v22, %v1072_v50 }
 0x160   : > { %v1345_v7 = vsel %vm1329_vm8, %v1326_v10, %v1152_v40  ;;  %v1487_v40 = vshrl.u32 %v3458_v37, 16 }
 0x161   : > { %v1060_v34 = vpop.permute.xlu1 %1059  ;;  %v1477_v39 = vsel %vm1447_vm5, %v1469_v4, %v1476_v53  ;;  %v3535_v52 = vsel %vm1447_vm5, %v1476_v53, %v3527_v47  ;;  %v1620_v49 = vshrl.u32 %v1345_v7, 16  ;;  %v1623_v59 = vshll.u32 %v1345_v7, 16 }
 0x162   : > { %1850 = vmatprep.mubr.bf16.mxu0 %v1477_v39  ;;  %v1297_v63 = vsel %vm1291_vm6, %v3021_v20, %v1060_v34 }
 0x163   : > { %v1228_v16 = vpop.permute.xlu0 %1227  ;;  %v1316_v17 = vsel %vm1310_vm7, %v1297_v63, %v1105_v27  ;;  %v1371_v27 = vsel %vm1291_vm6, %v3221_v21, %v3501_v38  ;;  %v1625_v53 = vrot.slane %v1623_v59, 4 }
 0x164   : > { %v1374_v20 = vsel %vm1291_vm6, %v3199_v25, %v1228_v16  ;;  %v1359_v25 = vsel %vm1291_vm6, %v3225_v11, %v3505_v33  ;;  %v1390_v21 = vsel %vm1310_vm7, %v1371_v27, %v3514_v46  ;;  %v1328_v11 = vsel %vm1310_vm7, %v1309_v0, %v3484_v41 }
 0x165   : > { %v1103_v61 = vpop.permute.xlu1 %1102  ;;  %v1392_v22 = vsel %vm1310_vm7, %v1374_v20, %v3508_v35 }
 0x167   : > { %v1056_v43 = vpop.permute.xlu0 %1055 }
 0x168   : > { %v1293_v44 = vsel %vm1291_vm6, %v2992_v6, %v1056_v43  ;;  %v1490_v6 = vshll.u32 %v3458_v37, 16 }
 0x169   : > { %v1280_v48 = vpop.permute.xlu1 %1279  ;;  %v1312_v18 = vsel %vm1310_vm7, %v1293_v44, %v1101_v58  ;;  %v1622_v58 = vrot.slane %v1620_v49, 3 }
 0x16a   : > { %v1406_v8 = vsel %vm1329_vm8, %v3492_v30, %v1280_v48  ;;  %v3564_v30 = vsel %vm1329_vm8, %v1316_v17, %v3510_v36  ;;  %v1331_v54 = vsel %vm1329_vm8, %v1312_v18, %v1138_v14  ;;  %v3575_v14 = vor.u32 %v1600_v12, %v1597_v3 }
 0x16b   : > { %v1237_v4 = vpop.permute.xlu0 %1236  ;;  %v1603_v34 = vshrl.u32 %v1406_v8, 16  ;;  %v1606_v38 = vshll.u32 %v1406_v8, 16  ;;  %v1495_v33 = vshrl.u32 %v3564_v30, 16  ;;  %v1498_v28 = vshll.u32 %v3564_v30, 16 }
 0x16c   : > { %v1448_v35 = vshrl.u32 %v1331_v54, 16  ;;  %v1451_v7 = vshll.u32 %v1331_v54, 16  ;;  %v3579_v49 = vor.u32 %v1625_v53, %v1622_v58  ;;  %v1382_v48 = vsel %vm1310_vm7, %v1359_v25, %v1237_v4 }
 0x16d   : > { %v1284_v50 = vpop.permute.xlu1 %1283  ;;  %v1605_v46 = vrot.slane %v1603_v34, 3  ;;  %v1608_v41 = vrot.slane %v1606_v38, 4  ;;  %v1497_v51 = vrot.slane %v1495_v33, 3 }
 0x16e   : > { %v1410_v39 = vsel %vm1329_vm8, %v1392_v22, %v1284_v50  ;;  %v1450_v12 = vrot.slane %v1448_v35, 3  ;;  %v1453_v0 = vrot.slane %v1451_v7, 4  ;;  %v1627_v7 = vsel %vm1447_vm5, %v3575_v14, %v3579_v49 }
 0x16f   : > { %v1653_v36 = vshrl.u32 %v1410_v39, 16  ;;  %v1656_v10 = vshll.u32 %v1410_v39, 16  ;;  %v1282_v16 = vpop.permute.xlu0 %1281  ;;  %v3589_v25 = vor.u32 %v1608_v41, %v1605_v46  ;;  %v1489_v41 = vrot.slane %v1487_v40, 3 }
 0x170   : > { %v1408_v63 = vsel %vm1329_vm8, %v1390_v21, %v1282_v16  ;;  %v1512_v40 = vshrl.u32 %v3102_v9, 16 }
 0x171   : > { %v1628_v23 = vshrl.u32 %v1408_v63, 16  ;;  %v1631_v55 = vshll.u32 %v1408_v63, 16  ;;  %v1058_v43 = vpop.permute.xlu1 %1057  ;;  %v1655_v44 = vrot.slane %v1653_v36, 3  ;;  %v1658_v59 = vrot.slane %v1656_v10, 4 }
 0x172   : > { %v1295_v17 = vsel %vm1291_vm6, %v2990_v5, %v1058_v43 }
 0x173   : > { %v1630_v20 = vrot.slane %v1628_v23, 3  ;;  %v1633_v18 = vrot.slane %v1631_v55, 4  ;;  %v1314_v8 = vsel %vm1310_vm7, %v1295_v17, %v1103_v61  ;;  %v1274_v3 = vpop.permute.xlu0 %1273  ;;  %v1659_v5 = vor.u32 %v1658_v59, %v1655_v44 }
 0x174   : > { %v1333_v27 = vsel %vm1329_vm8, %v1314_v8, %v3495_v32  ;;  %v1400_v58 = vsel %vm1329_vm8, %v1382_v48, %v1274_v3  ;;  %v1454_v55 = vor.u32 %v1453_v0, %v1450_v12  ;;  %v1492_v44 = vrot.slane %v1490_v6, 4 }
 0x175   : > { %v1455_v53 = vshrl.u32 %v1333_v27, 16  ;;  %v1458_v54 = vshll.u32 %v1333_v27, 16  ;;  %v1528_v34 = vshrl.u32 %v1400_v58, 16  ;;  %v1531_v22 = vshll.u32 %v1400_v58, 16  ;;  %v1154_v50 = vpop.permute.xlu1 %1153 }
 0x176   : > { %v1347_v4 = vsel %vm1329_vm8, %v1328_v11, %v1154_v50  ;;  %v1634_v21 = vor.u32 %v1633_v18, %v1630_v20  ;;  %v2743_v11 = vld [vmem:[%s3790_s8 + $0x88] sm:$0xff]   ;;  %v1481_v48 = vrot.slane %v1479_v19, 3  ;;  %v1484_v20 = vrot.slane %v1482_v29, 4 }
 0x177   : > { %v1457_v61 = vrot.slane %v1455_v53, 3  ;;  %v1460_v38 = vrot.slane %v1458_v54, 4  ;;  %v1530_v39 = vrot.slane %v1528_v34, 3  ;;  %v1533_v36 = vrot.slane %v1531_v22, 4  ;;  %v1220_v10 = vpop.permute.xlu0 %1219 }
 0x178   : > { %v1645_v16 = vshrl.u32 %v1347_v4, 16  ;;  %v1648_v32 = vshll.u32 %v1347_v4, 16  ;;  %v1635_v35 = vsel %vm1447_vm5, %v3589_v25, %v1634_v21  ;;  %v1660_v23 = vsel %vm1447_vm5, %v1634_v21, %v1659_v5 }
 0x179   : > { %v3599_v63 = vor.u32 %v1533_v36, %v1530_v39  ;;  %1898 = vmatprep.mubr.bf16.mxu1 %v1635_v35  ;;  %v1107_v46 = vpop.permute.xlu1 %1106  ;;  %v1461_v43 = vor.u32 %v1460_v38, %v1457_v61  ;;  %v1299_v6 = vsel %vm1291_vm6, %v2953_v15, %v3521_v2  ;;  %v1500_v19 = vrot.slane %v1498_v28, 4 }
 0x17a   : > { %v1647_v59 = vrot.slane %v1645_v16, 3  ;;  %v1650_v17 = vrot.slane %v1648_v32, 4  ;;  %1899 = vmatmul.mubr.bf16.vlgmr.msra.gmra.mrb[0].mxu1 %v1627_v7  ;;  %v1515_v29 = vshll.u32 %v3102_v9, 16  ;;  %v1493_v12 = vor.u32 %v1492_v44, %v1489_v41 }
 0x17b   : > { %1906 = vmatprep.mubr.bf16.mxu1 %v1660_v23  ;;  %v1239_v18 = vpop.permute.xlu0 %1238  ;;  %v1462_v8 = vsel %vm1447_vm5, %v1454_v55, %v1461_v43  ;;  %2665 = vmatpush3.bf16.msra.mxu1 %v3432_v45  ;;  %v1535_v37 = vsel %vm1447_vm5, %v3527_v47, %v3599_v63  ;;  %v1318_v45 = vsel %vm1310_vm7, %v1299_v6, %v1107_v46  ;;  %v1514_v9 = vrot.slane %v1512_v40, 3 }
 0x17c   : > { %1851 = vmatmul.mubr.bf16.vlgmr.msra.gmra.mrb[0].mxu0 %v1462_v8  ;;  %2666 = vmatprep.subr.bf16.mxu1 %v2743_v11  ;;  %v1651_v3 = vor.u32 %v1650_v17, %v1647_v59  ;;  %v1362_v0 = vsel %vm1291_vm6, %v3228_v57, %v1220_v10  ;;  %v1485_v27 = vor.u32 %v1484_v20, %v1481_v48  ;;  %v1517_v54 = vrot.slane %v1515_v29, 4 }
 0x17d   : > { %1858 = vmatprep.mubr.bf16.mxu0 %v3535_v52  ;;  %v1144_v47 = vpop.permute.xlu1 %1143  ;;  %v1384_v2 = vsel %vm1310_vm7, %v1362_v0, %v1239_v18  ;;  %v1501_v53 = vor.u32 %v1500_v19, %v1497_v51 }
 0x17e   : > { %v1337_v15 = vsel %vm1329_vm8, %v1318_v45, %v1144_v47  ;;  %v1652_v22 = vsel %vm1447_vm5, %v3579_v49, %v1651_v3  ;;  %v1494_v50 = vsel %vm1447_vm5, %v1485_v27, %v1493_v12  ;;  %v1518_v36 = vor.u32 %v1517_v54, %v1514_v9 }
 0x17f   : > { %v1520_v30 = vshrl.u32 %v1337_v15, 16  ;;  %v1523_v33 = vshll.u32 %v1337_v15, 16  ;;  %v1276_v28 = vpop.permute.xlu0 %1275  ;;  %2667 = vmatpush3.bf16.msra.mxu1 %v2743_v11  ;;  %v1502_v5 = vsel %vm1447_vm5, %v1461_v43, %v1501_v53 }
 0x180   : > { %v1402_v58 = vsel %vm1329_vm8, %v1384_v2, %v1276_v28  ;;  %v1519_v46 = vsel %vm1447_vm5, %v1493_v12, %v1518_v36  ;;  %v1544_v41 = vsel %vm1447_vm5, %v1518_v36, %v3159_v62 }
 0x181   : > { %v1553_v52 = vshrl.u32 %v1402_v58, 16  ;;  %v1556_v34 = vshll.u32 %v1402_v58, 16  ;;  %v1064_v57 = vpop.permute.xlu1 %1063  ;;  %v1522_v4 = vrot.slane %v1520_v30, 3  ;;  %v1525_v21 = vrot.slane %v1523_v33, 4 }
 0x182   : > { %1907 = vmatmul.mubr.bf16.gmra.mrb[4].mxu1 %v1652_v22  ;;  %v1301_v7 = vsel %vm1291_vm6, %v2963_v31, %v1064_v57 }
 0x183   : > { %v1555_v61 = vrot.slane %v1553_v52, 3  ;;  %v1558_v38 = vrot.slane %v1556_v34, 4  ;;  %2668 = vmatprep.mubr.msk.bf16.mxu1 %vm1291_vm6, %v1494_v50  ;;  %v1222_v39 = vpop.permute.xlu0 %1221  ;;  %v1526_v32 = vor.u32 %v1525_v21, %v1522_v4 }
 0x184   : > { %1859 = vmatmul.mubr.bf16.gmra.mrb[4].mxu0 %v1502_v5  ;;  %v1365_v55 = vsel %vm1291_vm6, %v3231_v56, %v1222_v39 }
 0x185   : > { %v1559_v10 = vor.u32 %v1558_v38, %v1555_v61  ;;  %1866 = vmatprep.mubr.bf16.mxu0 %v1535_v37  ;;  %v1109_v16 = vpop.permute.xlu1 %1108  ;;  %v1527_v17 = vsel %vm1447_vm5, %v1501_v53, %v1526_v32 }
 0x186   : > { %v1320_v11 = vsel %vm1310_vm7, %v1301_v7, %v1109_v16 }
 0x187   : > { %v1241_v49 = vpop.permute.xlu0 %1240  ;;  %v1560_v35 = vsel %vm1447_vm5, %v3599_v63, %v1559_v10 }
 0x188   : > { %v1386_v63 = vsel %vm1310_vm7, %v1365_v55, %v1241_v49 }
 0x189   : > { %v1146_v23 = vpop.permute.xlu1 %1145 }
 0x18a   : > { %2669 = vmatmul.mubr.msk.bf16.vlgmr.msra.gmra.mrb[8].mxu1 %vm1291_vm6, %v1519_v46  ;;  %v1339_v43 = vsel %vm1329_vm8, %v1320_v11, %v1146_v23 }
 0x18b   : > { %v1545_v44 = vshrl.u32 %v1339_v43, 16  ;;  %v1548_v59 = vshll.u32 %v1339_v43, 16  ;;  %2672 = vmatprep.mubr.msk.bf16.mxu1 %vm1291_vm6, %v1544_v41  ;;  %v1278_v31 = vpop.permute.xlu0 %1277 }
 0x18c   : > { %v1404_v48 = vsel %vm1329_vm8, %v1386_v63, %v1278_v31  ;;  %1867 = vmatmul.mubr.bf16.gmra.mrb[8].mxu0 %v1527_v17 }
 0x18d   : > { %v1547_v56 = vrot.slane %v1545_v44, 3  ;;  %v1550_v20 = vrot.slane %v1548_v59, 4  ;;  %v1578_v18 = vshrl.u32 %v1404_v48, 16  ;;  %v1581_v8 = vshll.u32 %v1404_v48, 16  ;;  %1874 = vmatprep.mubr.bf16.mxu0 %v1560_v35  ;;  %v1066_v37 = vpop.permute.xlu1 %1065 }
 0x18e   : > { %v1303_v47 = vsel %vm1291_vm6, %v3031_v24, %v1066_v37 }
 0x18f   : > { %v1551_v40 = vor.u32 %v1550_v20, %v1547_v56  ;;  %v1580_v62 = vrot.slane %v1578_v18, 3  ;;  %v1583_v6 = vrot.slane %v1581_v8, 4 }
 0x191   : > { %v1584_v51 = vor.u32 %v1583_v6, %v1580_v62  ;;  %v1111_v19 = vpop.permute.xlu1 %1110  ;;  %v1552_v29 = vsel %vm1447_vm5, %v1526_v32, %v1551_v40 }
 0x192   : > { %2673 = vmatmul.mubr.msk.bf16.gmra.mrb[12].mxu1 %vm1291_vm6, %v3217_v42  ;;  %v1322_v12 = vsel %vm1310_vm7, %v1303_v47, %v1111_v19 }
 0x193   : > { %2676 = vmatprep.mubr.msk.bf16.mxu1 %vm1291_vm6, %v3247_v13  ;;  %v1585_v3 = vsel %vm1447_vm5, %v1559_v10, %v1584_v51  ;;  %v1610_v45 = vsel %vm1447_vm5, %v1584_v51, %v3589_v25 }
 0x194   : > { %1875 = vmatmul.mubr.bf16.gmra.mrb[12].mxu0 %v1552_v29 }
 0x195   : > { %1882 = vmatprep.mubr.bf16.mxu0 %v1585_v3  ;;  %v1148_v0 = vpop.permute.xlu1 %1147 }
 0x196   : > { %v1341_v42 = vsel %vm1329_vm8, %v1322_v12, %v1148_v0 }
 0x197   : > { %v1570_v15 = vshrl.u32 %v1341_v42, 16  ;;  %v1573_v2 = vshll.u32 %v1341_v42, 16 }
 0x199   : > { %v1572_v13 = vrot.slane %v1570_v15, 3  ;;  %v1575_v30 = vrot.slane %v1573_v2, 4 }
 0x19a   : > { %2677 = vmatmul.mubr.msk.bf16.gmra.mrb[16].mxu1 %vm1291_vm6, %v3258_v1 }
 0x19b   : > { %v1576_v33 = vor.u32 %v1575_v30, %v1572_v13  ;;  %2680 = vmatprep.mubr.msk.bf16.mxu1 %vm1291_vm6, %v3261_v26 }
 0x19d   : > { %v1577_v24 = vsel %vm1447_vm5, %v1551_v40, %v1576_v33  ;;  %v1602_v25 = vsel %vm1447_vm5, %v1576_v33, %v3575_v14 }
 0x19e   : > { %1883 = vmatmul.mubr.bf16.gmra.mrb[16].mxu0 %v1577_v24 }
 0x19f   : > { %1890 = vmatprep.mubr.bf16.mxu0 %v1610_v45 }
 0x1a2   : > { %2681 = vmatmul.mubr.msk.bf16.gmra.mrb[20].mxu1 %vm1291_vm6, %v3266_v60  ;;  %v2112_v60 = vpop.permute.xlu0 %2111 }
 0x1a6   : > { %1891 = vmatmul.mubr.bf16.gmra.mrb[20].mxu0 %v1602_v25  ;;  %v2117_v49 = vpop.permute.xlu1 %2116  ;;  %v2122_v7 = vpop.permute.xlu0 %2121 }
 0x1aa   : > { %v2127_v40 = vpop.permute.xlu1 %2126  ;;  %v2132_v15 = vpop.permute.xlu0 %2131 }
 0x24d   : > { %v2642_v28 = vpop.f32.mrb[0].mxu1 }
 0x24e   : > { %v2643_v27 = vpop.f32.mrb[1].mxu1 }
 0x24f   : > { %v3671_v9 = vadd.f32 %v2643_v27, %v2642_v28  ;;  %v2645_v1 = vpop.f32.mrb[2].mxu1  ;;  %v2606_v58 = vpop.f32.mrb[0].mxu0 }
 0x250   : > { %v2646_v53 = vpop.f32.mrb[3].mxu1  ;;  %v2607_v54 = vpop.f32.mrb[1].mxu0 }
 0x251   : > { %v3673_v26 = vadd.f32 %v2646_v53, %v2645_v1  ;;  %v2608_v52 = vadd.f32 %v2607_v54, %v2606_v58  ;;  %v2609_v34 = vpop.f32.mrb[2].mxu0 }
 0x252   : > { %v2610_v22 = vpop.f32.mrb[3].mxu0 }
 0x253   : > { %v2611_v57 = vadd.f32 %v2610_v22, %v2609_v34 }
 0x255   : > { %v2648_v50 = vpop.f32.mrb[4].mxu1 }
 0x256   : > { %v2649_v5 = vpop.f32.mrb[5].mxu1 }
 0x257   : > { %v3675_v14 = vadd.f32 %v2649_v5, %v2648_v50  ;;  %v2651_v4 = vpop.f32.mrb[6].mxu1  ;;  %v2612_v21 = vpop.f32.mrb[4].mxu0 }
 0x258   : > { %v2652_v61 = vpop.f32.mrb[7].mxu1  ;;  %v2613_v38 = vpop.f32.mrb[5].mxu0 }
 0x259   : > { %v3677_v39 = vadd.f32 %v2652_v61, %v2651_v4  ;;  %v2614_v36 = vadd.f32 %v2613_v38, %v2612_v21  ;;  %v2615_v10 = vpop.f32.mrb[6].mxu0  ;;  %v2137_v50 = vpop.permute.xlu1 %2136 }
 0x25a   : > { %v2616_v16 = vpop.f32.mrb[7].mxu0 }
 0x25b   : > { %v2617_v32 = vadd.f32 %v2616_v16, %v2615_v10 }
 0x25d   : > { %v2670_v35 = vpop.f32.mrb[8].mxu1 }
 0x25e   : > { %v1958_v11 = vadd.f32 %v2670_v35, %v2614_v36  ;;  %v1949_v46 = vpop.f32.mrb[9].mxu1 }
 0x25f   : > { %v1950_v23 = vadd.f32 %v2608_v52, %v1949_v46  ;;  %v2671_v55 = vpop.f32.mrb[10].mxu1  ;;  %v2618_v43 = vpop.f32.mrb[8].mxu0 }
 0x260   : > { %v2576_v41 = vpack.c.bf16 %v1958_v11, %v1958_v11  ;;  %v2244_v63 = vmul.f32 %v1958_v11, %v1958_v11  ;;  %v1961_v44 = vadd.f32 %v2671_v55, %v2617_v32  ;;  %v1952_v59 = vpop.f32.mrb[11].mxu1  ;;  %v2619_v31 = vpop.f32.mrb[9].mxu0  ;;  %v2191_v62 = vmul.f32 %v2122_v7, %v1958_v11 }
 0x261   : > { %v2574_v17 = vpack.c.bf16 %v1950_v23, %v1950_v23  ;;  %v2242_v48 = vmul.f32 %v1950_v23, %v1950_v23  ;;  %v1953_v56 = vadd.f32 %v2611_v57, %v1952_v59  ;;  %v2621_v20 = vpop.f32.mrb[10].mxu0  ;;  %v2189_v18 = vmul.f32 %v2112_v60, %v1950_v23 }
 0x262   : > { %2079 = vst.msk [vmem:[%s3684_s17 + $0x8] sm:$0xf] %vm2076_vm9, %v2576_v41  ;;  %v2577_v8 = vpack.c.bf16 %v1961_v44, %v1961_v44  ;;  %v2622_v37 = vpop.f32.mrb[11].mxu0  ;;  %v2260_v6 = vmul.f32 %v2244_v63, %v2122_v7  ;;  %v2245_v51 = vmul.f32 %v1961_v44, %v1961_v44  ;;  %v2192_v3 = vmul.f32 %v2127_v40, %v1961_v44 }
 0x263   : > { %2077 = vst.msk [vmem:[%s3684_s17] sm:$0xf] %vm2076_vm9, %v2574_v17  ;;  %v2575_v19 = vpack.c.bf16 %v1953_v56, %v1953_v56  ;;  %v2258_v29 = vmul.f32 %v2242_v48, %v2112_v60  ;;  %v2190_v45 = vmul.f32 %v2117_v49, %v1953_v56  ;;  %v2243_v47 = vmul.f32 %v1953_v56, %v1953_v56  ;;  %v2142_v17 = vpop.permute.xlu0 %2141 }
 0x264   : > { %2080 = vst.msk [vmem:[%s3684_s17 + $0xc] sm:$0xf] %vm2076_vm9, %v2577_v8  ;;  %v2620_v12 = vadd.f32 %v2619_v31, %v2618_v43  ;;  %v2623_v0 = vadd.f32 %v2622_v37, %v2621_v20  ;;  %v2205_v2 = vsel %vm1291_vm6, %v2189_v18, 0.0  ;;  %v2261_v13 = vmul.f32 %v2245_v51, %v2127_v40  ;;  %v2147_v8 = vpop.permute.xlu1 %2146 }
 0x265   : > { %2078 = vst.msk [vmem:[%s3684_s17 + $0x4] sm:$0xf] %vm2076_vm9, %v2575_v19  ;;  %v2674_v42 = vpop.f32.mrb[12].mxu1  ;;  %v2206_v30 = vsel %vm1291_vm6, %v2190_v45, 0.0  ;;  %v2259_v33 = vmul.f32 %v2243_v47, %v2117_v49  ;;  %v2208_v25 = vsel %vm1291_vm6, %v2191_v62, 0.0  ;;  %v2277_v53 = vsel %vm1291_vm6, %v2260_v6, 0.0 }
 0x266   : > { %v1965_v24 = vpop.f32.mrb[13].mxu1  ;;  %v2207_v28 = vadd.f32 %v2206_v30, %v2205_v2  ;;  %v2274_v54 = vsel %vm1291_vm6, %v2258_v29, 0.0  ;;  %v2210_v52 = vsel %vm1291_vm6, %v2192_v3, 0.0  ;;  %v2279_v38 = vsel %vm1291_vm6, %v2261_v13, 0.0 }
 0x267   : > { %v1966_v27 = vadd.f32 %v2620_v12, %v1965_v24  ;;  %v2675_v1 = vpop.f32.mrb[14].mxu1  ;;  %v2624_v58 = vpop.f32.mrb[12].mxu0  ;;  %v2275_v34 = vsel %vm1291_vm6, %v2259_v33, 0.0 }
 0x268   : > { %v1968_v22 = vpop.f32.mrb[15].mxu1  ;;  %v2625_v57 = vpop.f32.mrb[13].mxu0  ;;  %v2209_v60 = vadd.f32 %v2208_v25, %v2207_v28  ;;  %v2276_v5 = vadd.f32 %v2275_v34, %v2274_v54 }
 0x269   : > { %v2578_v4 = vpack.c.bf16 %v1966_v27, %v1966_v27  ;;  %v2193_v21 = vmul.f32 %v2132_v15, %v1966_v27  ;;  %v2627_v61 = vpop.f32.mrb[14].mxu0  ;;  %v2246_v36 = vmul.f32 %v1966_v27, %v1966_v27  ;;  %v1969_v10 = vadd.f32 %v2623_v0, %v1968_v22 }
 0x26a   : > { %v2626_v16 = vadd.f32 %v2625_v57, %v2624_v58  ;;  %v2628_v32 = vpop.f32.mrb[15].mxu0  ;;  %v2278_v49 = vadd.f32 %v2277_v53, %v2276_v5  ;;  %v2211_v35 = vadd.f32 %v2210_v52, %v2209_v60  ;;  %v2152_v57 = vpop.permute.xlu0 %2151 }
 0x26b   : > { %2081 = vst.msk [vmem:[%s3684_s17 + $0x10] sm:$0xf] %vm2076_vm9, %v2578_v4  ;;  %v2212_v7 = vsel %vm1291_vm6, %v2193_v21, 0.0  ;;  %v2629_v11 = vadd.f32 %v2628_v32, %v2627_v61  ;;  %v2262_v46 = vmul.f32 %v2246_v36, %v2132_v15  ;;  %v2579_v23 = vpack.c.bf16 %v1969_v10, %v1969_v10  ;;  %v2157_v32 = vpop.permute.xlu1 %2156 }
 0x26c   : > { %v2194_v55 = vmul.f32 %v2137_v50, %v1969_v10  ;;  %v2247_v43 = vmul.f32 %v1969_v10, %v1969_v10  ;;  %v2213_v41 = vadd.f32 %v2212_v7, %v2211_v35  ;;  %v2280_v63 = vadd.f32 %v2279_v38, %v2278_v49 }
 0x26d   : > { %v1974_v44 = vadd.f32 %v2674_v42, %v2626_v16  ;;  %v1977_v59 = vadd.f32 %v2675_v1, %v2629_v11  ;;  %v3705_v31 = vpop.f32.mrb[16].mxu1  ;;  %v2281_v48 = vsel %vm1291_vm6, %v2262_v46, 0.0  ;;  %2082 = vst.msk [vmem:[%s3684_s17 + $0x14] sm:$0xf] %vm2076_vm9, %v2579_v23 }
 0x26e   : > { %v2214_v56 = vsel %vm1291_vm6, %v2194_v55, 0.0  ;;  %v2263_v20 = vmul.f32 %v2247_v43, %v2137_v50  ;;  %v1981_v18 = vpop.f32.mrb[17].mxu1  ;;  %v2282_v37 = vadd.f32 %v2281_v48, %v2280_v63 }
 0x26f   : > { %v2215_v40 = vadd.f32 %v2214_v56, %v2213_v41  ;;  %v2580_v62 = vpack.c.bf16 %v1974_v44, %v1974_v44  ;;  %v2195_v6 = vmul.f32 %v2142_v17, %v1974_v44  ;;  %v3711_v51 = vpop.f32.mrb[18].mxu1  ;;  %v2248_v29 = vmul.f32 %v1974_v44, %v1974_v44  ;;  %v2162_v56 = vpop.permute.xlu0 %2161 }
 0x270   : > { %v2283_v19 = vsel %vm1291_vm6, %v2263_v20, 0.0  ;;  %v2581_v3 = vpack.c.bf16 %v1977_v59, %v1977_v59  ;;  %v2196_v45 = vmul.f32 %v2147_v8, %v1977_v59  ;;  %v1984_v47 = vpop.f32.mrb[19].mxu1  ;;  %v2249_v42 = vmul.f32 %v1977_v59, %v1977_v59 }
 0x271   : > { %v2284_v12 = vadd.f32 %v2283_v19, %v2282_v37  ;;  %2083 = vst.msk [vmem:[%s3684_s17 + $0x18] sm:$0xf] %vm2076_vm9, %v2580_v62  ;;  %v2216_v0 = vsel %vm1291_vm6, %v2195_v6, 0.0  ;;  %v2630_v15 = vpop.f32.mrb[16].mxu0  ;;  %v2264_v13 = vmul.f32 %v2248_v29, %v2142_v17  ;;  %v2167_v37 = vpop.permute.xlu1 %2166 }
 0x272   : > { %v2217_v2 = vadd.f32 %v2216_v0, %v2215_v40  ;;  %2084 = vst.msk [vmem:[%s3684_s17 + $0x1c] sm:$0xf] %vm2076_vm9, %v2581_v3  ;;  %v2218_v30 = vsel %vm1291_vm6, %v2196_v45, 0.0  ;;  %v2631_v33 = vpop.f32.mrb[17].mxu0  ;;  %v2265_v24 = vmul.f32 %v2249_v42, %v2147_v8 }
 0x273   : > { %v2632_v25 = vadd.f32 %v2631_v33, %v2630_v15  ;;  %v2633_v28 = vpop.f32.mrb[18].mxu0  ;;  %v2285_v27 = vsel %vm1291_vm6, %v2264_v13, 0.0 }
 0x274   : > { %v2219_v1 = vadd.f32 %v2218_v30, %v2217_v2  ;;  %v2634_v58 = vpop.f32.mrb[19].mxu0  ;;  %v2286_v53 = vadd.f32 %v2285_v27, %v2284_v12  ;;  %v2287_v54 = vsel %vm1291_vm6, %v2265_v24, 0.0 }
 0x275   : > { %v1982_v52 = vadd.f32 %v2632_v25, %v1981_v18  ;;  %v2635_v34 = vadd.f32 %v2634_v58, %v2633_v28  ;;  %v2682_v22 = vpop.f32.mrb[20].mxu1  ;;  %v2177_v13 = vpop.permute.xlu1 %2176 }
 0x276   : > { %v3723_v50 = vadd.f32 %v2682_v22, %v3675_v14  ;;  %v1997_v60 = vpop.f32.mrb[21].mxu1  ;;  %v2288_v5 = vadd.f32 %v2287_v54, %v2286_v53 }
 0x277   : > { %v2582_v4 = vpack.c.bf16 %v1982_v52, %v1982_v52  ;;  %v2197_v21 = vmul.f32 %v2152_v57, %v1982_v52  ;;  %v2250_v61 = vmul.f32 %v1982_v52, %v1982_v52  ;;  %v2683_v38 = vpop.f32.mrb[22].mxu1  ;;  %v1985_v36 = vadd.f32 %v2635_v34, %v1984_v47  ;;  %v2172_v47 = vpop.permute.xlu0 %2171 }
 0x278   : > { %v2588_v10 = vpack.c.bf16 %v3723_v50, %v3723_v50  ;;  %v2000_v16 = vpop.f32.mrb[23].mxu1  ;;  %v1998_v35 = vadd.f32 %v3671_v9, %v1997_v60  ;;  %v3732_v7 = vadd.f32 %v2683_v38, %v3677_v39 }
 0x279   : > { %2085 = vst.msk [vmem:[%s3684_s17 + $0x20] sm:$0xf] %vm2076_vm9, %v2582_v4  ;;  %v2220_v49 = vsel %vm1291_vm6, %v2197_v21, 0.0  ;;  %v2266_v14 = vmul.f32 %v2250_v61, %v2152_v57  ;;  %v2636_v11 = vpop.f32.mrb[20].mxu0  ;;  %v2583_v23 = vpack.c.bf16 %v1985_v36, %v1985_v36  ;;  %v2198_v55 = vmul.f32 %v2157_v32, %v1985_v36  ;;  %v2187_v61 = vpop.permute.xlu1 %2186 }
 0x27a   : > { %v2221_v46 = vadd.f32 %v2220_v49, %v2219_v1  ;;  %v2251_v43 = vmul.f32 %v1985_v36, %v1985_v36  ;;  %2091 = vst.msk [vmem:[%s3684_s17 + $0x38] sm:$0xf] %vm2076_vm9, %v2588_v10  ;;  %v2637_v41 = vpop.f32.mrb[21].mxu0  ;;  %v2586_v44 = vpack.c.bf16 %v1998_v35, %v1998_v35  ;;  %v2589_v18 = vpack.c.bf16 %v3732_v7, %v3732_v7 }
 0x27b   : > { %v2289_v63 = vsel %vm1291_vm6, %v2266_v14, 0.0  ;;  %v2639_v59 = vpop.f32.mrb[22].mxu0  ;;  %2086 = vst.msk [vmem:[%s3684_s17 + $0x24] sm:$0xf] %vm2076_vm9, %v2583_v23  ;;  %v2222_v9 = vsel %vm1291_vm6, %v2198_v55, 0.0  ;;  %v2001_v62 = vadd.f32 %v3673_v26, %v2000_v16  ;;  %v2638_v6 = vadd.f32 %v2637_v41, %v2636_v11  ;;  %v2182_v52 = vpop.permute.xlu0 %2181 }
 0x27c   : > { %v2290_v17 = vadd.f32 %v2289_v63, %v2288_v5  ;;  %v2267_v39 = vmul.f32 %v2251_v43, %v2157_v32  ;;  %v2640_v48 = vpop.f32.mrb[23].mxu0  ;;  %v2223_v20 = vadd.f32 %v2222_v9, %v2221_v46  ;;  %2089 = vst.msk [vmem:[%s3684_s17 + $0x30] sm:$0xf] %vm2076_vm9, %v2586_v44  ;;  %2092 = vst.msk [vmem:[%s3684_s17 + $0x3c] sm:$0xf] %vm2076_vm9, %v2589_v18 }
 0x27d   : > { %v2641_v19 = vadd.f32 %v2640_v48, %v2639_v59  ;;  %v2587_v29 = vpack.c.bf16 %v2001_v62, %v2001_v62  ;;  %v1990_v3 = vadd.f32 %v3705_v31, %v2638_v6  ;;  %v2254_v12 = vmul.f32 %v1998_v35, %v1998_v35 }
 0x27e   : > { %v2291_v8 = vsel %vm1291_vm6, %v2267_v39, 0.0  ;;  %v2201_v33 = vmul.f32 %v2172_v47, %v1998_v35  ;;  %v2255_v24 = vmul.f32 %v2001_v62, %v2001_v62  ;;  %v2256_v1 = vmul.f32 %v3723_v50, %v3723_v50 }
 0x27f   : > { %v2292_v40 = vadd.f32 %v2291_v8, %v2290_v17  ;;  %v1993_v45 = vadd.f32 %v3711_v51, %v2641_v19  ;;  %2090 = vst.msk [vmem:[%s3684_s17 + $0x34] sm:$0xf] %vm2076_vm9, %v2587_v29  ;;  %v2584_v0 = vpack.c.bf16 %v1990_v3, %v1990_v3  ;;  %v2199_v42 = vmul.f32 %v2162_v56, %v1990_v3 }
 0x280   : > { %v2252_v15 = vmul.f32 %v1990_v3, %v1990_v3  ;;  %v2270_v58 = vmul.f32 %v2254_v12, %v2172_v47  ;;  %v2202_v53 = vmul.f32 %v2177_v13, %v2001_v62  ;;  %v2203_v60 = vmul.f32 %v2182_v52, %v3723_v50 }
 0x281   : > { %v2585_v2 = vpack.c.bf16 %v1993_v45, %v1993_v45  ;;  %v2200_v30 = vmul.f32 %v2167_v37, %v1993_v45  ;;  %v2253_v26 = vmul.f32 %v1993_v45, %v1993_v45  ;;  %2087 = vst.msk [vmem:[%s3684_s17 + $0x28] sm:$0xf] %vm2076_vm9, %v2584_v0  ;;  %v2224_v31 = vsel %vm1291_vm6, %v2199_v42, 0.0 }
 0x282   : > { %v2268_v25 = vmul.f32 %v2252_v15, %v2162_v56  ;;  %v2225_v51 = vadd.f32 %v2224_v31, %v2223_v20  ;;  %v2228_v5 = vsel %vm1291_vm6, %v2201_v33, 0.0  ;;  %v2257_v4 = vmul.f32 %v3732_v7, %v3732_v7 }
 0x283   : > { %2088 = vst.msk [vmem:[%s3684_s17 + $0x2c] sm:$0xf] %vm2076_vm9, %v2585_v2  ;;  %v2226_v28 = vsel %vm1291_vm6, %v2200_v30, 0.0  ;;  %v2269_v27 = vmul.f32 %v2253_v26, %v2167_v37  ;;  %v2271_v21 = vmul.f32 %v2255_v24, %v2177_v13  ;;  %v2272_v10 = vmul.f32 %v2256_v1, %v2182_v52 }
 0x284   : > { %v2293_v54 = vsel %vm1291_vm6, %v2268_v25, 0.0  ;;  %v2227_v22 = vadd.f32 %v2226_v28, %v2225_v51  ;;  %v2297_v16 = vsel %vm1291_vm6, %v2270_v58, 0.0  ;;  %v2204_v32 = vmul.f32 %v2187_v61, %v3732_v7 }
 0x285   : > { %v2294_v34 = vadd.f32 %v2293_v54, %v2292_v40  ;;  %v2295_v57 = vsel %vm1291_vm6, %v2269_v27, 0.0  ;;  %v2230_v49 = vsel %vm1291_vm6, %v2202_v53, 0.0  ;;  %v2232_v50 = vsel %vm1291_vm6, %v2203_v60, 0.0 }
 0x286   : > { %v2229_v38 = vadd.f32 %v2228_v5, %v2227_v22  ;;  %v2273_v11 = vmul.f32 %v2257_v4, %v2187_v61  ;;  %v2299_v46 = vsel %vm1291_vm6, %v2271_v21, 0.0  ;;  %v2301_v43 = vsel %vm1291_vm6, %v2272_v10, 0.0 }
 0x287   : > { %v2296_v36 = vadd.f32 %v2295_v57, %v2294_v34  ;;  %v2234_v41 = vsel %vm1291_vm6, %v2204_v32, 0.0 }
 0x288   : > { %v2231_v14 = vadd.f32 %v2230_v49, %v2229_v38  ;;  %v2303_v7 = vsel %vm1291_vm6, %v2273_v11, 0.0 }
 0x289   : > { %v2298_v35 = vadd.f32 %v2297_v16, %v2296_v36 }
 0x28a   : > { %v2233_v23 = vadd.f32 %v2232_v50, %v2231_v14 }
 0x28b   : > { %v2300_v55 = vadd.f32 %v2299_v46, %v2298_v35 }
 0x28c   : > { %v2235_v63 = vadd.f32 %v2234_v41, %v2233_v23 }
 0x28d   : > { %v2302_v44 = vadd.f32 %v2301_v43, %v2300_v55 }
 0x28e   : > { %v2236_v59 = vrot.slane %v2235_v63, 4 }
 0x28f   : > { %v2304_v17 = vadd.f32 %v2303_v7, %v2302_v44 }
 0x290   : > { %v2237_v9 = vadd.f32 %v2236_v59, %v2235_v63 }
 0x291   : > { %v2305_v39 = vrot.slane %v2304_v17, 4 }
 0x292   : > { %v2238_v48 = vrot.slane %v2237_v9, 2 }
 0x293   : > { %v2306_v56 = vadd.f32 %v2305_v39, %v2304_v17 }
 0x294   : > { %v2239_v20 = vadd.f32 %v2238_v48, %v2237_v9 }
 0x295   : > { %v2307_v18 = vrot.slane %v2306_v56, 2 }
 0x296   : > { %v2240_v8 = vrot.slane %v2239_v20, 1 }
 0x297   : > { %v2308_v37 = vadd.f32 %v2307_v18, %v2306_v56 }
 0x298   : > { %v2241_v62 = vadd.f32 %v2240_v8, %v2239_v20 }
 0x299   : > { %v2309_v40 = vrot.slane %v2308_v37, 1 }
 0x29b   : > { %v2310_v6 = vadd.f32 %v2309_v40, %v2308_v37 }
 0x29d   : > { %v2312_v19 = vsel %vm2311_vm10, %v2241_v62, %v2310_v6 }
 0x29e   : > { %2314 = vst.msk [vmem:[%s595_s18] sm:$0x3] %vm2313_vm11, %v2312_v19 }
 0x29f PF: > { %s21_s13 = sadd.s32 1, %s2761_s13  }
 0x2a0   : > { %p18_p9 = scmp.ge.s32.totalorder %s21_s13, 9  }
 0x2a2   :  { %20 = sbr.rel (!%p18_p9) target bundleno = 1 (0x1), region = 113 }

// kernel: _lambda_.9
= control target key start
LH: loop header
LB: loop body
LE: loop exit
PB: predicated region body
PF: predicated region fallthrough
CT: control target
= control target key end

     0   :  { %s2518_s13 = smov 0   ;;  %s3415_s0 = inlined_call_operand.vmem [shape: bf16[896,32], index: 0, kind: input, shape index: {}, may-alias: {0,1,2}]   ;;  %s3416_s1 = inlined_call_operand.vmem [shape: bf16[896,32], index: 1, kind: input, shape index: {}, may-alias: {0,1,2}]   ;;  %s3417_s2 = inlined_call_operand.vmem [shape: bf16[896,32], index: 2, kind: input, shape index: {}, may-alias: {0,1,2}]   ;;  %s3418_s3 = inlined_call_operand.vmem [shape: f32[896,1], index: 3, kind: input, shape index: {}, may-alias: {3,4,5}]   ;;  %s3419_s4 = inlined_call_operand.vmem [shape: f32[896,1], index: 4, kind: input, shape index: {}, may-alias: {3,4,5}]   ;;  %s3420_s5 = inlined_call_operand.vmem [shape: f32[896,1], index: 5, kind: input, shape index: {}, may-alias: {3,4,5}]   ;;  %s3421_s6 = inlined_call_operand.vmem [shape: f32[1,32], index: 6, kind: input, shape index: {}]   ;;  %s3422_s7 = inlined_call_operand.vmem [shape: f32[1,32], index: 7, kind: input, shape index: {}]   ;;  %s3423_s8 = inlined_call_operand.vmem [shape: bf16[288,3], index: 8, kind: input, shape index: {}]   ;;  %s3424_s9 = inlined_call_operand.vmem [shape: f32[896,3], index: 9, kind: input, shape index: {}]   ;;  %s3425_s10 = inlined_call_operand.vmem [shape: f32[896,3], index: 10, kind: output, shape index: {}]  }
   0x1 LB: > { %s2200_s14 = sadd.s32 4294967295, %s2457_s13   ;;  %p2216_p0 = scmp.ge.s32.totalorder %s2457_s13, 1  ;;  %s2457_s13 = sphi %s2518_s13, %s20_s13  }
   0x2   : > { %p443_p1 = scmp.lt.s32.totalorder %s2457_s13, 8 }
   0x4   : > { %p444_p2 = pnand %p2216_p0, %p443_p1 }
   0x5   : > { %s2217_s15 = sshll.u32 (!%p444_p2), %s2200_s14, 4  ;;  %s2219_s16 = sshll.u32 (!%p444_p2), %s2200_s14, 2  ;;  %v2459_v0 = vmov (!%p444_p2), 0   ;;  %v2554_v13 = vld [vmem:[%s3421_s6] ss:$0 sm:$0xff] (!%p444_p2)  ;;  %vm1204_vm1 = vcmask (!%p444_p2), 1042432  }
   0x6   : > { %447 = sbr.rel (%p444_p2) target bundleno = 644 (0x284), region = 60  ;;  %2420 = vset.pattern.permute.xlu1 (!%p444_p2), %v2459_v0  ;;  %2419 = vset.pattern.permute.xlu0 (!%p444_p2), %v2459_v0  ;;  %p528_p3 = scmp.lt.s32.totalorder (!%p444_p2), %s2217_s15, 111  ;;  %v2564_v20 = vld [vmem:[%s3422_s7] ss:$0 sm:$0xff] (!%p444_p2)  ;;  %vm1166_vm0 = vsmask.f32 (!%p444_p2), 3328 }
   0x7   : > { %s2220_s17 = sadd.s32 (!%p444_p2), 4294967295, %s2219_s16  ;;  %s2294_s18 = sadd.s32 (!%p444_p2), 4, %s2219_s16  ;;  %vm1093_vm2 = vcmask (!%p444_p2), 1046528   ;;  %vm994_vm3 = vsmask.f32 (!%p444_p2), 7424  ;;  %vm1130_vm4 = vcmask (!%p444_p2), 1043456  }
   0x8   : > { %p535_p4 = scmp.gt.s32.totalorder (!%p444_p2), %s2220_s17, 0  ;;  %p549_p6 = scmp.lt.s32.totalorder (!%p444_p2), %s2294_s18, 27  ;;  %vm1458_vm5 = vsmask.f32 (!%p444_p2), 4352  ;;  %vm1302_vm6 = vcmask (!%p444_p2), 261120   ;;  %vm1321_vm7 = vcmask (!%p444_p2), 523264  }
   0x9   : > { %s2462_s14 = smov (!%p444_p2), 96   ;;  %vm1340_vm8 = vcmask (!%p444_p2), 785408   ;;  %vm2055_vm9 = vcmask (!%p444_p2), 23552  }
   0xd   : > { %s3455_s15 = smov (!%p528_p3, %s2217_s15), 111  ;;  %s3457_s17 = smov (!%p535_p4, %s2220_s17), 0 }
   0xe   : > { %s2526_s19 = sshll.u32 %s3455_s15, 3  ;;  %s2218_s20 = sshll.u32 %s3455_s15, 2 }
   0xf   : > { %s2532_s23 = scalar_lea.vmem %s3418_s3, %s2526_s19  ;;  %s2221_s24 = sshll.u32 %s3457_s17, 2 }
  0x10   : > { %v711_v1 = vld [vmem:[%s2532_s23 + $0x18] sm:$0xff]  ;;  %v710_v2 = vld [vmem:[%s2532_s23 + $0x10] sm:$0xff]  ;;  %p538_p5 = scmp.lt.s32.totalorder %s2221_s24, 111  ;;  %s2539_s27 = scalar_lea.vmem %s3415_s0, %s2218_s20  ;;  %v713_v3 = vld [vmem:[%s2532_s23 + $0x28] sm:$0xff] }
  0x11   : > { %875 = vperm.xlu1 %2420, %v711_v1   ;;  %870 = vperm.xlu0 %2419, %v710_v2   ;;  %v712_v4 = vld [vmem:[%s2532_s23 + $0x20] sm:$0xff]  ;;  %s3461_s18 = smov (!%p549_p6, %s2294_s18), 27  ;;  %v709_v18 = vld [vmem:[%s2532_s23 + $0x8] sm:$0xff]  ;;  %v719_v29 = vld [vmem:[%s2532_s23 + $0x58] sm:$0xff]  ;;  %s3360_s25 = scalar_lea.vmem %s3425_s10, %s2526_s19 }
  0x12   : > { %s3459_s24 = smov (!%p538_p5, %s2221_s24), 111  ;;  %s2224_s17 = sshll.u32 %s3461_s18, 2  ;;  %v708_v19 = vld [vmem:[%s2532_s23] sm:$0xff]  ;;  %v717_v27 = vld [vmem:[%s2532_s23 + $0x48] sm:$0xff]  ;;  %v718_v30 = vld [vmem:[%s2532_s23 + $0x50] sm:$0xff] }
  0x13   : > { %s2222_s28 = sshll.u32 %s3459_s24, 2  ;;  %s2231_s29 = sshll.u32 %s3459_s24, 3  ;;  %v716_v28 = vld [vmem:[%s2532_s23 + $0x40] sm:$0xff]  ;;  %v715_v31 = vld [vmem:[%s2532_s23 + $0x38] sm:$0xff]  ;;  %v714_v32 = vld [vmem:[%s2532_s23 + $0x30] sm:$0xff] }
  0x14   : > { %s541_s12 = scalar_lea.vmem %s3416_s1, %s2222_s28  ;;  %s575_s16 = scalar_lea.vmem %s3419_s4, %s2231_s29  ;;  %v723_v34 = vld [vmem:[%s2532_s23 + $0x78] sm:$0xff]  ;;  %v722_v35 = vld [vmem:[%s2532_s23 + $0x70] sm:$0xff]  ;;  %v721_v47 = vld [vmem:[%s2532_s23 + $0x68] sm:$0xff] }
  0x15   : > { %885 = vperm.xlu1 %2420, %v713_v3   ;;  %880 = vperm.xlu0 %2419, %v712_v4   ;;  %v706_v5 = vld [vmem:[%s575_s16 + $0x10] sm:$0xff]  ;;  %v704_v6 = vld [vmem:[%s575_s16] sm:$0xff]  ;;  %v707_v7 = vld [vmem:[%s575_s16 + $0x18] sm:$0xff]  ;;  %p552_p7 = scmp.lt.s32.totalorder %s2224_s17, 111 }
  0x16   : > { %v705_v8 = vld [vmem:[%s575_s16 + $0x8] sm:$0xff]  ;;  %v2424_v10 = vld [vmem:[%s541_s12] sm:$0xff]   ;;  %v2422_v58 = vld [vmem:[%s2539_s27 + $0x10] sm:$0xff]  }
  0x17   : > { %v2423_v9 = vld [vmem:[%s541_s12 + $0x8] sm:$0xff]   ;;  %s3463_s17 = smov (!%p552_p7, %s2224_s17), 111  ;;  %v728_v14 = vunpack.c.l.bf16 %v2424_v10  ;;  %v729_v15 = vunpack.c.h.bf16 %v2424_v10  ;;  %v720_v48 = vld [vmem:[%s2532_s23 + $0x60] sm:$0xff]  ;;  %v737_v61 = vunpack.c.h.bf16 %v2422_v58  ;;  %v736_v62 = vunpack.c.l.bf16 %v2422_v58  ;;  %s2460_s23 = smov 64   ;;  %v2429_v58 = vld [vmem:[%s2539_s27 + $0x38] sm:$0xff]  }
  0x18   : > { %v730_v11 = vunpack.c.l.bf16 %v2423_v9  ;;  %v731_v12 = vunpack.c.h.bf16 %v2423_v9  ;;  %s2225_s18 = sshll.u32 %s3463_s17, 2  ;;  %s2234_s29 = sshll.u32 %s3463_s17, 3  ;;  %v2421_v55 = vld [vmem:[%s2539_s27 + $0x8] sm:$0xff]   ;;  %v2426_v9 = vld [vmem:[%s2539_s27 + $0x20] sm:$0xff]  }
  0x19   : > { %850 = vperm.xlu1 %2420, %v706_v5   ;;  %840 = vperm.xlu0 %2419, %v704_v6   ;;  %v759_v21 = vmul.f32 %v2554_v13, %v728_v14  ;;  %v760_v22 = vmul.f32 %v2554_v13, %v729_v15  ;;  %s2577_s28 = scalar_lea.vmem %s3417_s2, %s2225_s18  ;;  %s589_s12 = scalar_lea.vmem %s3420_s5, %s2234_s29  ;;  %v735_v56 = vunpack.c.h.bf16 %v2421_v55  ;;  %v734_v57 = vunpack.c.l.bf16 %v2421_v55 }
  0x1a   : > { %v761_v16 = vmul.f32 %v2554_v13, %v730_v11  ;;  %v762_v17 = vmul.f32 %v2554_v13, %v731_v12  ;;  %v2430_v33 = vld [vmem:[%s2577_s28] sm:$0xff]   ;;  %v725_v42 = vld [vmem:[%s589_s12 + $0x8] sm:$0xff]  ;;  %v727_v53 = vld [vmem:[%s589_s12 + $0x18] sm:$0xff]  ;;  %v768_v1 = vmul.f32 %v2554_v13, %v737_v61  ;;  %v767_v2 = vmul.f32 %v2554_v13, %v736_v62  ;;  %s3352_s18 = scalar_lea.vmem %s3424_s9, %s2526_s19 }
  0x1b   : > { %v2580_v25 = vadd.f32 %v2564_v20, %v759_v21  ;;  %v2583_v26 = vadd.f32 %v2564_v20, %v760_v22  ;;  %v749_v36 = vunpack.c.h.bf16 %v2430_v33  ;;  %v748_v37 = vunpack.c.l.bf16 %v2430_v33  ;;  %v724_v43 = vld [vmem:[%s589_s12] sm:$0xff]  ;;  %v2432_v44 = vld [vmem:[%s2577_s28 + $0x8] sm:$0xff]   ;;  %v726_v54 = vld [vmem:[%s589_s12 + $0x10] sm:$0xff] }
  0x1c   : > { %v2569_v23 = vadd.f32 %v2564_v20, %v761_v16  ;;  %v2572_v24 = vadd.f32 %v2564_v20, %v762_v17  ;;  %v751_v45 = vunpack.c.h.bf16 %v2432_v44  ;;  %v750_v46 = vunpack.c.l.bf16 %v2432_v44  ;;  %v2427_v16 = vld [vmem:[%s2539_s27 + $0x28] sm:$0xff]  }
  0x1d   : > { %855 = vperm.xlu1 %2420, %v707_v7   ;;  %845 = vperm.xlu0 %2419, %v705_v8   ;;  %v780_v38 = vmul.f32 %v2554_v13, %v749_v36  ;;  %v779_v39 = vmul.f32 %v2554_v13, %v748_v37  ;;  %v766_v59 = vmul.f32 %v2554_v13, %v735_v56  ;;  %v741_v21 = vunpack.c.h.bf16 %v2426_v9 }
  0x1e   : > { %v782_v49 = vmul.f32 %v2554_v13, %v751_v45  ;;  %v781_v50 = vmul.f32 %v2554_v13, %v750_v46  ;;  %v765_v60 = vmul.f32 %v2554_v13, %v734_v57  ;;  %v799_v5 = vadd.f32 %v2564_v20, %v768_v1 }
  0x1f   : > { %v2601_v40 = vadd.f32 %v2564_v20, %v780_v38  ;;  %v2604_v41 = vadd.f32 %v2564_v20, %v779_v39  ;;  %v797_v63 = vadd.f32 %v2564_v20, %v766_v59  ;;  %v798_v6 = vadd.f32 %v2564_v20, %v767_v2 }
  0x20   : > { %v2612_v51 = vadd.f32 %v2564_v20, %v782_v49  ;;  %v2615_v52 = vadd.f32 %v2564_v20, %v781_v50  ;;  %v796_v0 = vadd.f32 %v2564_v20, %v765_v60  ;;  %v823_v12 = vmax.f32 %v799_v5, 0.0 }
  0x21   : > { %865 = vperm.xlu1 %2420, %v709_v18   ;;  %860 = vperm.xlu0 %2419, %v708_v19   ;;  %v821_v3 = vmax.f32 %v797_v63, 0.0  ;;  %v822_v14 = vmax.f32 %v798_v6, 0.0  ;;  %v816_v19 = vmax.f32 %v2569_v23, 0.0  ;;  %v815_v23 = vmax.f32 %v2583_v26, 0.0 }
  0x22   : > { %v820_v4 = vmax.f32 %v796_v0, 0.0  ;;  %v772_v38 = vmul.f32 %v2554_v13, %v741_v21  ;;  %v742_v39 = vunpack.c.l.bf16 %v2427_v16 }
  0x24   : > { %v803_v55 = vadd.f32 %v2564_v20, %v772_v38  ;;  %v773_v57 = vmul.f32 %v2554_v13, %v742_v39 }
  0x25   : > { %905 = vperm.xlu1 %2420, %v717_v27   ;;  %900 = vperm.xlu0 %2419, %v716_v28   ;;  %v814_v28 = vmax.f32 %v2580_v25, 0.0 }
  0x29   : > { %915 = vperm.xlu1 %2420, %v719_v29   ;;  %910 = vperm.xlu0 %2419, %v718_v30   ;;  %v740_v29 = vunpack.c.l.bf16 %v2426_v9  ;;  %v2425_v30 = vld [vmem:[%s2539_s27] sm:$0xff]   ;;  %v747_v9 = vunpack.c.h.bf16 %v2429_v58 }
  0x2a   : > { %v733_v45 = vunpack.c.h.bf16 %v2425_v30  ;;  %v732_v46 = vunpack.c.l.bf16 %v2425_v30 }
  0x2b   : > { %v778_v30 = vmul.f32 %v2554_v13, %v747_v9 }
  0x2c   : > { %v764_v63 = vmul.f32 %v2554_v13, %v733_v45  ;;  %v763_v0 = vmul.f32 %v2554_v13, %v732_v46 }
  0x2d   : > { %895 = vperm.xlu1 %2420, %v715_v31   ;;  %890 = vperm.xlu0 %2419, %v714_v32   ;;  %v809_v45 = vadd.f32 %v2564_v20, %v778_v30 }
  0x31   : > { %935 = vperm.xlu1 %2420, %v723_v34   ;;  %930 = vperm.xlu0 %2419, %v722_v35   ;;  %v817_v34 = vmax.f32 %v2572_v24, 0.0  ;;  %v743_v35 = vunpack.c.h.bf16 %v2427_v16  ;;  %v771_v24 = vmul.f32 %v2554_v13, %v740_v29  ;;  %v746_v16 = vunpack.c.l.bf16 %v2429_v58 }
  0x33   : > { %v774_v56 = vmul.f32 %v2554_v13, %v743_v35  ;;  %v802_v62 = vadd.f32 %v2564_v20, %v771_v24 }
  0x35   : > { %945 = vperm.xlu1 %2420, %v725_v42   ;;  %940 = vperm.xlu0 %2419, %v724_v43  }
  0x39   : > { %925 = vperm.xlu1 %2420, %v721_v47   ;;  %920 = vperm.xlu0 %2419, %v720_v48   ;;  %v2428_v48 = vld [vmem:[%s2539_s27 + $0x18] sm:$0xff]  }
  0x3d   : > { %955 = vperm.xlu1 %2420, %v727_v53   ;;  %950 = vperm.xlu0 %2419, %v726_v54  }
  0x90   : > { %v876_v7 = vpop.permute.xlu1 %875  ;;  %v871_v8 = vpop.permute.xlu0 %870 }
  0x91   : > { %v965_v10 = vmul.f32 %v876_v7, %v821_v3  ;;  %v964_v11 = vmul.f32 %v871_v8, %v820_v4  ;;  %v739_v4 = vunpack.c.h.bf16 %v2428_v48  ;;  %v805_v7 = vadd.f32 %v2564_v20, %v774_v56 }
  0x92   : > { %v738_v8 = vunpack.c.l.bf16 %v2428_v48 }
  0x93   : > { %v2628_v15 = vpack.c.bf16 %v965_v10, %v964_v11  ;;  %v827_v11 = vmax.f32 %v803_v55, 0.0 }
  0x94   : > { %v886_v17 = vpop.permute.xlu1 %885  ;;  %v881_v18 = vpop.permute.xlu0 %880  ;;  %v769_v29 = vmul.f32 %v2554_v13, %v738_v8 }
  0x95   : > { %v967_v22 = vmul.f32 %v886_v17, %v823_v12  ;;  %v966_v27 = vmul.f32 %v881_v18, %v822_v14  ;;  %1241 = vrot.lane.b32.xlu0 %v2628_v15, %s2460_s23  ;;  %v3438_v31 = vshll.u32 %v2628_v15, 16  ;;  %v3434_v32 = vshrl.u32 %v2628_v15, 16 }
  0x96   : > { %v826_v12 = vmax.f32 %v802_v62, 0.0  ;;  %v804_v14 = vadd.f32 %v2564_v20, %v773_v57  ;;  %v795_v17 = vadd.f32 %v2564_v20, %v764_v63  ;;  %v794_v18 = vadd.f32 %v2564_v20, %v763_v0 }
  0x97   : > { %v2638_v33 = vpack.c.bf16 %v967_v22, %v966_v27  ;;  %v1170_v25 = vrot.slane %v3434_v32, 4  ;;  %v1171_v42 = vrot.slane %v3438_v31, 5  ;;  %v829_v27 = vmax.f32 %v805_v7, 0.0 }
  0x98   : > { %v851_v36 = vpop.permute.xlu1 %850  ;;  %v841_v37 = vpop.permute.xlu0 %840  ;;  %v828_v35 = vmax.f32 %v804_v14, 0.0  ;;  %v818_v38 = vmax.f32 %v794_v18, 0.0  ;;  %v800_v24 = vadd.f32 %v2564_v20, %v769_v29  ;;  %v833_v63 = vmax.f32 %v809_v45, 0.0 }
  0x99   : > { %v960_v43 = vmul.f32 %v851_v36, %v816_v19  ;;  %v958_v44 = vmul.f32 %v841_v37, %v814_v28  ;;  %1243 = vrot.lane.b32.xlu1 %v2638_v33, %s2460_s23  ;;  %v3436_v26 = vshll.u32 %v2638_v33, 16  ;;  %v3431_v47 = vshrl.u32 %v2638_v33, 16  ;;  %v2431_v19 = vld [vmem:[%s2539_s27 + $0x30] sm:$0xff]   ;;  %s2461_s27 = smov 32  }
  0x9a   : > { %v2655_v50 = vor.u32 %v1171_v42, %v1170_v25  ;;  %v770_v28 = vmul.f32 %v2554_v13, %v739_v4  ;;  %v777_v36 = vmul.f32 %v2554_v13, %v746_v16  ;;  %v819_v37 = vmax.f32 %v795_v17, 0.0 }
  0x9b   : > { %v1175_v49 = vrot.slane %v3436_v26, 5  ;;  %v1174_v59 = vrot.slane %v3431_v47, 4  ;;  %v745_v39 = vunpack.c.h.bf16 %v2431_v19  ;;  %v744_v25 = vunpack.c.l.bf16 %v2431_v19 }
  0x9c   : > { %v856_v53 = vpop.permute.xlu1 %855  ;;  %v846_v54 = vpop.permute.xlu0 %845  ;;  %v824_v62 = vmax.f32 %v800_v24, 0.0  ;;  %v835_v18 = vmax.f32 %v2601_v40, 0.0  ;;  %v834_v19 = vmax.f32 %v2604_v41, 0.0  ;;  %v836_v29 = vmax.f32 %v2615_v52, 0.0 }
  0x9d   : > { %v961_v60 = vmul.f32 %v856_v53, %v817_v34  ;;  %v959_v61 = vmul.f32 %v846_v54, %v815_v23  ;;  %v2666_v1 = vor.u32 %v1175_v49, %v1174_v59  ;;  %v808_v53 = vadd.f32 %v2564_v20, %v777_v36 }
  0x9e   : > { %v776_v56 = vmul.f32 %v2554_v13, %v745_v39  ;;  %v775_v57 = vmul.f32 %v2554_v13, %v744_v25  ;;  %v1206_v30 = vrot.slane %v2628_v15, 5  ;;  %v1134_v36 = vrot.slane %v2628_v15, 4 }
  0x9f   : > { %v2668_v2 = vpack.c.bf16 %v961_v60, %v960_v43  ;;  %v2670_v3 = vpack.c.bf16 %v959_v61, %v958_v44  ;;  %v2676_v10 = vsel %vm1166_vm0, %v2655_v50, %v2666_v1  ;;  %v801_v44 = vadd.f32 %v2564_v20, %v770_v28 }
  0xa0   : > { %v866_v5 = vpop.permute.xlu1 %865  ;;  %v861_v6 = vpop.permute.xlu0 %860  ;;  %v832_v0 = vmax.f32 %v808_v53, 0.0  ;;  %v1208_v52 = vrot.slane %v2638_v33, 5 }
  0xa1   : > { %v963_v54 = vmul.f32 %v866_v5, %v819_v37  ;;  %v962_v55 = vmul.f32 %v861_v6, %v818_v38  ;;  %v825_v60 = vmax.f32 %v801_v44, 0.0  ;;  %v807_v5 = vadd.f32 %v2564_v20, %v776_v56 }
  0xa2   : > { %v806_v6 = vadd.f32 %v2564_v20, %v775_v57 }
  0xa3   : > { %v2698_v8 = vpack.c.bf16 %v963_v54, %v962_v55  ;;  %v831_v20 = vmax.f32 %v807_v5, 0.0 }
  0xa4   : > { %v906_v21 = vpop.permute.xlu1 %905  ;;  %v901_v22 = vpop.permute.xlu0 %900 }
  0xa5   : > { %v971_v34 = vmul.f32 %v906_v21, %v827_v11  ;;  %v970_v23 = vmul.f32 %v901_v22, %v826_v12  ;;  %v830_v21 = vmax.f32 %v806_v6, 0.0  ;;  %v837_v22 = vmax.f32 %v2612_v51, 0.0 }
  0xa6   : > { %v3428_v51 = vshrl.u32 %v2698_v8, 16  ;;  %v1132_v39 = vrot.slane %v2698_v8, 4  ;;  %v3429_v44 = vshll.u32 %v2698_v8, 16 }
  0xa7   : > { %v2689_v46 = vpack.c.bf16 %v971_v34, %v970_v23 }
  0xa8   : > { %v916_v42 = vpop.permute.xlu1 %915  ;;  %v911_v43 = vpop.permute.xlu0 %910 }
  0xa9   : > { %v973_v48 = vmul.f32 %v916_v42, %v829_v27  ;;  %v972_v49 = vmul.f32 %v911_v43, %v828_v35  ;;  %v3427_v7 = vrot.slane %v2689_v46, 5  ;;  %v1205_v27 = vrot.slane %v2698_v8, 5 }
  0xaa   : > { %v3432_v34 = vshrl.u32 %v2689_v46, 16  ;;  %v1105_v25 = vrot.slane %v2689_v46, 1  ;;  %v1043_v45 = vshll.u32 %v2689_v46, 16 }
  0xab   : > { %v2694_v58 = vpack.c.bf16 %v973_v48, %v972_v49  ;;  %v2731_v42 = vsel %vm1204_vm1, %v1205_v27, %v1206_v30  ;;  %v1140_v49 = vrot.slane %v2689_v46, 4 }
  0xac   : > { %v896_v59 = vpop.permute.xlu1 %895  ;;  %v891_v61 = vpop.permute.xlu0 %890  ;;  %v2740_v48 = vrot.slane %v3432_v34, 4 }
  0xad   : > { %v1214_v4 = vrot.slane %v2694_v58, 5  ;;  %v969_v9 = vmul.f32 %v896_v59, %v825_v60  ;;  %v968_v11 = vmul.f32 %v891_v61, %v824_v62  ;;  %v1107_v41 = vrot.slane %v2694_v58, 1 }
  0xae   : > { %v2753_v59 = vrot.slane %v3428_v51, 4  ;;  %v3433_v5 = vshll.u32 %v2694_v58, 16 }
  0xaf   : > { %v2707_v13 = vsel %vm1204_vm1, %v3427_v7, %v1214_v4  ;;  %v2718_v23 = vpack.c.bf16 %v969_v9, %v968_v11  ;;  %v1108_v55 = vsel %vm1093_vm2, %v1105_v25, %v1107_v41 }
  0xb0   : > { %v936_v12 = vpop.permute.xlu1 %935  ;;  %v931_v14 = vpop.permute.xlu0 %930 }
  0xb1   : > { %v977_v16 = vmul.f32 %v936_v12, %v833_v63  ;;  %v976_v17 = vmul.f32 %v931_v14, %v832_v0  ;;  %v3426_v57 = vrot.slane %v2718_v23, 1  ;;  %v1142_v0 = vrot.slane %v2694_v58, 4 }
  0xb2   : > { %v1548_v12 = vshrl.u32 %v1108_v55, 16 }
  0xb3   : > { %v2713_v28 = vpack.c.bf16 %v977_v16, %v976_v17  ;;  %v3430_v16 = vshrl.u32 %v2694_v58, 16 }
  0xb4   : > { %v946_v35 = vpop.permute.xlu1 %945  ;;  %v941_v40 = vpop.permute.xlu0 %940 }
  0xb5   : > { %v979_v37 = vmul.f32 %v946_v35, %v835_v18  ;;  %v978_v38 = vmul.f32 %v941_v40, %v834_v19  ;;  %1253 = vrot.lane.b32.xlu0 %v2713_v28, %s2460_s23  ;;  %v1198_v43 = vshll.u32 %v2713_v28, 16  ;;  %v1218_v62 = vrot.slane %v2713_v28, 5 }
  0xb6   : > { %v1195_v6 = vshrl.u32 %v2713_v28, 16  ;;  %v3439_v19 = vrot.slane %v2713_v28, 1  ;;  %v2776_v35 = vsel %vm1093_vm2, %v3426_v57, %v1105_v25  ;;  %v1168_v25 = vrot.slane %v3429_v44, 5 }
  0xb7   : > { %v2735_v24 = vpack.c.bf16 %v979_v37, %v978_v38  ;;  %v2748_v56 = vrot.slane %v1198_v43, 1  ;;  %v1039_v57 = vshrl.u32 %v2718_v23, 16 }
  0xb8   : > { %v926_v53 = vpop.permute.xlu1 %925  ;;  %v921_v54 = vpop.permute.xlu0 %920 }
  0xb9   : > { %v975_v60 = vmul.f32 %v926_v53, %v831_v20  ;;  %v974_v61 = vmul.f32 %v921_v54, %v830_v21  ;;  %1245 = vrot.lane.b32.xlu0 %v2718_v23, %s2460_s23  ;;  %v1220_v63 = vrot.slane %v2735_v24, 5  ;;  %v1263_v9 = vshll.u32 %v2735_v24, 16 }
  0xba   : > { %v1261_v20 = vor.u32 %v2748_v56, %v1195_v6  ;;  %v1551_v54 = vshll.u32 %v1108_v55, 16 }
  0xbb   : > { %v2763_v11 = vpack.c.bf16 %v975_v60, %v974_v61  ;;  %v2768_v14 = vsel %vm1204_vm1, %v1218_v62, %v1220_v63  ;;  %v1265_v21 = vrot.slane %v1263_v9, 1 }
  0xbc   : > { %v956_v17 = vpop.permute.xlu1 %955  ;;  %v951_v18 = vpop.permute.xlu0 %950  ;;  %v1553_v7 = vrot.slane %v1551_v54, 4  ;;  %v1267_v54 = vshrl.u32 %v2735_v24, 16 }
  0xbd   : > { %v981_v40 = vmul.f32 %v956_v17, %v837_v22  ;;  %v980_v37 = vmul.f32 %v951_v18, %v836_v29  ;;  %1222 = vrot.lane.b32.xlu0 %v1205_v27, %s2461_s27  ;;  %v1109_v38 = vrot.slane %v2763_v11, 1  ;;  %v1216_v53 = vrot.slane %v2763_v11, 5 }
  0xbe   : > { %v1059_v60 = vshll.u32 %v2763_v11, 16  ;;  %v2783_v61 = vsel %vm994_vm3, %v1261_v20, %v1265_v21  ;;  %v3437_v29 = vshll.u32 %v2718_v23, 16  ;;  %v1063_v17 = vshrl.u32 %v2763_v11, 16 }
  0xbf   : > { %v2787_v63 = vpack.c.bf16 %v981_v40, %v980_v37  ;;  %v2792_v22 = vsel %vm1093_vm2, %v1109_v38, %v3439_v19  ;;  %1127 = vrot.lane.b32.xlu1 %v1109_v38, %s2460_s23  ;;  %v1217_v27 = vsel %vm1204_vm1, %v1214_v4, %v1216_v53  ;;  %v1187_v18 = vrot.slane %v3433_v5, 5 }
  0xc0   : > { %v2799_v9 = vrot.slane %v1059_v60, 1  ;;  %v1186_v20 = vrot.slane %v3430_v16, 4  ;;  %v3435_v40 = vrot.slane %v2713_v28, 4  ;;  %v1550_v37 = vrot.slane %v1548_v12, 3 }
  0xc1   : > { %1234 = vrot.lane.b32.xlu0 %v1217_v27, %s2461_s27  ;;  %v2811_v4 = vsel %vm1093_vm2, %v1107_v41, %v1109_v38  ;;  %v1144_v12 = vrot.slane %v2763_v11, 4  ;;  %v1179_v41 = vrot.slane %v3437_v29, 5  ;;  %v1271_v38 = vshll.u32 %v2787_v63, 16 }
  0xc2   : > { %v2815_v51 = vor.u32 %v1063_v17, %v2799_v9  ;;  %v1573_v44 = vshrl.u32 %v2811_v4, 16  ;;  %v1576_v16 = vshll.u32 %v2811_v4, 16  ;;  %v1190_v27 = vrot.slane %v1063_v17, 4 }
  0xc3   : > { %1164 = vrot.lane.b32.xlu1 %v3435_v40, %s2462_s14  ;;  %v1191_v47 = vrot.slane %v1059_v60, 5  ;;  %v2828_v32 = vrot.slane %v1271_v38, 1  ;;  %v1178_v40 = vrot.slane %v1039_v57, 4  ;;  %v1269_v26 = vor.u32 %v1267_v54, %v1265_v21 }
  0xc4   : > { %v1575_v34 = vrot.slane %v1573_v44, 3  ;;  %v1578_v5 = vrot.slane %v1576_v16, 4  ;;  %v2835_v29 = vsel %vm994_vm3, %v2815_v51, %v2748_v56  ;;  %v1598_v31 = vshrl.u32 %v2792_v22, 16 }
  0xc5   : > { %1123 = vrot.lane.b32.xlu0 %v1108_v55, %s2460_s23  ;;  %v1197_v19 = vrot.slane %v1195_v6, 4  ;;  %v2843_v44 = vsel %vm1130_vm4, %v1140_v49, %v1142_v0  ;;  %v2846_v55 = vor.u32 %v1168_v25, %v2753_v59  ;;  %v1601_v16 = vshll.u32 %v2792_v22, 16 }
  0xc6   : > { %v1145_v56 = vsel %vm1130_vm4, %v1142_v0, %v1144_v12  ;;  %v1579_v6 = vor.u32 %v1578_v5, %v1575_v34  ;;  %v2858_v21 = vsel %vm994_vm3, %v1269_v26, %v2828_v32  ;;  %v1188_v60 = vor.u32 %v1187_v18, %v1186_v20 }
  0xc7   : > { %1224 = vrot.lane.b32.xlu1 %v2731_v42, %s2461_s27  ;;  %v1192_v17 = vor.u32 %v1191_v47, %v1190_v27  ;;  %v2863_v59 = vsel %vm1166_vm0, %v2846_v55, %v2655_v50  ;;  %v1200_v42 = vrot.slane %v1198_v43, 5  ;;  %v1298_v25 = vrot.slane %v2735_v24, 1 }
  0xc8   : > { %v1300_v22 = vrot.slane %v2787_v63, 1  ;;  %v2869_v0 = vor.u32 %v1553_v7, %v1550_v37  ;;  %v1180_v26 = vor.u32 %v1179_v41, %v1178_v40  ;;  %v1219_v47 = vsel %vm1204_vm1, %v1216_v53, %v1218_v62 }
  0xc9   : > { %1160 = vrot.lane.b32.xlu0 %v1145_v56, %s2462_s14  ;;  %v2876_v34 = vsel %vm1166_vm0, %v1188_v60, %v1192_v17  ;;  %v2878_v50 = vor.u32 %v1200_v42, %v1197_v19  ;;  %v1183_v43 = vrot.slane %v1043_v45, 5  ;;  %v1209_v7 = vsel %vm1204_vm1, %v1206_v30, %v1208_v52 }
  0xca   : > { %v1135_v62 = vsel %vm1130_vm4, %v1132_v39, %v1134_v36  ;;  %v2895_v5 = vsel %vm1166_vm0, %v2666_v1, %v1180_v26  ;;  %v2899_v19 = vsel %vm1458_vm5, %v2869_v0, %v1579_v6  ;;  %v1600_v18 = vrot.slane %v1598_v31, 3 }
  0xcb   : > { %1236 = vrot.lane.b32.xlu1 %v1219_v47, %s2461_s27  ;;  %v2903_v53 = vsel %vm1166_vm0, %v1192_v17, %v2878_v50  ;;  %v1184_v30 = vor.u32 %v1183_v43, %v2740_v48  ;;  %v1603_v20 = vrot.slane %v1601_v16, 4  ;;  %v3440_v40 = vrot.slane %v2713_v28, 1 }
  0xcc   : > { %v1301_v1 = vsel %vm1093_vm2, %v1298_v25, %v1300_v22  ;;  %v1673_v41 = vshrl.u32 %v1300_v22, 16  ;;  %v1676_v38 = vshll.u32 %v1300_v22, 16 }
  0xcd   : > { %1226 = vrot.lane.b32.xlu0 %v1209_v7, %s2461_s27  ;;  %v1299_v37 = vsel %vm1093_vm2, %v3440_v40, %v1298_v25  ;;  %v2912_v54 = vsel %vm1166_vm0, %v1180_v26, %v1184_v30  ;;  %v2915_v27 = vsel %vm1166_vm0, %v1184_v30, %v1188_v60  ;;  %v1604_v56 = vor.u32 %v1603_v20, %v1600_v18 }
  0xce   : > { %v1623_v48 = vshrl.u32 %v1299_v37, 16  ;;  %v1626_v31 = vshll.u32 %v1299_v37, 16  ;;  %v1648_v16 = vshrl.u32 %v1301_v1, 16  ;;  %v1651_v17 = vshll.u32 %v1301_v1, 16 }
  0xcf   : > { %1150 = vrot.lane.b32.xlu1 %v1135_v62, %s2462_s14  ;;  %v1675_v42 = vrot.slane %v1673_v41, 3  ;;  %v2919_v47 = vsel %vm1458_vm5, %v1579_v6, %v1604_v56  ;;  %v1678_v43 = vrot.slane %v1676_v38, 4  ;;  %v3441_v7 = vshll.u32 %v2628_v15, 16 }
  0xd0   : > { %v1625_v25 = vrot.slane %v1623_v48, 3  ;;  %v1628_v22 = vrot.slane %v1626_v31, 4  ;;  %v1650_v26 = vrot.slane %v1648_v16, 3  ;;  %v1653_v60 = vrot.slane %v1651_v17, 4 }
  0xd1   : > { %1082 = vrot.lane.b32.xlu0 %v2815_v51, %s2461_s27  ;;  %v2925_v30 = vrot.slane %v3441_v7, 1  ;;  %v1679_v62 = vor.u32 %v1678_v43, %v1675_v42  ;;  %v3442_v6 = vshll.u32 %v2638_v33, 16  ;;  %v3443_v41 = vrot.slane %v2713_v28, 4  ;;  %v2433_v7 = vld [vmem:[%s3423_s8 + $0x40] sm:$0xff]  }
  0xd2   : > { %v1629_v18 = vor.u32 %v1628_v22, %v1625_v25  ;;  %v1654_v20 = vor.u32 %v1653_v60, %v1650_v26  ;;  %v3444_v38 = vshrl.u32 %v2628_v15, 16  ;;  %v1097_v31 = vrot.slane %v2698_v8, 1  ;;  %2297 = vmatprep.subr.bf16.mxu0 %v2433_v7  ;;  %2391 = vmatprep.subr.bf16.mxu1 %v2433_v7  ;;  %v2437_v7 = vld [vmem:[%s3423_s8 + $0x50] sm:$0xff]  }
  0xd3   : > { %1125 = vrot.lane.b32.xlu1 %v2811_v4, %s2460_s23  ;;  %v1029_v40 = vrot.slane %v3442_v6, 1  ;;  %v1147_v4 = vsel %vm1130_vm4, %v1144_v12, %v3443_v41  ;;  %v1099_v28 = vrot.slane %v2628_v15, 1  ;;  %v3445_v17 = vshll.u32 %v2694_v58, 16 }
  0xd4   : > { %v2934_v51 = vsel %vm1458_vm5, %v1604_v56, %v1629_v18  ;;  %v2937_v37 = vsel %vm1458_vm5, %v1629_v18, %v1654_v20  ;;  %v2940_v1 = vsel %vm1458_vm5, %v1654_v20, %v1679_v62  ;;  %v1025_v48 = vor.u32 %v3444_v38, %v2925_v30  ;;  %v2434_v62 = vld [vmem:[%s3423_s8] sm:$0xff]   ;;  %v2436_v38 = vld [vmem:[%s3423_s8 + $0x8] sm:$0xff]  }
  0xd5   : > { %1257 = vrot.lane.b32.xlu0 %v2787_v63, %s2460_s23  ;;  %v2953_v56 = vrot.slane %v1043_v45, 1  ;;  %v1053_v12 = vrot.slane %v3445_v17, 1  ;;  %v1100_v45 = vsel %vm1093_vm2, %v1097_v31, %v1099_v28  ;;  %v3446_v42 = vshrl.u32 %v2689_v46, 16  ;;  %2298 = vmatpush3.bf16.msra.mxu0 %v2434_v62 }
  0xd6   : > { %v2957_v16 = vsel %vm994_vm3, %v1025_v48, %v1029_v40  ;;  %v1136_v43 = vrot.slane %v2638_v33, 4  ;;  %v1094_v26 = vrot.slane %v2670_v3, 1  ;;  %v1095_v60 = vrot.slane %v2668_v2, 1  ;;  %2399 = vmatpush3.bf16.msra.mxu1 %v2434_v62  ;;  %v2438_v62 = vld [vmem:[%s3423_s8 + $0x10] sm:$0xff]  }
  0xd7   : > { %1162 = vrot.lane.b32.xlu1 %v1147_v4, %s2462_s14  ;;  %v1049_v25 = vor.u32 %v3446_v42, %v2953_v56  ;;  %v1131_v6 = vrot.slane %v2668_v2, 4  ;;  %v3447_v41 = vshll.u32 %v2718_v23, 16  ;;  %v3448_v17 = vshrl.u32 %v2638_v33, 16 }
  0xd8   : > { %v1137_v18 = vsel %vm1130_vm4, %v1134_v36, %v1136_v43  ;;  %v1096_v20 = vsel %vm1093_vm2, %v1094_v26, %v1095_v60  ;;  %v2435_v36 = vld [vmem:[%s3423_s8 + $0x48] sm:$0xff]   ;;  %v3449_v42 = vshll.u32 %v2698_v8, 16 }
  0xd9   : > { %1278 = vrot.lane.b32.xlu0 %v2957_v16, %s2462_s14  ;;  %v2975_v22 = vsel %vm994_vm3, %v1049_v25, %v1053_v12  ;;  %v1037_v4 = vrot.slane %v3447_v41, 1  ;;  %v1133_v48 = vsel %vm1130_vm4, %v1131_v6, %v1132_v39  ;;  %2299 = vmatprep.subr.bf16.mxu0 %v2435_v36  ;;  %v3450_v39 = vshrl.u32 %v2694_v58, 16  ;;  %v2440_v41 = vld [vmem:[%s3423_s8 + $0x18] sm:$0xff]  }
  0xda   : > { %v3019_v25 = vrot.slane %v3449_v42, 1  ;;  %2300 = vmatpush3.bf16.msra.mxu0 %v2436_v38  ;;  %2392 = vmatprep.subr.bf16.mxu1 %v2435_v36  ;;  %v1275_v6 = vshrl.u32 %v2787_v63, 16  ;;  %v2441_v63 = vld [vmem:[%s3423_s8 + $0x60] sm:$0xff]  }
  0xdb   : > { %1115 = vrot.lane.b32.xlu1 %v1100_v45, %s2460_s23  ;;  %v1033_v45 = vor.u32 %v3448_v17, %v1029_v40  ;;  %2400 = vmatpush3.bf16.msra.mxu1 %v2436_v38  ;;  %v1057_v26 = vor.u32 %v3450_v39, %v1053_v12  ;;  %v998_v40 = vshll.u32 %v2670_v3, 16  ;;  %v3451_v12 = vshrl.u32 %v2698_v8, 16 }
  0xdc   : > { %2301 = vmatprep.subr.bf16.mxu0 %v2437_v7  ;;  %2393 = vmatprep.subr.bf16.mxu1 %v2437_v7  ;;  %v1041_v38 = vor.u32 %v1039_v57, %v1037_v4  ;;  %v1277_v17 = vor.u32 %v1275_v6, %v2828_v32  ;;  %v2442_v57 = vld [vmem:[%s3423_s8 + $0x20] sm:$0xff]   ;;  %v2443_v32 = vld [vmem:[%s3423_s8 + $0x68] sm:$0xff]   ;;  %v1210_v39 = vrot.slane %v2718_v23, 5  ;;  %v2445_v7 = vld [vmem:[%s3423_s8 + $0x70] sm:$0xff]  }
  0xdd   : > { %1078 = vrot.lane.b32.xlu0 %v2975_v22, %s2461_s27 }
  0xde   : > { %2302 = vmatpush3.bf16.msra.mxu0 %v2438_v62 }
  0xdf   : > { %1152 = vrot.lane.b32.xlu1 %v1137_v18, %s2462_s14  ;;  %v3036_v18 = vsel %vm994_vm3, %v1057_v26, %v2799_v9  ;;  %2401 = vmatpush3.bf16.msra.mxu1 %v2438_v62  ;;  %v2439_v9 = vld [vmem:[%s3423_s8 + $0x58] sm:$0xff]   ;;  %v2444_v26 = vld [vmem:[%s3423_s8 + $0x28] sm:$0xff]  }
  0xe0   : > { %2303 = vmatprep.subr.bf16.mxu0 %v2439_v9  ;;  %2394 = vmatprep.subr.bf16.mxu1 %v2439_v9  ;;  %v2447_v62 = vld [vmem:[%s3423_s8 + $0x78] sm:$0xff]  }
  0xe1   : > { %1111 = vrot.lane.b32.xlu0 %v1096_v20, %s2460_s23  ;;  %v1017_v20 = vor.u32 %v3451_v12, %v3019_v25  ;;  %v2448_v12 = vld [vmem:[%s3423_s8 + $0x38] sm:$0xff]  }
  0xe2   : > { %2304 = vmatpush3.bf16.msra.mxu0 %v2440_v41 }
  0xe3   : > { %1255 = vrot.lane.b32.xlu1 %v2735_v24, %s2460_s23  ;;  %v3015_v24 = vsel %vm994_vm3, %v1033_v45, %v1037_v4  ;;  %v1022_v36 = vsel %vm994_vm3, %v1017_v20, %v2925_v30  ;;  %2402 = vmatpush3.bf16.msra.mxu1 %v2440_v41  ;;  %v1046_v30 = vsel %vm994_vm3, %v1041_v38, %v2953_v56 }
  0xe4   : > { %2305 = vmatprep.subr.bf16.mxu0 %v2441_v63  ;;  %2395 = vmatprep.subr.bf16.mxu1 %v2441_v63  ;;  %v1098_v56 = vsel %vm1093_vm2, %v1095_v60, %v1097_v31  ;;  %v2446_v31 = vld [vmem:[%s3423_s8 + $0x30] sm:$0xff]   ;;  %v1007_v60 = vshrl.u32 %v2668_v2, 16 }
  0xe5   : > { %1148 = vrot.lane.b32.xlu0 %v1133_v48, %s2462_s14  ;;  %v996_v48 = vshrl.u32 %v2670_v3, 16 }
  0xe6   : > { %2306 = vmatpush3.bf16.msra.mxu0 %v2442_v57 }
  0xe7   : > { %1280 = vrot.lane.b32.xlu1 %v3015_v24, %s2462_s14  ;;  %2403 = vmatpush3.bf16.msra.mxu1 %v2442_v57 }
  0xe8   : > { %2307 = vmatprep.subr.bf16.mxu0 %v2443_v32  ;;  %2396 = vmatprep.subr.bf16.mxu1 %v2443_v32 }
  0xe9   : > { %1238 = vrot.lane.b32.xlu0 %v2768_v14, %s2461_s27  ;;  %v1000_v14 = vrot.slane %v998_v40, 1  ;;  %v1211_v40 = vsel %vm1204_vm1, %v1208_v52, %v1210_v39 }
  0xea   : > { %2308 = vmatpush3.bf16.msra.mxu0 %v2444_v26 }
  0xeb   : > { %1080 = vrot.lane.b32.xlu1 %v3036_v18, %s2461_s27  ;;  %v1001_v45 = vor.u32 %v1000_v14, %v996_v48  ;;  %2404 = vmatpush3.bf16.msra.mxu1 %v2444_v26  ;;  %v3117_v14 = vld [vmem:[%s3423_s8 + $0x80] sm:$0xff]  }
  0xec   : > { %2309 = vmatprep.subr.bf16.mxu0 %v2445_v7  ;;  %2397 = vmatprep.subr.bf16.mxu1 %v2445_v7 }
  0xed   : > { %1290 = vrot.lane.b32.xlu0 %v2783_v61, %s2462_s14  ;;  %v1003_v61 = vshll.u32 %v2668_v2, 16 }
  0xee   : > { %2310 = vmatpush3.bf16.msra.mxu0 %v2446_v31 }
  0xef   : > { %1070 = vrot.lane.b32.xlu1 %v1022_v36, %s2461_s27  ;;  %v1005_v4 = vrot.slane %v1003_v61, 1  ;;  %2405 = vmatpush3.bf16.msra.mxu1 %v2446_v31 }
  0xf0   : > { %2311 = vmatprep.subr.bf16.mxu0 %v2447_v62  ;;  %2398 = vmatprep.subr.bf16.mxu1 %v2447_v62 }
  0xf1   : > { %1294 = vrot.lane.b32.xlu0 %v1277_v17, %s2462_s14  ;;  %v1006_v42 = vsel %vm994_vm3, %v1001_v45, %v1005_v4  ;;  %v1009_v52 = vor.u32 %v1007_v60, %v1005_v4 }
  0xf2   : > { %2312 = vmatpush3.bf16.msra.mxu0 %v2448_v12 }
  0xf3   : > { %1282 = vrot.lane.b32.xlu1 %v1046_v30, %s2462_s14  ;;  %v1014_v20 = vsel %vm994_vm3, %v1009_v52, %v3019_v25  ;;  %2406 = vmatpush3.bf16.msra.mxu1 %v2448_v12  ;;  %v3452_v25 = vrot.slane %v2689_v46, 5 }
  0xf4   : > { %2371 = vmatprep.subr.bf16.mxu1 %v3117_v14 }
  0xf5   : > { %1066 = vrot.lane.b32.xlu0 %v1006_v42, %s2461_s27  ;;  %v1213_v6 = vsel %vm1204_vm1, %v1210_v39, %v3452_v25 }
  0xf7   : > { %1113 = vrot.lane.b32.xlu1 %v1098_v56, %s2460_s23 }
  0xf9   : > { %1228 = vrot.lane.b32.xlu0 %v1211_v40, %s2461_s27 }
  0xfb   : > { %1072 = vrot.lane.b32.xlu1 %v2957_v16, %s2461_s27  ;;  %v1101_v16 = vrot.slane %v2638_v33, 1 }
  0xfd   : > { %1247 = vrot.lane.b32.xlu0 %v2689_v46, %s2460_s23 }
  0xff   : > { %1068 = vrot.lane.b32.xlu1 %v1014_v20, %s2461_s27 }
 0x101   : > { %1284 = vrot.lane.b32.xlu0 %v2975_v22, %s2462_s14  ;;  %v3127_v22 = vsel %vm1093_vm2, %v1099_v28, %v1101_v16  ;;  %v3453_v28 = vrot.slane %v2718_v23, 1 }
 0x103   : > { %1292 = vrot.lane.b32.xlu1 %v2858_v21, %s2462_s14  ;;  %v1138_v21 = vrot.slane %v2718_v23, 4  ;;  %v3147_v41 = vsel %vm1093_vm2, %v1101_v16, %v3453_v28 }
 0x105   : > { %1230 = vrot.lane.b32.xlu0 %v1213_v6, %s2461_s27  ;;  %v1139_v9 = vsel %vm1130_vm4, %v1136_v43, %v1138_v21  ;;  %v1141_v43 = vsel %vm1130_vm4, %v1138_v21, %v1140_v49 }
 0x107   : > { %1117 = vrot.lane.b32.xlu1 %v3127_v22, %s2460_s23 }
 0x109   : > { %1249 = vrot.lane.b32.xlu0 %v2694_v58, %s2460_s23 }
 0x10b   : > { %1154 = vrot.lane.b32.xlu1 %v1139_v9, %s2462_s14  ;;  %v1244_v36 = vpop.permute.xlu1 %1243 }
 0x10d   : > { %1286 = vrot.lane.b32.xlu0 %v3036_v18, %s2462_s14 }
 0x10f   : > { %1074 = vrot.lane.b32.xlu1 %v3015_v24, %s2461_s27 }
 0x111   : > { %1232 = vrot.lane.b32.xlu0 %v2707_v13, %s2461_s27  ;;  %v1242_v13 = vpop.permute.xlu0 %1241 }
 0x113   : > { %1119 = vrot.lane.b32.xlu1 %v3147_v41, %s2460_s23 }
 0x115   : > { %1251 = vrot.lane.b32.xlu0 %v2763_v11, %s2460_s23 }
 0x117   : > { %1156 = vrot.lane.b32.xlu1 %v1141_v43, %s2462_s14 }
 0x119   : > { %1288 = vrot.lane.b32.xlu0 %v2835_v29, %s2462_s14 }
 0x11b   : > { %1076 = vrot.lane.b32.xlu1 %v1046_v30, %s2461_s27 }
 0x11f   : > { %1121 = vrot.lane.b32.xlu1 %v2776_v35, %s2460_s23 }
 0x123   : > { %1158 = vrot.lane.b32.xlu1 %v2843_v44, %s2462_s14 }
 0x127   : > { %v1254_v24 = vpop.permute.xlu0 %1253 }
 0x12b   : > { %v1246_v18 = vpop.permute.xlu0 %1245 }
 0x12f   : > { %v1223_v38 = vpop.permute.xlu0 %1222 }
 0x130   : > { %v1361_v52 = vsel %vm1302_vm6, %v2846_v55, %v1223_v38 }
 0x131   : > { %v1128_v48 = vpop.permute.xlu1 %1127 }
 0x133   : > { %v1235_v49 = vpop.permute.xlu0 %1234 }
 0x134   : > { %v1379_v61 = vsel %vm1302_vm6, %v2876_v34, %v1235_v49 }
 0x135   : > { %v1165_v29 = vpop.permute.xlu1 %1164  ;;  %v3167_v63 = vsel %vm1321_vm7, %v1379_v61, %v1254_v24 }
 0x137   : > { %v1124_v17 = vpop.permute.xlu0 %1123 }
 0x139   : > { %v1225_v45 = vpop.permute.xlu1 %1224 }
 0x13a   : > { %v1364_v6 = vsel %vm1302_vm6, %v2863_v59, %v1225_v45 }
 0x13b   : > { %v1161_v57 = vpop.permute.xlu0 %1160  ;;  %v1389_v24 = vsel %vm1321_vm7, %v1364_v6, %v1244_v36 }
 0x13d   : > { %v3169_v30 = vpop.permute.xlu1 %1236 }
 0x13f   : > { %v1227_v44 = vpop.permute.xlu0 %1226 }
 0x140   : > { %v1367_v4 = vsel %vm1302_vm6, %v2676_v10, %v1227_v44 }
 0x141   : > { %v3173_v32 = vpop.permute.xlu1 %1150  ;;  %v1391_v42 = vsel %vm1321_vm7, %v1367_v4, %v1246_v18 }
 0x143   : > { %v1083_v34 = vpop.permute.xlu0 %1082 }
 0x144   : > { %v1320_v39 = vsel %vm1302_vm6, %v2763_v11, %v1083_v34  ;;  %v1387_v11 = vsel %vm1321_vm7, %v1361_v52, %v1242_v13 }
 0x145   : > { %v1339_v26 = vsel %vm1321_vm7, %v1320_v39, %v1128_v48  ;;  %v1126_v56 = vpop.permute.xlu1 %1125 }
 0x146   : > { %v3180_v40 = vsel %vm1340_vm8, %v1339_v26, %v1165_v29 }
 0x147   : > { %v3182_v7 = vpop.permute.xlu0 %1257 }
 0x149   : > { %v1163_v31 = vpop.permute.xlu1 %1162 }
 0x14b   : > { %v1279_v60 = vpop.permute.xlu0 %1278 }
 0x14c   : > { %v1405_v16 = vsel %vm1340_vm8, %v1387_v11, %v1279_v60 }
 0x14d   : > { %v3184_v10 = vpop.permute.xlu1 %1115  ;;  %v1474_v9 = vshrl.u32 %v1405_v16, 16  ;;  %v1477_v28 = vshll.u32 %v1405_v16, 16 }
 0x14f   : > { %v1079_v62 = vpop.permute.xlu0 %1078  ;;  %v1476_v49 = vrot.slane %v1474_v9, 3  ;;  %v1479_v13 = vrot.slane %v1477_v28, 4 }
 0x150   : > { %v1316_v26 = vsel %vm1302_vm6, %v2689_v46, %v1079_v62 }
 0x151   : > { %v3188_v12 = vpop.permute.xlu1 %1152  ;;  %v1480_v39 = vor.u32 %v1479_v13, %v1476_v49  ;;  %v1335_v11 = vsel %vm1321_vm7, %v1316_v26, %v1124_v17 }
 0x152   : > { %v3209_v46 = vsel %vm1340_vm8, %v1335_v11, %v1161_v57 }
 0x153   : > { %v1112_v20 = vpop.permute.xlu0 %1111 }
 0x155   : > { %v3192_v25 = vpop.permute.xlu1 %1255 }
 0x157   : > { %v1149_v21 = vpop.permute.xlu0 %1148 }
 0x159   : > { %v1281_v43 = vpop.permute.xlu1 %1280 }
 0x15a   : > { %v1407_v55 = vsel %vm1340_vm8, %v1389_v24, %v1281_v43 }
 0x15b   : > { %v1481_v18 = vshrl.u32 %v1407_v55, 16  ;;  %v1484_v38 = vshll.u32 %v1407_v55, 16  ;;  %v1239_v48 = vpop.permute.xlu0 %1238 }
 0x15c   : > { %v1385_v57 = vsel %vm1302_vm6, %v2878_v50, %v1239_v48  ;;  %v1609_v48 = vshll.u32 %v3209_v46, 16 }
 0x15d   : > { %v1483_v61 = vrot.slane %v1481_v18, 3  ;;  %v1486_v29 = vrot.slane %v1484_v38, 4  ;;  %v1081_v44 = vpop.permute.xlu1 %1080 }
 0x15e   : > { %v1318_v60 = vsel %vm1302_vm6, %v2694_v58, %v1081_v44  ;;  %v1490_v58 = vshrl.u32 %v3127_v22, 16 }
 0x15f   : > { %v1291_v4 = vpop.permute.xlu0 %1290  ;;  %v1487_v34 = vor.u32 %v1486_v29, %v1483_v61  ;;  %v1337_v6 = vsel %vm1321_vm7, %v1318_v60, %v1126_v56 }
 0x160   : > { %v1356_v17 = vsel %vm1340_vm8, %v1337_v6, %v1163_v31  ;;  %v1417_v56 = vsel %vm1340_vm8, %v3167_v63, %v1291_v4  ;;  %v1493_v4 = vshll.u32 %v3127_v22, 16 }
 0x161   : > { %v1071_v59 = vpop.permute.xlu1 %1070  ;;  %v1488_v45 = vsel %vm1458_vm5, %v1480_v39, %v1487_v34  ;;  %v1631_v61 = vshrl.u32 %v1356_v17, 16  ;;  %v1634_v29 = vshll.u32 %v1356_v17, 16  ;;  %v1498_v39 = vshrl.u32 %v3147_v41, 16 }
 0x162   : > { %1861 = vmatprep.mubr.bf16.mxu0 %v1488_v45  ;;  %v1308_v13 = vsel %vm1302_vm6, %v2698_v8, %v1071_v59  ;;  %v1614_v50 = vshrl.u32 %v1417_v56, 16  ;;  %v1382_v8 = vsel %vm1302_vm6, %v2903_v53, %v3169_v30  ;;  %v1617_v30 = vshll.u32 %v1417_v56, 16 }
 0x163   : > { %v1295_v36 = vpop.permute.xlu0 %1294  ;;  %v1401_v11 = vsel %vm1321_vm7, %v1382_v8, %v3192_v25  ;;  %v1636_v53 = vrot.slane %v1634_v29, 4 }
 0x165   : > { %v1283_v52 = vpop.permute.xlu1 %1282 }
 0x166   : > { %v1409_v16 = vsel %vm1340_vm8, %v1391_v42, %v1283_v52 }
 0x167   : > { %v1514_v9 = vshrl.u32 %v1409_v16, 16  ;;  %v1517_v28 = vshll.u32 %v1409_v16, 16  ;;  %v1067_v43 = vpop.permute.xlu0 %1066  ;;  %v1633_v16 = vrot.slane %v1631_v61, 3 }
 0x168   : > { %v1304_v24 = vsel %vm1302_vm6, %v2670_v3, %v1067_v43  ;;  %v1606_v3 = vshrl.u32 %v3209_v46, 16 }
 0x169   : > { %v1516_v62 = vrot.slane %v1514_v9, 3  ;;  %v1519_v55 = vrot.slane %v1517_v28, 4  ;;  %v1114_v18 = vpop.permute.xlu1 %1113  ;;  %v1323_v42 = vsel %vm1321_vm7, %v1304_v24, %v1112_v20  ;;  %v3230_v20 = vrot.slane %v1490_v58, 3 }
 0x16a   : > { %v1342_v31 = vsel %vm1340_vm8, %v1323_v42, %v1149_v21  ;;  %v1327_v21 = vsel %vm1321_vm7, %v1308_v13, %v3184_v10  ;;  %v3242_v45 = vrot.slane %v1606_v3, 3  ;;  %v1616_v9 = vrot.slane %v1614_v50, 3 }
 0x16b   : > { %v3216_v38 = vor.u32 %v1519_v55, %v1516_v62  ;;  %v1229_v49 = vpop.permute.xlu0 %1228  ;;  %v1459_v60 = vshrl.u32 %v1342_v31, 16  ;;  %v1462_v52 = vshll.u32 %v1342_v31, 16  ;;  %v1346_v10 = vsel %vm1340_vm8, %v1327_v21, %v3188_v12 }
 0x16c   : > { %v1506_v3 = vshrl.u32 %v1346_v10, 16 }
 0x16d   : > { %v3224_v44 = vpop.permute.xlu1 %1072  ;;  %v3228_v63 = vsel %vm1458_vm5, %v1487_v34, %v3216_v38  ;;  %v1403_v34 = vsel %vm1321_vm7, %v1385_v57, %v3182_v7  ;;  %v1370_v7 = vsel %vm1302_vm6, %v2895_v5, %v1229_v49  ;;  %v1461_v62 = vrot.slane %v1459_v60, 3 }
 0x16e   : > { %v1421_v26 = vsel %vm1340_vm8, %v1403_v34, %v1295_v36  ;;  %v1464_v55 = vrot.slane %v1462_v52, 4  ;;  %v1509_v57 = vshll.u32 %v1346_v10, 16 }
 0x16f   : > { %v1248_v59 = vpop.permute.xlu0 %1247  ;;  %v1664_v36 = vshrl.u32 %v1421_v26, 16  ;;  %v1667_v43 = vshll.u32 %v1421_v26, 16 }
 0x170   : > { %v1393_v24 = vsel %vm1321_vm7, %v1370_v7, %v1248_v59  ;;  %v1611_v59 = vrot.slane %v1609_v48, 4  ;;  %v1465_v52 = vor.u32 %v1464_v55, %v1461_v62  ;;  %v1310_v62 = vsel %vm1302_vm6, %v2628_v15, %v3224_v44 }
 0x171   : > { %v1069_v6 = vpop.permute.xlu1 %1068  ;;  %v1666_v8 = vrot.slane %v1664_v36, 3  ;;  %v1669_v21 = vrot.slane %v1667_v43, 4  ;;  %v1637_v36 = vor.u32 %v1636_v53, %v1633_v16  ;;  %v1511_v43 = vrot.slane %v1509_v57, 4 }
 0x172   : > { %v1306_v28 = vsel %vm1302_vm6, %v2668_v2, %v1069_v6  ;;  %v1619_v2 = vrot.slane %v1617_v30, 4  ;;  %v1501_v30 = vshll.u32 %v3147_v41, 16  ;;  %v3276_v53 = vor.u32 %v1611_v59, %v3242_v45 }
 0x173   : > { %v1325_v25 = vsel %vm1321_vm7, %v1306_v28, %v1114_v18  ;;  %v1285_v46 = vpop.permute.xlu0 %1284  ;;  %v1508_v28 = vrot.slane %v1506_v3, 3  ;;  %v1526_v41 = vshll.u32 %v2776_v35, 16 }
 0x174   : > { %v1344_v58 = vsel %vm1340_vm8, %v1325_v25, %v3173_v32  ;;  %v1411_v12 = vsel %vm1340_vm8, %v1393_v24, %v1285_v46  ;;  %v1670_v46 = vor.u32 %v1669_v21, %v1666_v8 }
 0x175   : > { %v1466_v17 = vshrl.u32 %v1344_v58, 16  ;;  %v1469_v42 = vshll.u32 %v1344_v58, 16  ;;  %v1539_v5 = vshrl.u32 %v1411_v12, 16  ;;  %v1542_v56 = vshll.u32 %v1411_v12, 16  ;;  %v1293_v49 = vpop.permute.xlu1 %1292 }
 0x176   : > { %v1419_v13 = vsel %vm1340_vm8, %v1401_v11, %v1293_v49  ;;  %v3262_v11 = vor.u32 %v1619_v2, %v1616_v9  ;;  %v1656_v9 = vshrl.u32 %v3180_v40, 16  ;;  %v1659_v58 = vshll.u32 %v3180_v40, 16  ;;  %v2450_v40 = vld [vmem:[%s3423_s8 + $0x88] sm:$0xff]  }
 0x177   : > { %v1468_v61 = vrot.slane %v1466_v17, 3  ;;  %v1471_v18 = vrot.slane %v1469_v42, 4  ;;  %v1541_v29 = vrot.slane %v1539_v5, 3  ;;  %v1544_v31 = vrot.slane %v1542_v56, 4  ;;  %v1231_v50 = vpop.permute.xlu0 %1230 }
 0x178   : > { %v1639_v32 = vshrl.u32 %v1419_v13, 16  ;;  %v1642_v34 = vshll.u32 %v1419_v13, 16  ;;  %v1500_v56 = vrot.slane %v1498_v39, 3  ;;  %v1503_v49 = vrot.slane %v1501_v30, 4 }
 0x179   : > { %v3259_v26 = vor.u32 %v1544_v31, %v1541_v29  ;;  %v1118_v60 = vpop.permute.xlu1 %1117  ;;  %v1472_v6 = vor.u32 %v1471_v18, %v1468_v61  ;;  %v1512_v3 = vor.u32 %v1511_v43, %v1508_v28  ;;  %v1658_v57 = vrot.slane %v1656_v9, 3 }
 0x17a   : > { %v1641_v10 = vrot.slane %v1639_v32, 3  ;;  %v1644_v7 = vrot.slane %v1642_v34, 4  ;;  %v1329_v12 = vsel %vm1321_vm7, %v1310_v62, %v1118_v60  ;;  %v1661_v13 = vrot.slane %v1659_v58, 4 }
 0x17b   : > { %v1250_v24 = vpop.permute.xlu0 %1249  ;;  %v1473_v25 = vsel %vm1458_vm5, %v1465_v52, %v1472_v6  ;;  %v1546_v48 = vsel %vm1458_vm5, %v3216_v38, %v3259_v26  ;;  %v1373_v38 = vsel %vm1302_vm6, %v2912_v54, %v1231_v50  ;;  %v1638_v54 = vsel %vm1458_vm5, %v3276_v53, %v1637_v36 }
 0x17c   : > { %1862 = vmatmul.mubr.bf16.vlgmr.msra.gmra.mrb[0].mxu0 %v1473_v25  ;;  %v1645_v55 = vor.u32 %v1644_v7, %v1641_v10  ;;  %v1495_v31 = vrot.slane %v1493_v4, 4  ;;  %v1523_v50 = vshrl.u32 %v2776_v35, 16  ;;  %v1513_v39 = vsel %vm1458_vm5, %v1472_v6, %v1512_v3 }
 0x17d   : > { %1869 = vmatprep.mubr.bf16.mxu0 %v3228_v63  ;;  %v1155_v16 = vpop.permute.xlu1 %1154  ;;  %v1395_v63 = vsel %vm1321_vm7, %v1373_v38, %v1250_v24  ;;  %v1504_v60 = vor.u32 %v1503_v49, %v1500_v56  ;;  %v1662_v30 = vor.u32 %v1661_v13, %v1658_v57  ;;  %v1528_v10 = vrot.slane %v1526_v41, 4 }
 0x17e   : > { %v1348_v17 = vsel %vm1340_vm8, %v1329_v12, %v1155_v16  ;;  %v1646_v15 = vsel %vm1458_vm5, %v3262_v11, %v1645_v55  ;;  %v1671_v44 = vsel %vm1458_vm5, %v1645_v55, %v1670_v46  ;;  %v1496_v22 = vor.u32 %v1495_v31, %v3230_v20 }
 0x17f   : > { %v1531_v42 = vshrl.u32 %v1348_v17, 16  ;;  %v1534_v5 = vshll.u32 %v1348_v17, 16  ;;  %1909 = vmatprep.mubr.bf16.mxu1 %v1646_v15  ;;  %v1287_v45 = vpop.permute.xlu0 %1286  ;;  %v1525_v4 = vrot.slane %v1523_v50, 3  ;;  %v1663_v6 = vsel %vm1458_vm5, %v1637_v36, %v1662_v30 }
 0x180   : > { %v1413_v2 = vsel %vm1340_vm8, %v1395_v63, %v1287_v45  ;;  %1910 = vmatmul.mubr.bf16.vlgmr.msra.gmra.mrb[0].mxu1 %v1638_v54  ;;  %v1505_v25 = vsel %vm1458_vm5, %v1496_v22, %v1504_v60 }
 0x181   : > { %v1564_v61 = vshrl.u32 %v1413_v2, 16  ;;  %v1567_v18 = vshll.u32 %v1413_v2, 16  ;;  %1917 = vmatprep.mubr.bf16.mxu1 %v1671_v44  ;;  %2372 = vmatpush3.bf16.msra.mxu1 %v3117_v14  ;;  %v1075_v29 = vpop.permute.xlu1 %1074  ;;  %v1533_v8 = vrot.slane %v1531_v42, 3  ;;  %v1536_v21 = vrot.slane %v1534_v5, 4 }
 0x182   : > { %2373 = vmatprep.subr.bf16.mxu1 %v2450_v40  ;;  %v1312_v24 = vsel %vm1302_vm6, %v2638_v33, %v1075_v29  ;;  %v1529_v43 = vor.u32 %v1528_v10, %v1525_v4 }
 0x183   : > { %v1566_v32 = vrot.slane %v1564_v61, 3  ;;  %v1569_v34 = vrot.slane %v1567_v18, 4  ;;  %v1233_v59 = vpop.permute.xlu0 %1232  ;;  %v1537_v35 = vor.u32 %v1536_v21, %v1533_v8 }
 0x184   : > { %1870 = vmatmul.mubr.bf16.gmra.mrb[4].mxu0 %v1513_v39  ;;  %v1376_v46 = vsel %vm1302_vm6, %v2915_v27, %v1233_v59  ;;  %v1530_v63 = vsel %vm1458_vm5, %v1504_v60, %v1529_v43  ;;  %v1555_v42 = vsel %vm1458_vm5, %v1529_v43, %v2869_v0 }
 0x185   : > { %v1570_v52 = vor.u32 %v1569_v34, %v1566_v32  ;;  %1877 = vmatprep.mubr.bf16.mxu0 %v1546_v48  ;;  %v1120_v14 = vpop.permute.xlu1 %1119  ;;  %2374 = vmatpush3.bf16.msra.mxu1 %v2450_v40  ;;  %v1538_v33 = vsel %vm1458_vm5, %v1512_v3, %v1537_v35 }
 0x186   : > { %v1331_v48 = vsel %vm1321_vm7, %v1312_v24, %v1120_v14 }
 0x187   : > { %v1252_v7 = vpop.permute.xlu0 %1251  ;;  %v1571_v28 = vsel %vm1458_vm5, %v3259_v26, %v1570_v52 }
 0x188   : > { %1918 = vmatmul.mubr.bf16.gmra.mrb[4].mxu1 %v1663_v6  ;;  %v1397_v62 = vsel %vm1321_vm7, %v1376_v46, %v1252_v7 }
 0x189   : > { %2375 = vmatprep.mubr.msk.bf16.mxu1 %vm1302_vm6, %v1505_v25  ;;  %v1157_v20 = vpop.permute.xlu1 %1156 }
 0x18a   : > { %v1350_v36 = vsel %vm1340_vm8, %v1331_v48, %v1157_v20 }
 0x18b   : > { %v1556_v26 = vshrl.u32 %v1350_v36, 16  ;;  %v1559_v55 = vshll.u32 %v1350_v36, 16  ;;  %v1289_v9 = vpop.permute.xlu0 %1288  ;;  %v2025_v36 = vld [vmem:[%s3352_s18 + $0x10] sm:$0xff] }
 0x18c   : > { %v1415_v58 = vsel %vm1340_vm8, %v1397_v62, %v1289_v9  ;;  %1878 = vmatmul.mubr.bf16.gmra.mrb[8].mxu0 %v1538_v33 }
 0x18d   : > { %v1558_v12 = vrot.slane %v1556_v26, 3  ;;  %v1561_v16 = vrot.slane %v1559_v55, 4  ;;  %v1589_v38 = vshrl.u32 %v1415_v58, 16  ;;  %v1592_v17 = vshll.u32 %v1415_v58, 16  ;;  %1885 = vmatprep.mubr.bf16.mxu0 %v1571_v28  ;;  %v1077_v15 = vpop.permute.xlu1 %1076  ;;  %v2023_v55 = vld [vmem:[%s3352_s18] sm:$0xff]  ;;  %v2026_v58 = vld [vmem:[%s3352_s18 + $0x18] sm:$0xff] }
 0x18e   : > { %v1314_v2 = vsel %vm1302_vm6, %v2718_v23, %v1077_v15 }
 0x18f   : > { %v1562_v44 = vor.u32 %v1561_v16, %v1558_v12  ;;  %v1591_v27 = vrot.slane %v1589_v38, 3  ;;  %v1594_v40 = vrot.slane %v1592_v17, 4  ;;  %v2024_v17 = vld [vmem:[%s3352_s18 + $0x8] sm:$0xff] }
 0x190   : > { %2376 = vmatmul.mubr.msk.bf16.vlgmr.msra.gmra.mrb[8].mxu1 %vm1302_vm6, %v1530_v63 }
 0x191   : > { %v1595_v5 = vor.u32 %v1594_v40, %v1591_v27  ;;  %2379 = vmatprep.mubr.msk.bf16.mxu1 %vm1302_vm6, %v1555_v42  ;;  %v1122_v45 = vpop.permute.xlu1 %1121  ;;  %v1563_v54 = vsel %vm1458_vm5, %v1537_v35, %v1562_v44 }
 0x192   : > { %v1333_v3 = vsel %vm1321_vm7, %v1314_v2, %v1122_v45  ;;  %v2029_v2 = vld [vmem:[%s3352_s18 + $0x30] sm:$0xff] }
 0x193   : > { %v1596_v56 = vsel %vm1458_vm5, %v1570_v52, %v1595_v5  ;;  %v1621_v49 = vsel %vm1458_vm5, %v1595_v5, %v3262_v11 }
 0x194   : > { %1886 = vmatmul.mubr.bf16.gmra.mrb[12].mxu0 %v1563_v54 }
 0x195   : > { %1893 = vmatprep.mubr.bf16.mxu0 %v1596_v56  ;;  %v1159_v57 = vpop.permute.xlu1 %1158 }
 0x196   : > { %v1352_v0 = vsel %vm1340_vm8, %v1333_v3, %v1159_v57 }
 0x197   : > { %v1581_v13 = vshrl.u32 %v1352_v0, 16  ;;  %v1584_v61 = vshll.u32 %v1352_v0, 16  ;;  %v2027_v0 = vld [vmem:[%s3352_s18 + $0x20] sm:$0xff] }
 0x198   : > { %2380 = vmatmul.mubr.msk.bf16.gmra.mrb[12].mxu1 %vm1302_vm6, %v2899_v19 }
 0x199   : > { %v1583_v18 = vrot.slane %v1581_v13, 3  ;;  %v1586_v29 = vrot.slane %v1584_v61, 4  ;;  %2383 = vmatprep.mubr.msk.bf16.mxu1 %vm1302_vm6, %v2919_v47 }
 0x19b   : > { %v1587_v11 = vor.u32 %v1586_v29, %v1583_v18  ;;  %v2030_v18 = vld [vmem:[%s3352_s18 + $0x38] sm:$0xff] }
 0x19d   : > { %v1588_v23 = vsel %vm1458_vm5, %v1562_v44, %v1587_v11  ;;  %v1613_v31 = vsel %vm1458_vm5, %v1587_v11, %v3276_v53 }
 0x19e   : > { %1894 = vmatmul.mubr.bf16.gmra.mrb[16].mxu0 %v1588_v23 }
 0x19f   : > { %1901 = vmatprep.mubr.bf16.mxu0 %v1621_v49 }
 0x1a0   : > { %2384 = vmatmul.mubr.msk.bf16.gmra.mrb[16].mxu1 %vm1302_vm6, %v2934_v51 }
 0x1a1   : > { %2387 = vmatprep.mubr.msk.bf16.mxu1 %vm1302_vm6, %v2937_v37 }
 0x1a6   : > { %1902 = vmatmul.mubr.bf16.gmra.mrb[20].mxu0 %v1613_v31  ;;  %v2028_v31 = vld [vmem:[%s3352_s18 + $0x28] sm:$0xff] }
 0x1a8   : > { %2388 = vmatmul.mubr.msk.bf16.gmra.mrb[20].mxu1 %vm1302_vm6, %v2940_v1 }
 0x24f   : > { %v2313_v19 = vpop.f32.mrb[0].mxu0 }
 0x250   : > { %v2314_v47 = vpop.f32.mrb[1].mxu0 }
 0x251   : > { %v2315_v50 = vadd.f32 %v2314_v47, %v2313_v19  ;;  %v2316_v41 = vpop.f32.mrb[2].mxu0 }
 0x252   : > { %v2317_v39 = vpop.f32.mrb[3].mxu0 }
 0x253   : > { %v2318_v8 = vadd.f32 %v2317_v39, %v2316_v41  ;;  %v2349_v21 = vpop.f32.mrb[0].mxu1 }
 0x254   : > { %v2350_v32 = vpop.f32.mrb[1].mxu1 }
 0x255   : > { %v3340_v34 = vadd.f32 %v2350_v32, %v2349_v21  ;;  %v2352_v51 = vpop.f32.mrb[2].mxu1 }
 0x256   : > { %v2353_v59 = vpop.f32.mrb[3].mxu1 }
 0x257   : > { %v3342_v37 = vadd.f32 %v2353_v59, %v2352_v51  ;;  %v2319_v53 = vpop.f32.mrb[4].mxu0 }
 0x258   : > { %v2320_v60 = vpop.f32.mrb[5].mxu0 }
 0x259   : > { %v2321_v52 = vadd.f32 %v2320_v60, %v2319_v53  ;;  %v2322_v14 = vpop.f32.mrb[6].mxu0  ;;  %v2031_v53 = vld [vmem:[%s3352_s18 + $0x40] sm:$0xff] }
 0x25a   : > { %v2323_v1 = vpop.f32.mrb[7].mxu0 }
 0x25b   : > { %v2324_v30 = vadd.f32 %v2323_v1, %v2322_v14  ;;  %v2355_v22 = vpop.f32.mrb[4].mxu1 }
 0x25c   : > { %v2356_v4 = vpop.f32.mrb[5].mxu1 }
 0x25d   : > { %v3344_v10 = vadd.f32 %v2356_v4, %v2355_v22  ;;  %v2358_v35 = vpop.f32.mrb[6].mxu1  ;;  %v2032_v22 = vld [vmem:[%s3352_s18 + $0x48] sm:$0xff] }
 0x25e   : > { %v2359_v7 = vpop.f32.mrb[7].mxu1 }
 0x25f   : > { %v3346_v6 = vadd.f32 %v2359_v7, %v2358_v35  ;;  %v2325_v28 = vpop.f32.mrb[8].mxu0 }
 0x260   : > { %v2326_v24 = vpop.f32.mrb[9].mxu0 }
 0x261   : > { %v2327_v25 = vadd.f32 %v2326_v24, %v2325_v28  ;;  %v2328_v48 = vpop.f32.mrb[10].mxu0 }
 0x262   : > { %v2329_v20 = vpop.f32.mrb[11].mxu0 }
 0x263   : > { %v2330_v43 = vadd.f32 %v2329_v20, %v2328_v48  ;;  %v2377_v46 = vpop.f32.mrb[8].mxu1  ;;  %v2037_v20 = vld [vmem:[%s3352_s18 + $0x70] sm:$0xff] }
 0x264   : > { %v1969_v62 = vadd.f32 %v2377_v46, %v2321_v52  ;;  %v1960_v26 = vpop.f32.mrb[9].mxu1  ;;  %v2033_v46 = vld [vmem:[%s3352_s18 + $0x50] sm:$0xff] }
 0x265   : > { %v1961_v9 = vadd.f32 %v2315_v50, %v1960_v26  ;;  %v2378_v33 = vpop.f32.mrb[10].mxu1  ;;  %v2035_v26 = vld [vmem:[%s3352_s18 + $0x60] sm:$0xff] }
 0x266   : > { %v2041_v12 = vsub.f32 %v2025_v36, %v1969_v62  ;;  %v1972_v16 = vadd.f32 %v2378_v33, %v2324_v30  ;;  %v1963_v38 = vpop.f32.mrb[11].mxu1 }
 0x267   : > { %v2039_v15 = vsub.f32 %v2023_v55, %v1961_v9  ;;  %v1964_v44 = vadd.f32 %v2318_v8, %v1963_v38  ;;  %v2331_v27 = vpop.f32.mrb[12].mxu0 }
 0x268   : > { %2058 = vst.msk [vmem:[%s3360_s25 + $0x10] sm:$0xff] %vm2055_vm9, %v2041_v12  ;;  %v2042_v40 = vsub.f32 %v2026_v58, %v1972_v16  ;;  %v2332_v63 = vpop.f32.mrb[13].mxu0  ;;  %v2038_v16 = vld [vmem:[%s3352_s18 + $0x78] sm:$0xff] }
 0x269   : > { %2056 = vst.msk [vmem:[%s3360_s25] sm:$0xff] %vm2055_vm9, %v2039_v15  ;;  %v2040_v42 = vsub.f32 %v2024_v17, %v1964_v44  ;;  %v2333_v5 = vadd.f32 %v2332_v63, %v2331_v27  ;;  %v2334_v45 = vpop.f32.mrb[14].mxu0  ;;  %v2034_v17 = vld [vmem:[%s3352_s18 + $0x58] sm:$0xff]  ;;  %v2036_v44 = vld [vmem:[%s3352_s18 + $0x68] sm:$0xff] }
 0x26a   : > { %2059 = vst.msk [vmem:[%s3360_s25 + $0x18] sm:$0xff] %vm2055_vm9, %v2042_v40  ;;  %v2335_v54 = vpop.f32.mrb[15].mxu0 }
 0x26b   : > { %2057 = vst.msk [vmem:[%s3360_s25 + $0x8] sm:$0xff] %vm2055_vm9, %v2040_v42  ;;  %v2336_v56 = vadd.f32 %v2335_v54, %v2334_v45  ;;  %v2381_v49 = vpop.f32.mrb[12].mxu1 }
 0x26c   : > { %v1985_v3 = vadd.f32 %v2381_v49, %v2333_v5  ;;  %v1976_v57 = vpop.f32.mrb[13].mxu1 }
 0x26d   : > { %v1977_v13 = vadd.f32 %v2327_v25, %v1976_v57  ;;  %v2382_v61 = vpop.f32.mrb[14].mxu1 }
 0x26e   : > { %v2045_v29 = vsub.f32 %v2029_v2, %v1985_v3  ;;  %v1988_v11 = vadd.f32 %v2382_v61, %v2336_v56  ;;  %v1979_v23 = vpop.f32.mrb[15].mxu1 }
 0x26f   : > { %v2043_v19 = vsub.f32 %v2027_v0, %v1977_v13  ;;  %v1980_v47 = vadd.f32 %v2330_v43, %v1979_v23 }
 0x270   : > { %2062 = vst.msk [vmem:[%s3360_s25 + $0x30] sm:$0xff] %vm2055_vm9, %v2045_v29  ;;  %v2046_v50 = vsub.f32 %v2030_v18, %v1988_v11 }
 0x271   : > { %2060 = vst.msk [vmem:[%s3360_s25 + $0x20] sm:$0xff] %vm2055_vm9, %v2043_v19  ;;  %v2044_v41 = vsub.f32 %v2028_v31, %v1980_v47  ;;  %v2337_v39 = vpop.f32.mrb[16].mxu0 }
 0x272   : > { %2063 = vst.msk [vmem:[%s3360_s25 + $0x38] sm:$0xff] %vm2055_vm9, %v2046_v50  ;;  %v2338_v8 = vpop.f32.mrb[17].mxu0 }
 0x273   : > { %2061 = vst.msk [vmem:[%s3360_s25 + $0x28] sm:$0xff] %vm2055_vm9, %v2044_v41  ;;  %v2339_v21 = vadd.f32 %v2338_v8, %v2337_v39  ;;  %v2385_v32 = vpop.f32.mrb[16].mxu1  ;;  %v2340_v51 = vpop.f32.mrb[18].mxu0 }
 0x274   : > { %v1992_v59 = vpop.f32.mrb[17].mxu1  ;;  %v2341_v60 = vpop.f32.mrb[19].mxu0 }
 0x275   : > { %v1993_v52 = vadd.f32 %v2339_v21, %v1992_v59  ;;  %v2342_v14 = vadd.f32 %v2341_v60, %v2340_v51  ;;  %v2386_v1 = vpop.f32.mrb[18].mxu1 }
 0x276   : > { %v1995_v30 = vpop.f32.mrb[19].mxu1 }
 0x277   : > { %v2047_v4 = vsub.f32 %v2031_v53, %v1993_v52  ;;  %v1996_v35 = vadd.f32 %v2342_v14, %v1995_v30 }
 0x279   : > { %2064 = vst.msk [vmem:[%s3360_s25 + $0x40] sm:$0xff] %vm2055_vm9, %v2047_v4  ;;  %v2048_v7 = vsub.f32 %v2032_v22, %v1996_v35  ;;  %v2343_v28 = vpop.f32.mrb[20].mxu0 }
 0x27a   : > { %v2344_v24 = vpop.f32.mrb[21].mxu0 }
 0x27b   : > { %2065 = vst.msk [vmem:[%s3360_s25 + $0x48] sm:$0xff] %vm2055_vm9, %v2048_v7  ;;  %v2345_v25 = vadd.f32 %v2344_v24, %v2343_v28  ;;  %v2389_v48 = vpop.f32.mrb[20].mxu1  ;;  %v2346_v43 = vpop.f32.mrb[22].mxu0 }
 0x27c   : > { %v2017_v36 = vadd.f32 %v2389_v48, %v3344_v10  ;;  %v2008_v62 = vpop.f32.mrb[21].mxu1  ;;  %v2347_v55 = vpop.f32.mrb[23].mxu0 }
 0x27d   : > { %v2001_v9 = vadd.f32 %v2385_v32, %v2345_v25  ;;  %v2009_v33 = vadd.f32 %v3340_v34, %v2008_v62  ;;  %v2348_v58 = vadd.f32 %v2347_v55, %v2346_v43  ;;  %v2390_v12 = vpop.f32.mrb[22].mxu1 }
 0x27e   : > { %v2053_v38 = vsub.f32 %v2037_v20, %v2017_v36  ;;  %v2020_v15 = vadd.f32 %v2390_v12, %v3346_v6  ;;  %v2011_v10 = vpop.f32.mrb[23].mxu1 }
 0x27f   : > { %v2049_v27 = vsub.f32 %v2033_v46, %v2001_v9  ;;  %v2051_v40 = vsub.f32 %v2035_v26, %v2009_v33  ;;  %v2004_v63 = vadd.f32 %v2386_v1, %v2348_v58  ;;  %v2012_v42 = vadd.f32 %v3342_v37, %v2011_v10 }
 0x280   : > { %2070 = vst.msk [vmem:[%s3360_s25 + $0x70] sm:$0xff] %vm2055_vm9, %v2053_v38  ;;  %v2054_v34 = vsub.f32 %v2038_v16, %v2020_v15 }
 0x281   : > { %2066 = vst.msk [vmem:[%s3360_s25 + $0x50] sm:$0xff] %vm2055_vm9, %v2049_v27  ;;  %2068 = vst.msk [vmem:[%s3360_s25 + $0x60] sm:$0xff] %vm2055_vm9, %v2051_v40  ;;  %v2050_v5 = vsub.f32 %v2034_v17, %v2004_v63  ;;  %v2052_v45 = vsub.f32 %v2036_v44, %v2012_v42 }
 0x282   : > { %2071 = vst.msk [vmem:[%s3360_s25 + $0x78] sm:$0xff] %vm2055_vm9, %v2054_v34 }
 0x283   : > { %2067 = vst.msk [vmem:[%s3360_s25 + $0x58] sm:$0xff] %vm2055_vm9, %v2050_v5  ;;  %2069 = vst.msk [vmem:[%s3360_s25 + $0x68] sm:$0xff] %vm2055_vm9, %v2052_v45 }
 0x284 PF: > { %s20_s13 = sadd.s32 1, %s2457_s13  }
 0x285   : > { %p17_p8 = scmp.ge.s32.totalorder %s20_s13, 9  }
 0x287   :  { %19 = sbr.rel (!%p17_p8) target bundleno = 1 (0x1), region = 108 }

</bundles_post_ra>
